<compile_context>
chip_gen: v7x
topology: tpu7x:2x2x1
jax: 0.10.0
libtpu: 0.0.40
codegen_flags: <defaults>
</compile_context>

<pallas_src>
import functools

import jax
import jax.numpy as jnp
from jax import lax
from jax.experimental import pallas as pl
from jax.experimental.pallas import tpu as pltpu


# --------------------------------------------------------------------------
# Fused PosEncoder kernel
# --------------------------------------------------------------------------
def _pos_encoder_kernel(
    xp_ref,      # (S*B, 2E)  row block t = [x[t] | x[S-1-t]]
    wih_ref,     # (2E, 6E)   input weights, cols [r_f|r_b|z_f|z_b|n_f|n_b]
    whh_ref,     # (2E, 6E)   block-diagonal hidden weights, same col layout
    bi_ref,      # (1, 6E)    r/z cols = bih+bhh (folded); n cols = bih_n
    bhn_ref,     # (1, 2E)    [bhh_n_f | bhh_n_b] (stays inside r * (...))
    b1_ref,      # (1, H)
    b2_ref,      # (1, E)
    w1_hbm,      # (2E, H)    memory_space=ANY — DMA'd under the recurrence
    w2_hbm,      # (H, E)     memory_space=ANY
    o_ref,       # (S*B, E)
    gi_scr,      # (S*B, 6E)  hoisted input projections (both directions)
    y_scr,       # (S*B, 2E)  [h_fwd | h_bwd] per sequence position
    w1_scr,      # (2E, H)    VMEM landing buffer for W1
    w2_scr,      # (H, E)     VMEM landing buffer for W2
    sem,         # DMA semaphores, shape (2,)
    *, seq_len, batch, embd, unroll,
):
    S, B, E = seq_len, batch, embd

    # Kick off the MLP-weight DMAs; they complete under the serial recurrence.
    w1_cp = pltpu.make_async_copy(w1_hbm, w1_scr, sem.at[0])
    w2_cp = pltpu.make_async_copy(w2_hbm, w2_scr, sem.at[1])
    w1_cp.start()
    w2_cp.start()

    xp = xp_ref[...]                                         # (S*B, 2E)

    # Hoisted input projection: ONE matmul covers both directions and all
    # three gates; r/z biases were folded with the hidden biases at pack time.
    gi_scr[...] = (jnp.dot(xp, wih_ref[...],
                           preferred_element_type=jnp.float32) + bi_ref[...])

    whh = whh_ref[...]                                       # loop invariant
    bhn = jnp.broadcast_to(bhn_ref[...], (B, 2 * E))         # hoisted broadcast

    def step(t, h):                                          # h = [h_f | h_b]
        fo = pl.multiple_of(t * B, B)                        # forward rows
        bo = pl.multiple_of((S - 1 - t) * B, B)              # backward rows
        gi_rz = gi_scr[pl.ds(fo, B), 0:4 * E]                # (B, 4E) vreg-aligned
        gi_n = gi_scr[pl.ds(fo, B), 4 * E:6 * E]             # (B, 2E)
        gh = jnp.dot(h, whh, preferred_element_type=jnp.float32)  # 1 MXU push
        rz = jax.nn.sigmoid(gi_rz + gh[:, 0:4 * E])          # 1 EUP push, both dirs
        r = rz[:, 0:2 * E]                                   # [r_f | r_b]
        z = rz[:, 2 * E:4 * E]                               # [z_f | z_b]
        n = jnp.tanh(gi_n + r * (gh[:, 4 * E:] + bhn))       # 1 EUP push
        h = h + (1.0 - z) * (n - h)                          # 3 VALU ops
        y_scr[pl.ds(fo, B), 0:E] = h[:, 0:E]                 # forward hidden
        y_scr[pl.ds(bo, B), E:2 * E] = h[:, E:2 * E]         # backward hidden
        return h

    h0 = jnp.zeros((B, 2 * E), jnp.float32)
    lax.fori_loop(0, S, step, h0, unroll=unroll)

    # MLP + residual. y_scr columns are [h_fwd | h_bwd], matching W1's rows,
    # so a single K=2E matmul replaces the split pair (no concat materializes).
    w1_cp.wait()
    w2_cp.wait()
    z1 = (jnp.dot(y_scr[...], w1_scr[...], preferred_element_type=jnp.float32)
          + b1_ref[...])
    z1 = jnp.maximum(z1, 0.0)
    z2 = (jnp.dot(z1, w2_scr[...], preferred_element_type=jnp.float32)
          + b2_ref[...])
    o_ref[...] = xp[:, 0:E] + z2


# --------------------------------------------------------------------------
# Wrapper-side weight repacking (one time)
# --------------------------------------------------------------------------
def pack_params(p):
    E = p["wih_f"].shape[0]
    Z = jnp.zeros((E, E), jnp.float32)

    def g(w):  # split (E, 3E) gate columns [r|z|n]
        return w[:, :E], w[:, E:2 * E], w[:, 2 * E:]

    wfr, wfz, wfn = g(p["wih_f"])
    wbr, wbz, wbn = g(p["wih_b"])
    hfr, hfz, hfn = g(p["whh_f"])
    hbr, hbz, hbn = g(p["whh_b"])
    # column layout [r_f | r_b | z_f | z_b | n_f | n_b]; top row-block is the
    # forward-direction input (x[t] / h_f), bottom is backward (x[S-1-t]/h_b).
    wih = jnp.concatenate([
        jnp.concatenate([wfr, Z,   wfz, Z,   wfn, Z  ], axis=1),
        jnp.concatenate([Z,   wbr, Z,   wbz, Z,   wbn], axis=1)], axis=0)
    whh = jnp.concatenate([
        jnp.concatenate([hfr, Z,   hfz, Z,   hfn, Z  ], axis=1),
        jnp.concatenate([Z,   hbr, Z,   hbz, Z,   hbn], axis=1)], axis=0)

    def gb(b):  # split (1, 3E) bias columns [r|z|n]
        return b[:, :E], b[:, E:2 * E], b[:, 2 * E:]

    bifr, bifz, bifn = gb(p["bih_f"])
    bhfr, bhfz, bhfn = gb(p["bhh_f"])
    bibr, bibz, bibn = gb(p["bih_b"])
    bhbr, bhbz, bhbn = gb(p["bhh_b"])
    bi = jnp.concatenate([bifr + bhfr, bibr + bhbr,
                          bifz + bhfz, bibz + bhbz,
                          bifn,        bibn], axis=1)        # (1, 6E)
    bhn = jnp.concatenate([bhfn, bhbn], axis=1)              # (1, 2E)
    return dict(wih=wih, whh=whh, bi=bi, bhn=bhn,
                w1=p["w1"], b1=p["b1"], w2=p["w2"], b2=p["b2"])


@jax.jit
def pos_encoder(x, packed):
    S, B, E = x.shape
    H = packed["w1"].shape[1]
    # Row block t of x_pair = [x[t] | x[S-1-t]]: both GRU chains read the SAME
    # contiguous row block at every step (no per-step reversal inside).
    x_pair = jnp.concatenate([x, x[::-1]], axis=-1).reshape(S * B, 2 * E)

    vmem = pl.BlockSpec(memory_space=pltpu.MemorySpace.VMEM)
    anyspace = pl.BlockSpec(memory_space=pl.ANY)
    kernel = functools.partial(
        _pos_encoder_kernel, seq_len=S, batch=B, embd=E,
        unroll=max(1, min(S, 8)))

    out2 = pl.pallas_call(
        kernel,
        out_shape=jax.ShapeDtypeStruct((S * B, E), jnp.float32),
        in_specs=[vmem] * 7 + [anyspace] * 2,
        out_specs=vmem,
        scratch_shapes=[
            pltpu.VMEM((S * B, 6 * E), jnp.float32),   # gi, both directions
            pltpu.VMEM((S * B, 2 * E), jnp.float32),   # [h_fwd | h_bwd]
            pltpu.VMEM((2 * E, H), jnp.float32),       # W1 landing buffer
            pltpu.VMEM((H, E), jnp.float32),           # W2 landing buffer
            pltpu.SemaphoreType.DMA((2,)),
        ],
    )(x_pair, packed["wih"], packed["whh"], packed["bi"], packed["bhn"],
      packed["b1"], packed["b2"], packed["w1"], packed["w2"])

    return out2.reshape(S, B, E)


# --------------------------------------------------------------------------
# Pure-JAX reference (same weight layout) for correctness check
# --------------------------------------------------------------------------
def _ref_gru_dir(x, wih, whh, bih, bhh, reverse):
    S, B, E = x.shape
    xs = x[::-1] if reverse else x

    def step(h, x_t):
        gi = x_t @ wih + bih
        gh = h @ whh + bhh
        r = jax.nn.sigmoid(gi[:, :E] + gh[:, :E])
        z = jax.nn.sigmoid(gi[:, E:2 * E] + gh[:, E:2 * E])
        n = jnp.tanh(gi[:, 2 * E:] + r * gh[:, 2 * E:])
        h_new = (1.0 - z) * n + z * h
        return h_new, h_new

    _, ys = lax.scan(step, jnp.zeros((B, E), jnp.float32), xs)
    return ys[::-1] if reverse else ys


def _ref_pos_encoder(x, p):
    S, B, E = x.shape
    yf = _ref_gru_dir(x, p["wih_f"], p["whh_f"], p["bih_f"], p["bhh_f"], False)
    yb = _ref_gru_dir(x, p["wih_b"], p["whh_b"], p["bih_b"], p["bhh_b"], True)
    h = jnp.concatenate([yf, yb], axis=-1).reshape(S * B, 2 * E)
    z1 = jnp.maximum(h @ p["w1"] + p["b1"], 0.0)
    z2 = z1 @ p["w2"] + p["b2"]
    return x + z2.reshape(S, B, E)


# --------------------------------------------------------------------------
# Deterministic parameter init (shapes per nn.GRU(E,E,bidirectional) + MLP)
# --------------------------------------------------------------------------
def init_params(key, E, hidden_mlp=1024):
    std_g = 1.0 / jnp.sqrt(E)
    keys = jax.random.split(key, 12)
    u = lambda k, shape, s: jax.random.uniform(k, shape, jnp.float32, -s, s)
    return {
        # per-direction weights, gates [r|z|n] packed along columns, stored
        # pre-transposed for x @ W
        "wih_f": u(keys[0], (E, 3 * E), std_g),
        "whh_f": u(keys[1], (E, 3 * E), std_g),
        "bih_f": u(keys[2], (1, 3 * E), std_g),
        "bhh_f": u(keys[3], (1, 3 * E), std_g),
        "wih_b": u(keys[4], (E, 3 * E), std_g),
        "whh_b": u(keys[5], (E, 3 * E), std_g),
        "bih_b": u(keys[6], (1, 3 * E), std_g),
        "bhh_b": u(keys[7], (1, 3 * E), std_g),
        # mlp: Linear(2E, 1024) -> ReLU -> Linear(1024, E)
        "w1": u(keys[8], (2 * E, hidden_mlp), 1.0 / jnp.sqrt(2 * E)),
        "b1": u(keys[9], (1, hidden_mlp), 1.0 / jnp.sqrt(2 * E)),
        "w2": u(keys[10], (hidden_mlp, E), 1.0 / jnp.sqrt(hidden_mlp)),
        "b2": u(keys[11], (1, E), 1.0 / jnp.sqrt(hidden_mlp)),
    }


if __name__ == "__main__":
    S, B, E = 8, 8, 32  # seq, batch, embd_dim
    key = jax.random.PRNGKey(0)
    kx, kp = jax.random.split(key)
    x = jax.random.normal(kx, (S, B, E), jnp.float32)
    params = init_params(kp, E)
    packed = pack_params(params)

    out = pos_encoder(x, packed)
    out = jax.block_until_ready(out)

    ref = _ref_pos_encoder(x, params)
    assert out.shape == (S, B, E)
    assert jnp.allclose(out, ref, atol=2e-4, rtol=2e-4), (
        f"max abs err {jnp.max(jnp.abs(out - ref))}")
    print("KERNEL_OK")
</pallas_src>

<mosaic_0001>
module attributes {stable_mosaic.version = 11 : i64} {
  func.func @_pos_encoder_kernel(%arg0: memref<64x64xf32, #tpu.memory_space<vmem>>, %arg1: memref<64x192xf32, #tpu.memory_space<vmem>>, %arg2: memref<64x192xf32, #tpu.memory_space<vmem>>, %arg3: memref<1x192xf32, #tpu.memory_space<vmem>>, %arg4: memref<1x64xf32, #tpu.memory_space<vmem>>, %arg5: memref<1x1024xf32, #tpu.memory_space<vmem>>, %arg6: memref<1x32xf32, #tpu.memory_space<vmem>>, %arg7: memref<64x1024xf32, #tpu.memory_space<any>>, %arg8: memref<1024x32xf32, #tpu.memory_space<any>>, %arg9: memref<64x32xf32, #tpu.memory_space<vmem>>, %arg10: memref<64x192xf32, #tpu.memory_space<vmem>>, %arg11: memref<64x64xf32, #tpu.memory_space<vmem>>, %arg12: memref<64x1024xf32, #tpu.memory_space<vmem>>, %arg13: memref<1024x32xf32, #tpu.memory_space<vmem>>, %arg14: memref<2x!tpu.dma_semaphore, #tpu.memory_space<semaphore_mem>>) attributes {dimension_semantics = [], scalar_prefetch = 0 : i64, scratch_operands = 5 : i64, tpu.core_type = #tpu.core_type<tc>} {
    %c0_i32 = arith.constant 0 : i32
    %0 = tpu.memref_slice %arg14[%c0_i32] : memref<2x!tpu.dma_semaphore, #tpu.memory_space<semaphore_mem>> -> memref<1x!tpu.dma_semaphore, #tpu.memory_space<semaphore_mem>>
    %1 = tpu.memref_squeeze %0 : memref<1x!tpu.dma_semaphore, #tpu.memory_space<semaphore_mem>> -> memref<!tpu.dma_semaphore, #tpu.memory_space<semaphore_mem>>
    tpu.enqueue_dma source(%arg7 : memref<64x1024xf32, #tpu.memory_space<any>>) target(%arg12 : memref<64x1024xf32, #tpu.memory_space<vmem>>) target_semaphore(%1 : memref<!tpu.dma_semaphore, #tpu.memory_space<semaphore_mem>>)
    %c1_i32 = arith.constant 1 : i32
    %2 = tpu.memref_slice %arg14[%c1_i32] : memref<2x!tpu.dma_semaphore, #tpu.memory_space<semaphore_mem>> -> memref<1x!tpu.dma_semaphore, #tpu.memory_space<semaphore_mem>>
    %3 = tpu.memref_squeeze %2 : memref<1x!tpu.dma_semaphore, #tpu.memory_space<semaphore_mem>> -> memref<!tpu.dma_semaphore, #tpu.memory_space<semaphore_mem>>
    tpu.enqueue_dma source(%arg8 : memref<1024x32xf32, #tpu.memory_space<any>>) target(%arg13 : memref<1024x32xf32, #tpu.memory_space<vmem>>) target_semaphore(%3 : memref<!tpu.dma_semaphore, #tpu.memory_space<semaphore_mem>>)
    %c0 = arith.constant 0 : index
    %c0_0 = arith.constant 0 : index
    %4 = vector.load %arg0[%c0, %c0_0] : memref<64x64xf32, #tpu.memory_space<vmem>>, vector<64x64xf32>
    %c0_1 = arith.constant 0 : index
    %c0_2 = arith.constant 0 : index
    %5 = vector.load %arg1[%c0_1, %c0_2] : memref<64x192xf32, #tpu.memory_space<vmem>>, vector<64x192xf32>
    %cst = arith.constant dense<0.000000e+00> : vector<64x192xf32>
    %6 = tpu.matmul %4, %5, %cst {dimension_numbers = #tpu.dot_dimension_numbers<[1], [0], [0], [1], [0, 0, 1, 1], [], []>} : vector<64x64xf32>, vector<64x192xf32>, vector<64x192xf32> -> vector<64x192xf32>
    %c0_3 = arith.constant 0 : index
    %c0_4 = arith.constant 0 : index
    %7 = vector.load %arg3[%c0_3, %c0_4] : memref<1x192xf32, #tpu.memory_space<vmem>>, vector<1x192xf32>
    %8 = vector.broadcast %7 : vector<1x192xf32> to vector<64x192xf32>
    %9 = arith.addf %6, %8 : vector<64x192xf32>
    %c0_5 = arith.constant 0 : index
    %c0_6 = arith.constant 0 : index
    %10 = vector.load %arg10[%c0_5, %c0_6] : memref<64x192xf32, #tpu.memory_space<vmem>>, vector<64x192xf32>
    tpu.vector_store %arg10[%c0_5, %c0_6], %9 {strides = array<i32>} : memref<64x192xf32, #tpu.memory_space<vmem>>, vector<64x192xf32>,
    %c0_7 = arith.constant 0 : index
    %c0_8 = arith.constant 0 : index
    %11 = vector.load %arg2[%c0_7, %c0_8] : memref<64x192xf32, #tpu.memory_space<vmem>>, vector<64x192xf32>
    %c0_9 = arith.constant 0 : index
    %c0_10 = arith.constant 0 : index
    %12 = vector.load %arg4[%c0_9, %c0_10] : memref<1x64xf32, #tpu.memory_space<vmem>>, vector<1x64xf32>
    %13 = vector.shape_cast %12 : vector<1x64xf32> to vector<1x64xf32>
    %14 = vector.broadcast %13 : vector<1x64xf32> to vector<8x64xf32>
    %cst_11 = arith.constant 0.000000e+00 : f32
    %15 = vector.broadcast %cst_11 : f32 to vector<8x64xf32>
    %c0_i32_12 = arith.constant 0 : i32
    %c8_i32 = arith.constant 8 : i32
    %16 = arith.muli %c0_i32_12, %c8_i32 : i32
    %17 = tpu.assume_multiple %16, 8 : i32
    %c7_i32 = arith.constant 7 : i32
    %18 = arith.subi %c7_i32, %c0_i32_12 : i32
    %c8_i32_13 = arith.constant 8 : i32
    %19 = arith.muli %18, %c8_i32_13 : i32
    %20 = tpu.assume_multiple %19, 8 : i32
    %21 = arith.index_cast %17 : i32 to index
    %c0_14 = arith.constant 0 : index
    %22 = vector.load %arg10[%21, %c0_14] : memref<64x192xf32, #tpu.memory_space<vmem>>, vector<8x128xf32>
    %23 = arith.index_cast %17 : i32 to index
    %c128 = arith.constant 128 : index
    %24 = vector.load %arg10[%23, %c128] : memref<64x192xf32, #tpu.memory_space<vmem>>, vector<8x64xf32>
    %cst_15 = arith.constant dense<0.000000e+00> : vector<8x192xf32>
    %25 = tpu.matmul %15, %11, %cst_15 {dimension_numbers = #tpu.dot_dimension_numbers<[1], [0], [0], [1], [0, 0, 1, 1], [], []>} : vector<8x64xf32>, vector<64x192xf32>, vector<8x192xf32> -> vector<8x192xf32>
    %26 = vector.extract_strided_slice %25 {offsets = [0, 0], sizes = [8, 128], strides = [1, 1]} : vector<8x192xf32> to vector<8x128xf32>
    %27 = arith.addf %22, %26 : vector<8x128xf32>
    %28 = arith.negf %27 : vector<8x128xf32>
    %29 = math.exp %28 : vector<8x128xf32>
    %cst_16 = arith.constant 1.000000e+00 : f32
    %30 = vector.broadcast %cst_16 : f32 to vector<8x128xf32>
    %31 = arith.addf %30, %29 : vector<8x128xf32>
    %32 = arith.divf %30, %31 : vector<8x128xf32>
    %33 = vector.extract_strided_slice %32 {offsets = [0, 0], sizes = [8, 64], strides = [1, 1]} : vector<8x128xf32> to vector<8x64xf32>
    %34 = vector.extract_strided_slice %32 {offsets = [0, 64], sizes = [8, 64], strides = [1, 1]} : vector<8x128xf32> to vector<8x64xf32>
    %35 = vector.extract_strided_slice %25 {offsets = [0, 128], sizes = [8, 64], strides = [1, 1]} : vector<8x192xf32> to vector<8x64xf32>
    %36 = arith.addf %35, %14 : vector<8x64xf32>
    %37 = arith.mulf %33, %36 : vector<8x64xf32>
    %38 = arith.addf %24, %37 : vector<8x64xf32>
    %39 = math.tanh %38 : vector<8x64xf32>
    %cst_17 = arith.constant 1.000000e+00 : f32
    %40 = vector.broadcast %cst_17 : f32 to vector<8x64xf32>
    %41 = arith.subf %40, %34 : vector<8x64xf32>
    %42 = arith.subf %39, %15 : vector<8x64xf32>
    %43 = arith.mulf %41, %42 : vector<8x64xf32>
    %44 = arith.addf %15, %43 : vector<8x64xf32>
    %45 = vector.extract_strided_slice %44 {offsets = [0, 0], sizes = [8, 32], strides = [1, 1]} : vector<8x64xf32> to vector<8x32xf32>
    %46 = arith.index_cast %17 : i32 to index
    %c0_18 = arith.constant 0 : index
    %47 = vector.load %arg11[%46, %c0_18] : memref<64x64xf32, #tpu.memory_space<vmem>>, vector<8x32xf32>
    tpu.vector_store %arg11[%46, %c0_18], %45 {strides = array<i32>} : memref<64x64xf32, #tpu.memory_space<vmem>>, vector<8x32xf32>,
    %48 = vector.extract_strided_slice %44 {offsets = [0, 32], sizes = [8, 32], strides = [1, 1]} : vector<8x64xf32> to vector<8x32xf32>
    %49 = arith.index_cast %20 : i32 to index
    %c32 = arith.constant 32 : index
    %50 = vector.load %arg11[%49, %c32] : memref<64x64xf32, #tpu.memory_space<vmem>>, vector<8x32xf32>
    tpu.vector_store %arg11[%49, %c32], %48 {strides = array<i32>} : memref<64x64xf32, #tpu.memory_space<vmem>>, vector<8x32xf32>,
    %c1_i32_19 = arith.constant 1 : i32
    %c8_i32_20 = arith.constant 8 : i32
    %51 = arith.muli %c1_i32_19, %c8_i32_20 : i32
    %52 = tpu.assume_multiple %51, 8 : i32
    %c7_i32_21 = arith.constant 7 : i32
    %53 = arith.subi %c7_i32_21, %c1_i32_19 : i32
    %c8_i32_22 = arith.constant 8 : i32
    %54 = arith.muli %53, %c8_i32_22 : i32
    %55 = tpu.assume_multiple %54, 8 : i32
    %56 = arith.index_cast %52 : i32 to index
    %c0_23 = arith.constant 0 : index
    %57 = vector.load %arg10[%56, %c0_23] : memref<64x192xf32, #tpu.memory_space<vmem>>, vector<8x128xf32>
    %58 = arith.index_cast %52 : i32 to index
    %c128_24 = arith.constant 128 : index
    %59 = vector.load %arg10[%58, %c128_24] : memref<64x192xf32, #tpu.memory_space<vmem>>, vector<8x64xf32>
    %cst_25 = arith.constant dense<0.000000e+00> : vector<8x192xf32>
    %60 = tpu.matmul %44, %11, %cst_25 {dimension_numbers = #tpu.dot_dimension_numbers<[1], [0], [0], [1], [0, 0, 1, 1], [], []>} : vector<8x64xf32>, vector<64x192xf32>, vector<8x192xf32> -> vector<8x192xf32>
    %61 = vector.extract_strided_slice %60 {offsets = [0, 0], sizes = [8, 128], strides = [1, 1]} : vector<8x192xf32> to vector<8x128xf32>
    %62 = arith.addf %57, %61 : vector<8x128xf32>
    %63 = arith.negf %62 : vector<8x128xf32>
    %64 = math.exp %63 : vector<8x128xf32>
    %cst_26 = arith.constant 1.000000e+00 : f32
    %65 = vector.broadcast %cst_26 : f32 to vector<8x128xf32>
    %66 = arith.addf %65, %64 : vector<8x128xf32>
    %67 = arith.divf %65, %66 : vector<8x128xf32>
    %68 = vector.extract_strided_slice %67 {offsets = [0, 0], sizes = [8, 64], strides = [1, 1]} : vector<8x128xf32> to vector<8x64xf32>
    %69 = vector.extract_strided_slice %67 {offsets = [0, 64], sizes = [8, 64], strides = [1, 1]} : vector<8x128xf32> to vector<8x64xf32>
    %70 = vector.extract_strided_slice %60 {offsets = [0, 128], sizes = [8, 64], strides = [1, 1]} : vector<8x192xf32> to vector<8x64xf32>
    %71 = arith.addf %70, %14 : vector<8x64xf32>
    %72 = arith.mulf %68, %71 : vector<8x64xf32>
    %73 = arith.addf %59, %72 : vector<8x64xf32>
    %74 = math.tanh %73 : vector<8x64xf32>
    %cst_27 = arith.constant 1.000000e+00 : f32
    %75 = vector.broadcast %cst_27 : f32 to vector<8x64xf32>
    %76 = arith.subf %75, %69 : vector<8x64xf32>
    %77 = arith.subf %74, %44 : vector<8x64xf32>
    %78 = arith.mulf %76, %77 : vector<8x64xf32>
    %79 = arith.addf %44, %78 : vector<8x64xf32>
    %80 = vector.extract_strided_slice %79 {offsets = [0, 0], sizes = [8, 32], strides = [1, 1]} : vector<8x64xf32> to vector<8x32xf32>
    %81 = arith.index_cast %52 : i32 to index
    %c0_28 = arith.constant 0 : index
    %82 = vector.load %arg11[%81, %c0_28] : memref<64x64xf32, #tpu.memory_space<vmem>>, vector<8x32xf32>
    tpu.vector_store %arg11[%81, %c0_28], %80 {strides = array<i32>} : memref<64x64xf32, #tpu.memory_space<vmem>>, vector<8x32xf32>,
    %83 = vector.extract_strided_slice %79 {offsets = [0, 32], sizes = [8, 32], strides = [1, 1]} : vector<8x64xf32> to vector<8x32xf32>
    %84 = arith.index_cast %55 : i32 to index
    %c32_29 = arith.constant 32 : index
    %85 = vector.load %arg11[%84, %c32_29] : memref<64x64xf32, #tpu.memory_space<vmem>>, vector<8x32xf32>
    tpu.vector_store %arg11[%84, %c32_29], %83 {strides = array<i32>} : memref<64x64xf32, #tpu.memory_space<vmem>>, vector<8x32xf32>,
    %c2_i32 = arith.constant 2 : i32
    %c8_i32_30 = arith.constant 8 : i32
    %86 = arith.muli %c2_i32, %c8_i32_30 : i32
    %87 = tpu.assume_multiple %86, 8 : i32
    %c7_i32_31 = arith.constant 7 : i32
    %88 = arith.subi %c7_i32_31, %c2_i32 : i32
    %c8_i32_32 = arith.constant 8 : i32
    %89 = arith.muli %88, %c8_i32_32 : i32
    %90 = tpu.assume_multiple %89, 8 : i32
    %91 = arith.index_cast %87 : i32 to index
    %c0_33 = arith.constant 0 : index
    %92 = vector.load %arg10[%91, %c0_33] : memref<64x192xf32, #tpu.memory_space<vmem>>, vector<8x128xf32>
    %93 = arith.index_cast %87 : i32 to index
    %c128_34 = arith.constant 128 : index
    %94 = vector.load %arg10[%93, %c128_34] : memref<64x192xf32, #tpu.memory_space<vmem>>, vector<8x64xf32>
    %cst_35 = arith.constant dense<0.000000e+00> : vector<8x192xf32>
    %95 = tpu.matmul %79, %11, %cst_35 {dimension_numbers = #tpu.dot_dimension_numbers<[1], [0], [0], [1], [0, 0, 1, 1], [], []>} : vector<8x64xf32>, vector<64x192xf32>, vector<8x192xf32> -> vector<8x192xf32>
    %96 = vector.extract_strided_slice %95 {offsets = [0, 0], sizes = [8, 128], strides = [1, 1]} : vector<8x192xf32> to vector<8x128xf32>
    %97 = arith.addf %92, %96 : vector<8x128xf32>
    %98 = arith.negf %97 : vector<8x128xf32>
    %99 = math.exp %98 : vector<8x128xf32>
    %cst_36 = arith.constant 1.000000e+00 : f32
    %100 = vector.broadcast %cst_36 : f32 to vector<8x128xf32>
    %101 = arith.addf %100, %99 : vector<8x128xf32>
    %102 = arith.divf %100, %101 : vector<8x128xf32>
    %103 = vector.extract_strided_slice %102 {offsets = [0, 0], sizes = [8, 64], strides = [1, 1]} : vector<8x128xf32> to vector<8x64xf32>
    %104 = vector.extract_strided_slice %102 {offsets = [0, 64], sizes = [8, 64], strides = [1, 1]} : vector<8x128xf32> to vector<8x64xf32>
    %105 = vector.extract_strided_slice %95 {offsets = [0, 128], sizes = [8, 64], strides = [1, 1]} : vector<8x192xf32> to vector<8x64xf32>
    %106 = arith.addf %105, %14 : vector<8x64xf32>
    %107 = arith.mulf %103, %106 : vector<8x64xf32>
    %108 = arith.addf %94, %107 : vector<8x64xf32>
    %109 = math.tanh %108 : vector<8x64xf32>
    %cst_37 = arith.constant 1.000000e+00 : f32
    %110 = vector.broadcast %cst_37 : f32 to vector<8x64xf32>
    %111 = arith.subf %110, %104 : vector<8x64xf32>
    %112 = arith.subf %109, %79 : vector<8x64xf32>
    %113 = arith.mulf %111, %112 : vector<8x64xf32>
    %114 = arith.addf %79, %113 : vector<8x64xf32>
    %115 = vector.extract_strided_slice %114 {offsets = [0, 0], sizes = [8, 32], strides = [1, 1]} : vector<8x64xf32> to vector<8x32xf32>
    %116 = arith.index_cast %87 : i32 to index
    %c0_38 = arith.constant 0 : index
    %117 = vector.load %arg11[%116, %c0_38] : memref<64x64xf32, #tpu.memory_space<vmem>>, vector<8x32xf32>
    tpu.vector_store %arg11[%116, %c0_38], %115 {strides = array<i32>} : memref<64x64xf32, #tpu.memory_space<vmem>>, vector<8x32xf32>,
    %118 = vector.extract_strided_slice %114 {offsets = [0, 32], sizes = [8, 32], strides = [1, 1]} : vector<8x64xf32> to vector<8x32xf32>
    %119 = arith.index_cast %90 : i32 to index
    %c32_39 = arith.constant 32 : index
    %120 = vector.load %arg11[%119, %c32_39] : memref<64x64xf32, #tpu.memory_space<vmem>>, vector<8x32xf32>
    tpu.vector_store %arg11[%119, %c32_39], %118 {strides = array<i32>} : memref<64x64xf32, #tpu.memory_space<vmem>>, vector<8x32xf32>,
    %c3_i32 = arith.constant 3 : i32
    %c8_i32_40 = arith.constant 8 : i32
    %121 = arith.muli %c3_i32, %c8_i32_40 : i32
    %122 = tpu.assume_multiple %121, 8 : i32
    %c7_i32_41 = arith.constant 7 : i32
    %123 = arith.subi %c7_i32_41, %c3_i32 : i32
    %c8_i32_42 = arith.constant 8 : i32
    %124 = arith.muli %123, %c8_i32_42 : i32
    %125 = tpu.assume_multiple %124, 8 : i32
    %126 = arith.index_cast %122 : i32 to index
    %c0_43 = arith.constant 0 : index
    %127 = vector.load %arg10[%126, %c0_43] : memref<64x192xf32, #tpu.memory_space<vmem>>, vector<8x128xf32>
    %128 = arith.index_cast %122 : i32 to index
    %c128_44 = arith.constant 128 : index
    %129 = vector.load %arg10[%128, %c128_44] : memref<64x192xf32, #tpu.memory_space<vmem>>, vector<8x64xf32>
    %cst_45 = arith.constant dense<0.000000e+00> : vector<8x192xf32>
    %130 = tpu.matmul %114, %11, %cst_45 {dimension_numbers = #tpu.dot_dimension_numbers<[1], [0], [0], [1], [0, 0, 1, 1], [], []>} : vector<8x64xf32>, vector<64x192xf32>, vector<8x192xf32> -> vector<8x192xf32>
    %131 = vector.extract_strided_slice %130 {offsets = [0, 0], sizes = [8, 128], strides = [1, 1]} : vector<8x192xf32> to vector<8x128xf32>
    %132 = arith.addf %127, %131 : vector<8x128xf32>
    %133 = arith.negf %132 : vector<8x128xf32>
    %134 = math.exp %133 : vector<8x128xf32>
    %cst_46 = arith.constant 1.000000e+00 : f32
    %135 = vector.broadcast %cst_46 : f32 to vector<8x128xf32>
    %136 = arith.addf %135, %134 : vector<8x128xf32>
    %137 = arith.divf %135, %136 : vector<8x128xf32>
    %138 = vector.extract_strided_slice %137 {offsets = [0, 0], sizes = [8, 64], strides = [1, 1]} : vector<8x128xf32> to vector<8x64xf32>
    %139 = vector.extract_strided_slice %137 {offsets = [0, 64], sizes = [8, 64], strides = [1, 1]} : vector<8x128xf32> to vector<8x64xf32>
    %140 = vector.extract_strided_slice %130 {offsets = [0, 128], sizes = [8, 64], strides = [1, 1]} : vector<8x192xf32> to vector<8x64xf32>
    %141 = arith.addf %140, %14 : vector<8x64xf32>
    %142 = arith.mulf %138, %141 : vector<8x64xf32>
    %143 = arith.addf %129, %142 : vector<8x64xf32>
    %144 = math.tanh %143 : vector<8x64xf32>
    %cst_47 = arith.constant 1.000000e+00 : f32
    %145 = vector.broadcast %cst_47 : f32 to vector<8x64xf32>
    %146 = arith.subf %145, %139 : vector<8x64xf32>
    %147 = arith.subf %144, %114 : vector<8x64xf32>
    %148 = arith.mulf %146, %147 : vector<8x64xf32>
    %149 = arith.addf %114, %148 : vector<8x64xf32>
    %150 = vector.extract_strided_slice %149 {offsets = [0, 0], sizes = [8, 32], strides = [1, 1]} : vector<8x64xf32> to vector<8x32xf32>
    %151 = arith.index_cast %122 : i32 to index
    %c0_48 = arith.constant 0 : index
    %152 = vector.load %arg11[%151, %c0_48] : memref<64x64xf32, #tpu.memory_space<vmem>>, vector<8x32xf32>
    tpu.vector_store %arg11[%151, %c0_48], %150 {strides = array<i32>} : memref<64x64xf32, #tpu.memory_space<vmem>>, vector<8x32xf32>,
    %153 = vector.extract_strided_slice %149 {offsets = [0, 32], sizes = [8, 32], strides = [1, 1]} : vector<8x64xf32> to vector<8x32xf32>
    %154 = arith.index_cast %125 : i32 to index
    %c32_49 = arith.constant 32 : index
    %155 = vector.load %arg11[%154, %c32_49] : memref<64x64xf32, #tpu.memory_space<vmem>>, vector<8x32xf32>
    tpu.vector_store %arg11[%154, %c32_49], %153 {strides = array<i32>} : memref<64x64xf32, #tpu.memory_space<vmem>>, vector<8x32xf32>,
    %c4_i32 = arith.constant 4 : i32
    %c8_i32_50 = arith.constant 8 : i32
    %156 = arith.muli %c4_i32, %c8_i32_50 : i32
    %157 = tpu.assume_multiple %156, 8 : i32
    %c7_i32_51 = arith.constant 7 : i32
    %158 = arith.subi %c7_i32_51, %c4_i32 : i32
    %c8_i32_52 = arith.constant 8 : i32
    %159 = arith.muli %158, %c8_i32_52 : i32
    %160 = tpu.assume_multiple %159, 8 : i32
    %161 = arith.index_cast %157 : i32 to index
    %c0_53 = arith.constant 0 : index
    %162 = vector.load %arg10[%161, %c0_53] : memref<64x192xf32, #tpu.memory_space<vmem>>, vector<8x128xf32>
    %163 = arith.index_cast %157 : i32 to index
    %c128_54 = arith.constant 128 : index
    %164 = vector.load %arg10[%163, %c128_54] : memref<64x192xf32, #tpu.memory_space<vmem>>, vector<8x64xf32>
    %cst_55 = arith.constant dense<0.000000e+00> : vector<8x192xf32>
    %165 = tpu.matmul %149, %11, %cst_55 {dimension_numbers = #tpu.dot_dimension_numbers<[1], [0], [0], [1], [0, 0, 1, 1], [], []>} : vector<8x64xf32>, vector<64x192xf32>, vector<8x192xf32> -> vector<8x192xf32>
    %166 = vector.extract_strided_slice %165 {offsets = [0, 0], sizes = [8, 128], strides = [1, 1]} : vector<8x192xf32> to vector<8x128xf32>
    %167 = arith.addf %162, %166 : vector<8x128xf32>
    %168 = arith.negf %167 : vector<8x128xf32>
    %169 = math.exp %168 : vector<8x128xf32>
    %cst_56 = arith.constant 1.000000e+00 : f32
    %170 = vector.broadcast %cst_56 : f32 to vector<8x128xf32>
    %171 = arith.addf %170, %169 : vector<8x128xf32>
    %172 = arith.divf %170, %171 : vector<8x128xf32>
    %173 = vector.extract_strided_slice %172 {offsets = [0, 0], sizes = [8, 64], strides = [1, 1]} : vector<8x128xf32> to vector<8x64xf32>
    %174 = vector.extract_strided_slice %172 {offsets = [0, 64], sizes = [8, 64], strides = [1, 1]} : vector<8x128xf32> to vector<8x64xf32>
    %175 = vector.extract_strided_slice %165 {offsets = [0, 128], sizes = [8, 64], strides = [1, 1]} : vector<8x192xf32> to vector<8x64xf32>
    %176 = arith.addf %175, %14 : vector<8x64xf32>
    %177 = arith.mulf %173, %176 : vector<8x64xf32>
    %178 = arith.addf %164, %177 : vector<8x64xf32>
    %179 = math.tanh %178 : vector<8x64xf32>
    %cst_57 = arith.constant 1.000000e+00 : f32
    %180 = vector.broadcast %cst_57 : f32 to vector<8x64xf32>
    %181 = arith.subf %180, %174 : vector<8x64xf32>
    %182 = arith.subf %179, %149 : vector<8x64xf32>
    %183 = arith.mulf %181, %182 : vector<8x64xf32>
    %184 = arith.addf %149, %183 : vector<8x64xf32>
    %185 = vector.extract_strided_slice %184 {offsets = [0, 0], sizes = [8, 32], strides = [1, 1]} : vector<8x64xf32> to vector<8x32xf32>
    %186 = arith.index_cast %157 : i32 to index
    %c0_58 = arith.constant 0 : index
    %187 = vector.load %arg11[%186, %c0_58] : memref<64x64xf32, #tpu.memory_space<vmem>>, vector<8x32xf32>
    tpu.vector_store %arg11[%186, %c0_58], %185 {strides = array<i32>} : memref<64x64xf32, #tpu.memory_space<vmem>>, vector<8x32xf32>,
    %188 = vector.extract_strided_slice %184 {offsets = [0, 32], sizes = [8, 32], strides = [1, 1]} : vector<8x64xf32> to vector<8x32xf32>
    %189 = arith.index_cast %160 : i32 to index
    %c32_59 = arith.constant 32 : index
    %190 = vector.load %arg11[%189, %c32_59] : memref<64x64xf32, #tpu.memory_space<vmem>>, vector<8x32xf32>
    tpu.vector_store %arg11[%189, %c32_59], %188 {strides = array<i32>} : memref<64x64xf32, #tpu.memory_space<vmem>>, vector<8x32xf32>,
    %c5_i32 = arith.constant 5 : i32
    %c8_i32_60 = arith.constant 8 : i32
    %191 = arith.muli %c5_i32, %c8_i32_60 : i32
    %192 = tpu.assume_multiple %191, 8 : i32
    %c7_i32_61 = arith.constant 7 : i32
    %193 = arith.subi %c7_i32_61, %c5_i32 : i32
    %c8_i32_62 = arith.constant 8 : i32
    %194 = arith.muli %193, %c8_i32_62 : i32
    %195 = tpu.assume_multiple %194, 8 : i32
    %196 = arith.index_cast %192 : i32 to index
    %c0_63 = arith.constant 0 : index
    %197 = vector.load %arg10[%196, %c0_63] : memref<64x192xf32, #tpu.memory_space<vmem>>, vector<8x128xf32>
    %198 = arith.index_cast %192 : i32 to index
    %c128_64 = arith.constant 128 : index
    %199 = vector.load %arg10[%198, %c128_64] : memref<64x192xf32, #tpu.memory_space<vmem>>, vector<8x64xf32>
    %cst_65 = arith.constant dense<0.000000e+00> : vector<8x192xf32>
    %200 = tpu.matmul %184, %11, %cst_65 {dimension_numbers = #tpu.dot_dimension_numbers<[1], [0], [0], [1], [0, 0, 1, 1], [], []>} : vector<8x64xf32>, vector<64x192xf32>, vector<8x192xf32> -> vector<8x192xf32>
    %201 = vector.extract_strided_slice %200 {offsets = [0, 0], sizes = [8, 128], strides = [1, 1]} : vector<8x192xf32> to vector<8x128xf32>
    %202 = arith.addf %197, %201 : vector<8x128xf32>
    %203 = arith.negf %202 : vector<8x128xf32>
    %204 = math.exp %203 : vector<8x128xf32>
    %cst_66 = arith.constant 1.000000e+00 : f32
    %205 = vector.broadcast %cst_66 : f32 to vector<8x128xf32>
    %206 = arith.addf %205, %204 : vector<8x128xf32>
    %207 = arith.divf %205, %206 : vector<8x128xf32>
    %208 = vector.extract_strided_slice %207 {offsets = [0, 0], sizes = [8, 64], strides = [1, 1]} : vector<8x128xf32> to vector<8x64xf32>
    %209 = vector.extract_strided_slice %207 {offsets = [0, 64], sizes = [8, 64], strides = [1, 1]} : vector<8x128xf32> to vector<8x64xf32>
    %210 = vector.extract_strided_slice %200 {offsets = [0, 128], sizes = [8, 64], strides = [1, 1]} : vector<8x192xf32> to vector<8x64xf32>
    %211 = arith.addf %210, %14 : vector<8x64xf32>
    %212 = arith.mulf %208, %211 : vector<8x64xf32>
    %213 = arith.addf %199, %212 : vector<8x64xf32>
    %214 = math.tanh %213 : vector<8x64xf32>
    %cst_67 = arith.constant 1.000000e+00 : f32
    %215 = vector.broadcast %cst_67 : f32 to vector<8x64xf32>
    %216 = arith.subf %215, %209 : vector<8x64xf32>
    %217 = arith.subf %214, %184 : vector<8x64xf32>
    %218 = arith.mulf %216, %217 : vector<8x64xf32>
    %219 = arith.addf %184, %218 : vector<8x64xf32>
    %220 = vector.extract_strided_slice %219 {offsets = [0, 0], sizes = [8, 32], strides = [1, 1]} : vector<8x64xf32> to vector<8x32xf32>
    %221 = arith.index_cast %192 : i32 to index
    %c0_68 = arith.constant 0 : index
    %222 = vector.load %arg11[%221, %c0_68] : memref<64x64xf32, #tpu.memory_space<vmem>>, vector<8x32xf32>
    tpu.vector_store %arg11[%221, %c0_68], %220 {strides = array<i32>} : memref<64x64xf32, #tpu.memory_space<vmem>>, vector<8x32xf32>,
    %223 = vector.extract_strided_slice %219 {offsets = [0, 32], sizes = [8, 32], strides = [1, 1]} : vector<8x64xf32> to vector<8x32xf32>
    %224 = arith.index_cast %195 : i32 to index
    %c32_69 = arith.constant 32 : index
    %225 = vector.load %arg11[%224, %c32_69] : memref<64x64xf32, #tpu.memory_space<vmem>>, vector<8x32xf32>
    tpu.vector_store %arg11[%224, %c32_69], %223 {strides = array<i32>} : memref<64x64xf32, #tpu.memory_space<vmem>>, vector<8x32xf32>,
    %c6_i32 = arith.constant 6 : i32
    %c8_i32_70 = arith.constant 8 : i32
    %226 = arith.muli %c6_i32, %c8_i32_70 : i32
    %227 = tpu.assume_multiple %226, 8 : i32
    %c7_i32_71 = arith.constant 7 : i32
    %228 = arith.subi %c7_i32_71, %c6_i32 : i32
    %c8_i32_72 = arith.constant 8 : i32
    %229 = arith.muli %228, %c8_i32_72 : i32
    %230 = tpu.assume_multiple %229, 8 : i32
    %231 = arith.index_cast %227 : i32 to index
    %c0_73 = arith.constant 0 : index
    %232 = vector.load %arg10[%231, %c0_73] : memref<64x192xf32, #tpu.memory_space<vmem>>, vector<8x128xf32>
    %233 = arith.index_cast %227 : i32 to index
    %c128_74 = arith.constant 128 : index
    %234 = vector.load %arg10[%233, %c128_74] : memref<64x192xf32, #tpu.memory_space<vmem>>, vector<8x64xf32>
    %cst_75 = arith.constant dense<0.000000e+00> : vector<8x192xf32>
    %235 = tpu.matmul %219, %11, %cst_75 {dimension_numbers = #tpu.dot_dimension_numbers<[1], [0], [0], [1], [0, 0, 1, 1], [], []>} : vector<8x64xf32>, vector<64x192xf32>, vector<8x192xf32> -> vector<8x192xf32>
    %236 = vector.extract_strided_slice %235 {offsets = [0, 0], sizes = [8, 128], strides = [1, 1]} : vector<8x192xf32> to vector<8x128xf32>
    %237 = arith.addf %232, %236 : vector<8x128xf32>
    %238 = arith.negf %237 : vector<8x128xf32>
    %239 = math.exp %238 : vector<8x128xf32>
    %cst_76 = arith.constant 1.000000e+00 : f32
    %240 = vector.broadcast %cst_76 : f32 to vector<8x128xf32>
    %241 = arith.addf %240, %239 : vector<8x128xf32>
    %242 = arith.divf %240, %241 : vector<8x128xf32>
    %243 = vector.extract_strided_slice %242 {offsets = [0, 0], sizes = [8, 64], strides = [1, 1]} : vector<8x128xf32> to vector<8x64xf32>
    %244 = vector.extract_strided_slice %242 {offsets = [0, 64], sizes = [8, 64], strides = [1, 1]} : vector<8x128xf32> to vector<8x64xf32>
    %245 = vector.extract_strided_slice %235 {offsets = [0, 128], sizes = [8, 64], strides = [1, 1]} : vector<8x192xf32> to vector<8x64xf32>
    %246 = arith.addf %245, %14 : vector<8x64xf32>
    %247 = arith.mulf %243, %246 : vector<8x64xf32>
    %248 = arith.addf %234, %247 : vector<8x64xf32>
    %249 = math.tanh %248 : vector<8x64xf32>
    %cst_77 = arith.constant 1.000000e+00 : f32
    %250 = vector.broadcast %cst_77 : f32 to vector<8x64xf32>
    %251 = arith.subf %250, %244 : vector<8x64xf32>
    %252 = arith.subf %249, %219 : vector<8x64xf32>
    %253 = arith.mulf %251, %252 : vector<8x64xf32>
    %254 = arith.addf %219, %253 : vector<8x64xf32>
    %255 = vector.extract_strided_slice %254 {offsets = [0, 0], sizes = [8, 32], strides = [1, 1]} : vector<8x64xf32> to vector<8x32xf32>
    %256 = arith.index_cast %227 : i32 to index
    %c0_78 = arith.constant 0 : index
    %257 = vector.load %arg11[%256, %c0_78] : memref<64x64xf32, #tpu.memory_space<vmem>>, vector<8x32xf32>
    tpu.vector_store %arg11[%256, %c0_78], %255 {strides = array<i32>} : memref<64x64xf32, #tpu.memory_space<vmem>>, vector<8x32xf32>,
    %258 = vector.extract_strided_slice %254 {offsets = [0, 32], sizes = [8, 32], strides = [1, 1]} : vector<8x64xf32> to vector<8x32xf32>
    %259 = arith.index_cast %230 : i32 to index
    %c32_79 = arith.constant 32 : index
    %260 = vector.load %arg11[%259, %c32_79] : memref<64x64xf32, #tpu.memory_space<vmem>>, vector<8x32xf32>
    tpu.vector_store %arg11[%259, %c32_79], %258 {strides = array<i32>} : memref<64x64xf32, #tpu.memory_space<vmem>>, vector<8x32xf32>,
    %c7_i32_80 = arith.constant 7 : i32
    %c8_i32_81 = arith.constant 8 : i32
    %261 = arith.muli %c7_i32_80, %c8_i32_81 : i32
    %262 = tpu.assume_multiple %261, 8 : i32
    %c7_i32_82 = arith.constant 7 : i32
    %263 = arith.subi %c7_i32_82, %c7_i32_80 : i32
    %c8_i32_83 = arith.constant 8 : i32
    %264 = arith.muli %263, %c8_i32_83 : i32
    %265 = tpu.assume_multiple %264, 8 : i32
    %266 = arith.index_cast %262 : i32 to index
    %c0_84 = arith.constant 0 : index
    %267 = vector.load %arg10[%266, %c0_84] : memref<64x192xf32, #tpu.memory_space<vmem>>, vector<8x128xf32>
    %268 = arith.index_cast %262 : i32 to index
    %c128_85 = arith.constant 128 : index
    %269 = vector.load %arg10[%268, %c128_85] : memref<64x192xf32, #tpu.memory_space<vmem>>, vector<8x64xf32>
    %cst_86 = arith.constant dense<0.000000e+00> : vector<8x192xf32>
    %270 = tpu.matmul %254, %11, %cst_86 {dimension_numbers = #tpu.dot_dimension_numbers<[1], [0], [0], [1], [0, 0, 1, 1], [], []>} : vector<8x64xf32>, vector<64x192xf32>, vector<8x192xf32> -> vector<8x192xf32>
    %271 = vector.extract_strided_slice %270 {offsets = [0, 0], sizes = [8, 128], strides = [1, 1]} : vector<8x192xf32> to vector<8x128xf32>
    %272 = arith.addf %267, %271 : vector<8x128xf32>
    %273 = arith.negf %272 : vector<8x128xf32>
    %274 = math.exp %273 : vector<8x128xf32>
    %cst_87 = arith.constant 1.000000e+00 : f32
    %275 = vector.broadcast %cst_87 : f32 to vector<8x128xf32>
    %276 = arith.addf %275, %274 : vector<8x128xf32>
    %277 = arith.divf %275, %276 : vector<8x128xf32>
    %278 = vector.extract_strided_slice %277 {offsets = [0, 0], sizes = [8, 64], strides = [1, 1]} : vector<8x128xf32> to vector<8x64xf32>
    %279 = vector.extract_strided_slice %277 {offsets = [0, 64], sizes = [8, 64], strides = [1, 1]} : vector<8x128xf32> to vector<8x64xf32>
    %280 = vector.extract_strided_slice %270 {offsets = [0, 128], sizes = [8, 64], strides = [1, 1]} : vector<8x192xf32> to vector<8x64xf32>
    %281 = arith.addf %280, %14 : vector<8x64xf32>
    %282 = arith.mulf %278, %281 : vector<8x64xf32>
    %283 = arith.addf %269, %282 : vector<8x64xf32>
    %284 = math.tanh %283 : vector<8x64xf32>
    %cst_88 = arith.constant 1.000000e+00 : f32
    %285 = vector.broadcast %cst_88 : f32 to vector<8x64xf32>
    %286 = arith.subf %285, %279 : vector<8x64xf32>
    %287 = arith.subf %284, %254 : vector<8x64xf32>
    %288 = arith.mulf %286, %287 : vector<8x64xf32>
    %289 = arith.addf %254, %288 : vector<8x64xf32>
    %290 = vector.extract_strided_slice %289 {offsets = [0, 0], sizes = [8, 32], strides = [1, 1]} : vector<8x64xf32> to vector<8x32xf32>
    %291 = arith.index_cast %262 : i32 to index
    %c0_89 = arith.constant 0 : index
    %292 = vector.load %arg11[%291, %c0_89] : memref<64x64xf32, #tpu.memory_space<vmem>>, vector<8x32xf32>
    tpu.vector_store %arg11[%291, %c0_89], %290 {strides = array<i32>} : memref<64x64xf32, #tpu.memory_space<vmem>>, vector<8x32xf32>,
    %293 = vector.extract_strided_slice %289 {offsets = [0, 32], sizes = [8, 32], strides = [1, 1]} : vector<8x64xf32> to vector<8x32xf32>
    %294 = arith.index_cast %265 : i32 to index
    %c32_90 = arith.constant 32 : index
    %295 = vector.load %arg11[%294, %c32_90] : memref<64x64xf32, #tpu.memory_space<vmem>>, vector<8x32xf32>
    tpu.vector_store %arg11[%294, %c32_90], %293 {strides = array<i32>} : memref<64x64xf32, #tpu.memory_space<vmem>>, vector<8x32xf32>,
    %c8_i32_91 = arith.constant 8 : i32
    %c0_i32_92 = arith.constant 0 : i32
    %296 = tpu.memref_slice %arg14[%c0_i32_92] : memref<2x!tpu.dma_semaphore, #tpu.memory_space<semaphore_mem>> -> memref<1x!tpu.dma_semaphore, #tpu.memory_space<semaphore_mem>>
    %297 = tpu.memref_squeeze %296 : memref<1x!tpu.dma_semaphore, #tpu.memory_space<semaphore_mem>> -> memref<!tpu.dma_semaphore, #tpu.memory_space<semaphore_mem>>
    tpu.wait_dma2 semaphore(%297 : memref<!tpu.dma_semaphore, #tpu.memory_space<semaphore_mem>>) src(%arg7 : memref<64x1024xf32, #tpu.memory_space<any>>) dst(%arg12 : memref<64x1024xf32, #tpu.memory_space<vmem>>)
    %c1_i32_93 = arith.constant 1 : i32
    %298 = tpu.memref_slice %arg14[%c1_i32_93] : memref<2x!tpu.dma_semaphore, #tpu.memory_space<semaphore_mem>> -> memref<1x!tpu.dma_semaphore, #tpu.memory_space<semaphore_mem>>
    %299 = tpu.memref_squeeze %298 : memref<1x!tpu.dma_semaphore, #tpu.memory_space<semaphore_mem>> -> memref<!tpu.dma_semaphore, #tpu.memory_space<semaphore_mem>>
    tpu.wait_dma2 semaphore(%299 : memref<!tpu.dma_semaphore, #tpu.memory_space<semaphore_mem>>) src(%arg8 : memref<1024x32xf32, #tpu.memory_space<any>>) dst(%arg13 : memref<1024x32xf32, #tpu.memory_space<vmem>>)
    %c0_94 = arith.constant 0 : index
    %c0_95 = arith.constant 0 : index
    %300 = vector.load %arg11[%c0_94, %c0_95] : memref<64x64xf32, #tpu.memory_space<vmem>>, vector<64x64xf32>
    %c0_96 = arith.constant 0 : index
    %c0_97 = arith.constant 0 : index
    %301 = vector.load %arg12[%c0_96, %c0_97] : memref<64x1024xf32, #tpu.memory_space<vmem>>, vector<64x1024xf32>
    %cst_98 = arith.constant dense<0.000000e+00> : vector<64x1024xf32>
    %302 = tpu.matmul %300, %301, %cst_98 {dimension_numbers = #tpu.dot_dimension_numbers<[1], [0], [0], [1], [0, 0, 1, 1], [], []>} : vector<64x64xf32>, vector<64x1024xf32>, vector<64x1024xf32> -> vector<64x1024xf32>
    %c0_99 = arith.constant 0 : index
    %c0_100 = arith.constant 0 : index
    %303 = vector.load %arg5[%c0_99, %c0_100] : memref<1x1024xf32, #tpu.memory_space<vmem>>, vector<1x1024xf32>
    %304 = vector.broadcast %303 : vector<1x1024xf32> to vector<64x1024xf32>
    %305 = arith.addf %302, %304 : vector<64x1024xf32>
    %cst_101 = arith.constant 0.000000e+00 : f32
    %306 = vector.broadcast %cst_101 : f32 to vector<64x1024xf32>
    %307 = arith.maximumf %305, %306 : vector<64x1024xf32>
    %c0_102 = arith.constant 0 : index
    %c0_103 = arith.constant 0 : index
    %308 = vector.load %arg13[%c0_102, %c0_103] : memref<1024x32xf32, #tpu.memory_space<vmem>>, vector<1024x32xf32>
    %cst_104 = arith.constant dense<0.000000e+00> : vector<64x32xf32>
    %309 = tpu.matmul %307, %308, %cst_104 {dimension_numbers = #tpu.dot_dimension_numbers<[1], [0], [0], [1], [0, 0, 1, 1], [], []>} : vector<64x1024xf32>, vector<1024x32xf32>, vector<64x32xf32> -> vector<64x32xf32>
    %c0_105 = arith.constant 0 : index
    %c0_106 = arith.constant 0 : index
    %310 = vector.load %arg6[%c0_105, %c0_106] : memref<1x32xf32, #tpu.memory_space<vmem>>, vector<1x32xf32>
    %311 = vector.broadcast %310 : vector<1x32xf32> to vector<64x32xf32>
    %312 = arith.addf %309, %311 : vector<64x32xf32>
    %313 = vector.extract_strided_slice %4 {offsets = [0, 0], sizes = [64, 32], strides = [1, 1]} : vector<64x64xf32> to vector<64x32xf32>
    %314 = arith.addf %313, %312 : vector<64x32xf32>
    %c0_107 = arith.constant 0 : index
    %c0_108 = arith.constant 0 : index
    %315 = vector.load %arg9[%c0_107, %c0_108] : memref<64x32xf32, #tpu.memory_space<vmem>>, vector<64x32xf32>
    tpu.vector_store %arg9[%c0_107, %c0_108], %314 {strides = array<i32>} : memref<64x32xf32, #tpu.memory_space<vmem>>, vector<64x32xf32>,
    return
  }
}

</mosaic_0001>

<bundles_post_ra>
// kernel: pos_encoder.1
= control target key start
LH: loop header
LB: loop body
LE: loop exit
PB: predicated region body
PF: predicated region fallthrough
CT: control target
= control target key end

     0   :  { %14 = vsyncpa [#allocation8], 0  ;;  %s5351_s0 = inlined_call_operand.vmem [shape: f32[64,64], index: 0, kind: input, shape index: {}]   ;;  %s5352_s1 = inlined_call_operand.vmem [shape: f32[64,192], index: 1, kind: input, shape index: {}]   ;;  %s5353_s2 = inlined_call_operand.vmem [shape: f32[64,192], index: 2, kind: input, shape index: {}]   ;;  %s5354_s3 = inlined_call_operand.vmem [shape: f32[1,192], index: 3, kind: input, shape index: {}]   ;;  %s5355_s4 = inlined_call_operand.vmem [shape: f32[1,64], index: 4, kind: input, shape index: {}]   ;;  %s5356_s5 = inlined_call_operand.vmem [shape: f32[1,1024], index: 5, kind: input, shape index: {}]   ;;  %s5357_s6 = inlined_call_operand.vmem [shape: f32[1,32], index: 6, kind: input, shape index: {}]   ;;  %s5358_s7 = inlined_call_operand.vmem [shape: f32[64,1024], index: 7, kind: input, shape index: {}]   ;;  %s5359_s8 = inlined_call_operand.vmem [shape: f32[1024,32], index: 8, kind: input, shape index: {}]   ;;  %s5360_s9 = inlined_call_operand.hbm [shape: f32[64,32], index: 9, kind: output, shape index: {}]  }
   0x1   :  { %v3582_v0 = vld [vmem:[%s5358_s7] sm:$0xff]  ;;  %v3587_v1 = vld [vmem:[%s5358_s7 + $0x8] sm:$0xff]  ;;  %v3592_v2 = vld [vmem:[%s5358_s7 + $0x10] sm:$0xff] }
   0x2   :  { %v3597_v3 = vld [vmem:[%s5358_s7 + $0x18] sm:$0xff]  ;;  %v3602_v4 = vld [vmem:[%s5358_s7 + $0x20] sm:$0xff]  ;;  %v3607_v5 = vld [vmem:[%s5358_s7 + $0x28] sm:$0xff] }
   0x3   :  { %5375 = vst [vmem:[#allocation14_spill] sm:$0xff] %v3602_v4  ;;  %5376 = vst [vmem:[#allocation15_spill] sm:$0xff] %v3607_v5  ;;  %v3612_v6 = vld [vmem:[%s5358_s7 + $0x30] sm:$0xff]  ;;  %v3617_v7 = vld [vmem:[%s5358_s7 + $0x38] sm:$0xff] }
   0x4   :  { %5377 = vst [vmem:[#allocation16_spill] sm:$0xff] %v3612_v6  ;;  %5378 = vst [vmem:[#allocation17_spill] sm:$0xff] %v3617_v7  ;;  %v3622_v8 = vld [vmem:[%s5358_s7 + $0x40] sm:$0xff]  ;;  %v3627_v9 = vld [vmem:[%s5358_s7 + $0x48] sm:$0xff] }
   0x5   :  { %v3632_v10 = vld [vmem:[%s5358_s7 + $0x50] sm:$0xff]  ;;  %v3637_v11 = vld [vmem:[%s5358_s7 + $0x58] sm:$0xff]  ;;  %v3642_v12 = vld [vmem:[%s5358_s7 + $0x60] sm:$0xff] }
   0x6   :  { %5379 = vst [vmem:[#allocation18_spill] sm:$0xff] %v3642_v12  ;;  %v3647_v13 = vld [vmem:[%s5358_s7 + $0x68] sm:$0xff]  ;;  %v3652_v14 = vld [vmem:[%s5358_s7 + $0x70] sm:$0xff]  ;;  %v3657_v15 = vld [vmem:[%s5358_s7 + $0x78] sm:$0xff] }
   0x7   :  { %5380 = vst [vmem:[#allocation19_spill] sm:$0xff] %v3647_v13  ;;  %5381 = vst [vmem:[#allocation20_spill] sm:$0xff] %v3652_v14  ;;  %v3662_v16 = vld [vmem:[%s5358_s7 + $0x80] sm:$0xff]  ;;  %v3667_v17 = vld [vmem:[%s5358_s7 + $0x88] sm:$0xff] }
   0x8   :  { %5382 = vst [vmem:[#allocation21_spill] sm:$0xff] %v3657_v15  ;;  %v3672_v18 = vld [vmem:[%s5358_s7 + $0x90] sm:$0xff]  ;;  %v3677_v19 = vld [vmem:[%s5358_s7 + $0x98] sm:$0xff]  ;;  %v3682_v20 = vld [vmem:[%s5358_s7 + $0xa0] sm:$0xff] }
   0x9   :  { %5383 = vst [vmem:[#allocation22_spill] sm:$0xff] %v3682_v20  ;;  %v3687_v21 = vld [vmem:[%s5358_s7 + $0xa8] sm:$0xff]  ;;  %v3692_v22 = vld [vmem:[%s5358_s7 + $0xb0] sm:$0xff]  ;;  %v3697_v23 = vld [vmem:[%s5358_s7 + $0xb8] sm:$0xff] }
   0xa   :  { %5384 = vst [vmem:[#allocation23_spill] sm:$0xff] %v3687_v21  ;;  %5385 = vst [vmem:[#allocation24_spill] sm:$0xff] %v3692_v22  ;;  %v3702_v24 = vld [vmem:[%s5358_s7 + $0xc0] sm:$0xff]  ;;  %v3707_v25 = vld [vmem:[%s5358_s7 + $0xc8] sm:$0xff] }
   0xb   :  { %5386 = vst [vmem:[#allocation25_spill] sm:$0xff] %v3697_v23  ;;  %v3712_v26 = vld [vmem:[%s5358_s7 + $0xd0] sm:$0xff]  ;;  %v3717_v27 = vld [vmem:[%s5358_s7 + $0xd8] sm:$0xff]  ;;  %v3722_v28 = vld [vmem:[%s5358_s7 + $0xe0] sm:$0xff] }
   0xc   :  { %5387 = vst [vmem:[#allocation26_spill] sm:$0xff] %v3722_v28  ;;  %v3727_v29 = vld [vmem:[%s5358_s7 + $0xe8] sm:$0xff]  ;;  %v3732_v30 = vld [vmem:[%s5358_s7 + $0xf0] sm:$0xff]  ;;  %v3737_v31 = vld [vmem:[%s5358_s7 + $0xf8] sm:$0xff] }
   0xd   :  { %5388 = vst [vmem:[#allocation27_spill] sm:$0xff] %v3727_v29  ;;  %5389 = vst [vmem:[#allocation28_spill] sm:$0xff] %v3732_v30  ;;  %v3742_v32 = vld [vmem:[%s5358_s7 + $0x100] sm:$0xff]  ;;  %v3747_v33 = vld [vmem:[%s5358_s7 + $0x108] sm:$0xff] }
   0xe   :  { %5390 = vst [vmem:[#allocation29_spill] sm:$0xff] %v3737_v31  ;;  %v3752_v34 = vld [vmem:[%s5358_s7 + $0x110] sm:$0xff]  ;;  %v3757_v35 = vld [vmem:[%s5358_s7 + $0x118] sm:$0xff]  ;;  %v3762_v36 = vld [vmem:[%s5358_s7 + $0x120] sm:$0xff] }
   0xf   :  { %5391 = vst [vmem:[#allocation30_spill] sm:$0xff] %v3762_v36  ;;  %v3767_v37 = vld [vmem:[%s5358_s7 + $0x128] sm:$0xff]  ;;  %v3772_v38 = vld [vmem:[%s5358_s7 + $0x130] sm:$0xff]  ;;  %v3777_v39 = vld [vmem:[%s5358_s7 + $0x138] sm:$0xff] }
  0x10   :  { %5392 = vst [vmem:[#allocation31_spill] sm:$0xff] %v3767_v37  ;;  %5393 = vst [vmem:[#allocation32_spill] sm:$0xff] %v3772_v38  ;;  %v3782_v40 = vld [vmem:[%s5358_s7 + $0x140] sm:$0xff]  ;;  %v3787_v41 = vld [vmem:[%s5358_s7 + $0x148] sm:$0xff] }
  0x11   :  { %5394 = vst [vmem:[#allocation33_spill] sm:$0xff] %v3777_v39  ;;  %v3792_v42 = vld [vmem:[%s5358_s7 + $0x150] sm:$0xff]  ;;  %v3797_v43 = vld [vmem:[%s5358_s7 + $0x158] sm:$0xff]  ;;  %v3802_v44 = vld [vmem:[%s5358_s7 + $0x160] sm:$0xff] }
  0x12   :  { %5395 = vst [vmem:[#allocation34_spill] sm:$0xff] %v3802_v44  ;;  %v3807_v45 = vld [vmem:[%s5358_s7 + $0x168] sm:$0xff]  ;;  %v3812_v46 = vld [vmem:[%s5358_s7 + $0x170] sm:$0xff]  ;;  %v3817_v47 = vld [vmem:[%s5358_s7 + $0x178] sm:$0xff] }
  0x13   :  { %5396 = vst [vmem:[#allocation35_spill] sm:$0xff] %v3807_v45  ;;  %5397 = vst [vmem:[#allocation36_spill] sm:$0xff] %v3812_v46  ;;  %v3822_v48 = vld [vmem:[%s5358_s7 + $0x180] sm:$0xff]  ;;  %v3827_v49 = vld [vmem:[%s5358_s7 + $0x188] sm:$0xff] }
  0x14   :  { %5398 = vst [vmem:[#allocation37_spill] sm:$0xff] %v3817_v47  ;;  %v3832_v50 = vld [vmem:[%s5358_s7 + $0x190] sm:$0xff]  ;;  %v3837_v51 = vld [vmem:[%s5358_s7 + $0x198] sm:$0xff]  ;;  %v3842_v52 = vld [vmem:[%s5358_s7 + $0x1a0] sm:$0xff] }
  0x15   :  { %5399 = vst [vmem:[#allocation38_spill] sm:$0xff] %v3842_v52  ;;  %v3847_v53 = vld [vmem:[%s5358_s7 + $0x1a8] sm:$0xff]  ;;  %v3852_v54 = vld [vmem:[%s5358_s7 + $0x1b0] sm:$0xff]  ;;  %v3857_v55 = vld [vmem:[%s5358_s7 + $0x1b8] sm:$0xff] }
  0x16   :  { %5400 = vst [vmem:[#allocation39_spill] sm:$0xff] %v3847_v53  ;;  %5401 = vst [vmem:[#allocation40_spill] sm:$0xff] %v3852_v54  ;;  %v3862_v56 = vld [vmem:[%s5358_s7 + $0x1c0] sm:$0xff]  ;;  %v3867_v57 = vld [vmem:[%s5358_s7 + $0x1c8] sm:$0xff] }
  0x17   :  { %5402 = vst [vmem:[#allocation41_spill] sm:$0xff] %v3857_v55  ;;  %v3872_v58 = vld [vmem:[%s5358_s7 + $0x1d0] sm:$0xff]  ;;  %v3877_v59 = vld [vmem:[%s5358_s7 + $0x1d8] sm:$0xff]  ;;  %v3882_v60 = vld [vmem:[%s5358_s7 + $0x1e0] sm:$0xff] }
  0x18   :  { %5403 = vst [vmem:[#allocation42_spill] sm:$0xff] %v3872_v58  ;;  %5404 = vst [vmem:[#allocation43_spill] sm:$0xff] %v3882_v60  ;;  %v3887_v61 = vld [vmem:[%s5358_s7 + $0x1e8] sm:$0xff]  ;;  %v3892_v62 = vld [vmem:[%s5358_s7 + $0x1f0] sm:$0xff] }
  0x19   :  { %5405 = vst [vmem:[#allocation44_spill] sm:$0xff] %v3887_v61  ;;  %5406 = vst [vmem:[#allocation45_spill] sm:$0xff] %v3892_v62  ;;  %v3897_v63 = vld [vmem:[%s5358_s7 + $0x1f8] sm:$0xff] }
  0x1a   :  { %5407 = vst [vmem:[#allocation46_spill] sm:$0xff] %v3897_v63 }
  0x1b   :  { %196 = vsyncadd [#allocation6], 8192  ;;  %v3902_v54 = vld [vmem:[%s5359_s8] sm:$0xff]  ;;  %v3907_v60 = vld [vmem:[%s5359_s8 + $0x8] sm:$0xff] }
  0x1c   :  { %5408 = vst [vmem:[#allocation47_spill] sm:$0xff] %v3902_v54  ;;  %5409 = vst [vmem:[#allocation48_spill] sm:$0xff] %v3907_v60  ;;  %v3912_v62 = vld [vmem:[%s5359_s8 + $0x10] sm:$0xff]  ;;  %v3917_v52 = vld [vmem:[%s5359_s8 + $0x18] sm:$0xff] }
  0x1d   :  { %5410 = vst [vmem:[#allocation49_spill] sm:$0xff] %v3912_v62  ;;  %5411 = vst [vmem:[#allocation50_spill] sm:$0xff] %v3917_v52  ;;  %v3922_v63 = vld [vmem:[%s5359_s8 + $0x20] sm:$0xff]  ;;  %v3927_v54 = vld [vmem:[%s5359_s8 + $0x28] sm:$0xff] }
  0x1e   :  { %5412 = vst [vmem:[#allocation51_spill] sm:$0xff] %v3922_v63  ;;  %5413 = vst [vmem:[#allocation52_spill] sm:$0xff] %v3927_v54  ;;  %v3932_v60 = vld [vmem:[%s5359_s8 + $0x30] sm:$0xff]  ;;  %v3937_v62 = vld [vmem:[%s5359_s8 + $0x38] sm:$0xff] }
  0x1f   :  { %5414 = vst [vmem:[#allocation53_spill] sm:$0xff] %v3932_v60  ;;  %5415 = vst [vmem:[#allocation54_spill] sm:$0xff] %v3937_v62  ;;  %v3942_v52 = vld [vmem:[%s5359_s8 + $0x40] sm:$0xff]  ;;  %v3947_v63 = vld [vmem:[%s5359_s8 + $0x48] sm:$0xff] }
  0x20   :  { %5416 = vst [vmem:[#allocation55_spill] sm:$0xff] %v3942_v52  ;;  %5417 = vst [vmem:[#allocation56_spill] sm:$0xff] %v3947_v63  ;;  %v3952_v54 = vld [vmem:[%s5359_s8 + $0x50] sm:$0xff]  ;;  %v3957_v60 = vld [vmem:[%s5359_s8 + $0x58] sm:$0xff] }
  0x21   :  { %5418 = vst [vmem:[#allocation57_spill] sm:$0xff] %v3952_v54  ;;  %5419 = vst [vmem:[#allocation58_spill] sm:$0xff] %v3957_v60  ;;  %v3962_v62 = vld [vmem:[%s5359_s8 + $0x60] sm:$0xff]  ;;  %v3967_v52 = vld [vmem:[%s5359_s8 + $0x68] sm:$0xff] }
  0x22   :  { %5420 = vst [vmem:[#allocation59_spill] sm:$0xff] %v3962_v62  ;;  %5421 = vst [vmem:[#allocation60_spill] sm:$0xff] %v3967_v52  ;;  %v3972_v63 = vld [vmem:[%s5359_s8 + $0x70] sm:$0xff]  ;;  %v3977_v54 = vld [vmem:[%s5359_s8 + $0x78] sm:$0xff] }
  0x23   :  { %5422 = vst [vmem:[#allocation61_spill] sm:$0xff] %v3972_v63  ;;  %5423 = vst [vmem:[#allocation62_spill] sm:$0xff] %v3977_v54  ;;  %v3982_v60 = vld [vmem:[%s5359_s8 + $0x80] sm:$0xff]  ;;  %v3987_v62 = vld [vmem:[%s5359_s8 + $0x88] sm:$0xff] }
  0x24   :  { %5424 = vst [vmem:[#allocation63_spill] sm:$0xff] %v3982_v60  ;;  %5425 = vst [vmem:[#allocation64_spill] sm:$0xff] %v3987_v62  ;;  %v3992_v52 = vld [vmem:[%s5359_s8 + $0x90] sm:$0xff]  ;;  %v3997_v63 = vld [vmem:[%s5359_s8 + $0x98] sm:$0xff] }
  0x25   :  { %5426 = vst [vmem:[#allocation65_spill] sm:$0xff] %v3992_v52  ;;  %5427 = vst [vmem:[#allocation66_spill] sm:$0xff] %v3997_v63  ;;  %v4002_v54 = vld [vmem:[%s5359_s8 + $0xa0] sm:$0xff]  ;;  %v4007_v60 = vld [vmem:[%s5359_s8 + $0xa8] sm:$0xff] }
  0x26   :  { %5428 = vst [vmem:[#allocation67_spill] sm:$0xff] %v4002_v54  ;;  %5429 = vst [vmem:[#allocation68_spill] sm:$0xff] %v4007_v60  ;;  %v4012_v62 = vld [vmem:[%s5359_s8 + $0xb0] sm:$0xff]  ;;  %v4017_v52 = vld [vmem:[%s5359_s8 + $0xb8] sm:$0xff] }
  0x27   :  { %5430 = vst [vmem:[#allocation69_spill] sm:$0xff] %v4012_v62  ;;  %5431 = vst [vmem:[#allocation70_spill] sm:$0xff] %v4017_v52  ;;  %v4022_v63 = vld [vmem:[%s5359_s8 + $0xc0] sm:$0xff]  ;;  %v4027_v54 = vld [vmem:[%s5359_s8 + $0xc8] sm:$0xff] }
  0x28   :  { %5432 = vst [vmem:[#allocation71_spill] sm:$0xff] %v4022_v63  ;;  %5433 = vst [vmem:[#allocation72_spill] sm:$0xff] %v4027_v54  ;;  %v4032_v60 = vld [vmem:[%s5359_s8 + $0xd0] sm:$0xff]  ;;  %v4037_v62 = vld [vmem:[%s5359_s8 + $0xd8] sm:$0xff] }
  0x29   :  { %5434 = vst [vmem:[#allocation73_spill] sm:$0xff] %v4032_v60  ;;  %5435 = vst [vmem:[#allocation74_spill] sm:$0xff] %v4037_v62  ;;  %v4042_v52 = vld [vmem:[%s5359_s8 + $0xe0] sm:$0xff]  ;;  %v4047_v63 = vld [vmem:[%s5359_s8 + $0xe8] sm:$0xff] }
  0x2a   :  { %5436 = vst [vmem:[#allocation75_spill] sm:$0xff] %v4042_v52  ;;  %5437 = vst [vmem:[#allocation76_spill] sm:$0xff] %v4047_v63  ;;  %v4052_v54 = vld [vmem:[%s5359_s8 + $0xf0] sm:$0xff]  ;;  %v4057_v60 = vld [vmem:[%s5359_s8 + $0xf8] sm:$0xff] }
  0x2b   :  { %5438 = vst [vmem:[#allocation77_spill] sm:$0xff] %v4052_v54  ;;  %5439 = vst [vmem:[#allocation78_spill] sm:$0xff] %v4057_v60  ;;  %v4062_v62 = vld [vmem:[%s5359_s8 + $0x100] sm:$0xff]  ;;  %v4067_v52 = vld [vmem:[%s5359_s8 + $0x108] sm:$0xff] }
  0x2c   :  { %5440 = vst [vmem:[#allocation79_spill] sm:$0xff] %v4062_v62  ;;  %5441 = vst [vmem:[#allocation80_spill] sm:$0xff] %v4067_v52  ;;  %v4072_v63 = vld [vmem:[%s5359_s8 + $0x110] sm:$0xff]  ;;  %v4077_v54 = vld [vmem:[%s5359_s8 + $0x118] sm:$0xff] }
  0x2d   :  { %5442 = vst [vmem:[#allocation81_spill] sm:$0xff] %v4072_v63  ;;  %5443 = vst [vmem:[#allocation82_spill] sm:$0xff] %v4077_v54  ;;  %v4082_v60 = vld [vmem:[%s5359_s8 + $0x120] sm:$0xff]  ;;  %v4087_v62 = vld [vmem:[%s5359_s8 + $0x128] sm:$0xff] }
  0x2e   :  { %5444 = vst [vmem:[#allocation83_spill] sm:$0xff] %v4082_v60  ;;  %5445 = vst [vmem:[#allocation84_spill] sm:$0xff] %v4087_v62  ;;  %v4092_v52 = vld [vmem:[%s5359_s8 + $0x130] sm:$0xff]  ;;  %v4097_v63 = vld [vmem:[%s5359_s8 + $0x138] sm:$0xff] }
  0x2f   :  { %5446 = vst [vmem:[#allocation85_spill] sm:$0xff] %v4092_v52  ;;  %5447 = vst [vmem:[#allocation86_spill] sm:$0xff] %v4097_v63  ;;  %v4102_v54 = vld [vmem:[%s5359_s8 + $0x140] sm:$0xff]  ;;  %v4107_v60 = vld [vmem:[%s5359_s8 + $0x148] sm:$0xff] }
  0x30   :  { %5448 = vst [vmem:[#allocation87_spill] sm:$0xff] %v4102_v54  ;;  %5449 = vst [vmem:[#allocation88_spill] sm:$0xff] %v4107_v60  ;;  %v4112_v62 = vld [vmem:[%s5359_s8 + $0x150] sm:$0xff]  ;;  %v4117_v52 = vld [vmem:[%s5359_s8 + $0x158] sm:$0xff] }
  0x31   :  { %5450 = vst [vmem:[#allocation89_spill] sm:$0xff] %v4112_v62  ;;  %5451 = vst [vmem:[#allocation90_spill] sm:$0xff] %v4117_v52  ;;  %v4122_v63 = vld [vmem:[%s5359_s8 + $0x160] sm:$0xff]  ;;  %v4127_v54 = vld [vmem:[%s5359_s8 + $0x168] sm:$0xff] }
  0x32   :  { %5452 = vst [vmem:[#allocation91_spill] sm:$0xff] %v4122_v63  ;;  %5453 = vst [vmem:[#allocation92_spill] sm:$0xff] %v4127_v54  ;;  %v4132_v60 = vld [vmem:[%s5359_s8 + $0x170] sm:$0xff]  ;;  %v4137_v62 = vld [vmem:[%s5359_s8 + $0x178] sm:$0xff] }
  0x33   :  { %5454 = vst [vmem:[#allocation93_spill] sm:$0xff] %v4132_v60  ;;  %5455 = vst [vmem:[#allocation94_spill] sm:$0xff] %v4137_v62  ;;  %v4142_v52 = vld [vmem:[%s5359_s8 + $0x180] sm:$0xff]  ;;  %v4147_v63 = vld [vmem:[%s5359_s8 + $0x188] sm:$0xff] }
  0x34   :  { %5456 = vst [vmem:[#allocation95_spill] sm:$0xff] %v4142_v52  ;;  %5457 = vst [vmem:[#allocation96_spill] sm:$0xff] %v4147_v63  ;;  %v4152_v54 = vld [vmem:[%s5359_s8 + $0x190] sm:$0xff]  ;;  %v4157_v60 = vld [vmem:[%s5359_s8 + $0x198] sm:$0xff] }
  0x35   :  { %5458 = vst [vmem:[#allocation97_spill] sm:$0xff] %v4152_v54  ;;  %5459 = vst [vmem:[#allocation98_spill] sm:$0xff] %v4157_v60  ;;  %v4162_v62 = vld [vmem:[%s5359_s8 + $0x1a0] sm:$0xff]  ;;  %v4167_v52 = vld [vmem:[%s5359_s8 + $0x1a8] sm:$0xff] }
  0x36   :  { %5460 = vst [vmem:[#allocation99_spill] sm:$0xff] %v4162_v62  ;;  %5461 = vst [vmem:[#allocation100_spill] sm:$0xff] %v4167_v52  ;;  %v4172_v63 = vld [vmem:[%s5359_s8 + $0x1b0] sm:$0xff]  ;;  %v4177_v54 = vld [vmem:[%s5359_s8 + $0x1b8] sm:$0xff] }
  0x37   :  { %5462 = vst [vmem:[#allocation101_spill] sm:$0xff] %v4172_v63  ;;  %5463 = vst [vmem:[#allocation102_spill] sm:$0xff] %v4177_v54  ;;  %v4182_v60 = vld [vmem:[%s5359_s8 + $0x1c0] sm:$0xff]  ;;  %v4187_v62 = vld [vmem:[%s5359_s8 + $0x1c8] sm:$0xff] }
  0x38   :  { %5464 = vst [vmem:[#allocation103_spill] sm:$0xff] %v4182_v60  ;;  %5465 = vst [vmem:[#allocation104_spill] sm:$0xff] %v4187_v62  ;;  %v4192_v52 = vld [vmem:[%s5359_s8 + $0x1d0] sm:$0xff]  ;;  %v4197_v63 = vld [vmem:[%s5359_s8 + $0x1d8] sm:$0xff] }
  0x39   :  { %5466 = vst [vmem:[#allocation105_spill] sm:$0xff] %v4192_v52  ;;  %5467 = vst [vmem:[#allocation106_spill] sm:$0xff] %v4197_v63  ;;  %v4202_v54 = vld [vmem:[%s5359_s8 + $0x1e0] sm:$0xff]  ;;  %v4207_v60 = vld [vmem:[%s5359_s8 + $0x1e8] sm:$0xff] }
  0x3a   :  { %5468 = vst [vmem:[#allocation107_spill] sm:$0xff] %v4202_v54  ;;  %5469 = vst [vmem:[#allocation108_spill] sm:$0xff] %v4207_v60  ;;  %v4212_v62 = vld [vmem:[%s5359_s8 + $0x1f0] sm:$0xff]  ;;  %v4217_v52 = vld [vmem:[%s5359_s8 + $0x1f8] sm:$0xff] }
  0x3b   :  { %5470 = vst [vmem:[#allocation109_spill] sm:$0xff] %v4212_v62  ;;  %5471 = vst [vmem:[#allocation110_spill] sm:$0xff] %v4217_v52  ;;  %v4222_v63 = vld [vmem:[%s5359_s8 + $0x200] sm:$0xff]  ;;  %v4227_v54 = vld [vmem:[%s5359_s8 + $0x208] sm:$0xff] }
  0x3c   :  { %5472 = vst [vmem:[#allocation111_spill] sm:$0xff] %v4222_v63  ;;  %5473 = vst [vmem:[#allocation112_spill] sm:$0xff] %v4227_v54  ;;  %v4232_v60 = vld [vmem:[%s5359_s8 + $0x210] sm:$0xff]  ;;  %v4237_v62 = vld [vmem:[%s5359_s8 + $0x218] sm:$0xff] }
  0x3d   :  { %5474 = vst [vmem:[#allocation113_spill] sm:$0xff] %v4232_v60  ;;  %5475 = vst [vmem:[#allocation114_spill] sm:$0xff] %v4237_v62  ;;  %v4242_v52 = vld [vmem:[%s5359_s8 + $0x220] sm:$0xff]  ;;  %v4247_v63 = vld [vmem:[%s5359_s8 + $0x228] sm:$0xff] }
  0x3e   :  { %5476 = vst [vmem:[#allocation115_spill] sm:$0xff] %v4242_v52  ;;  %5477 = vst [vmem:[#allocation116_spill] sm:$0xff] %v4247_v63  ;;  %v4252_v54 = vld [vmem:[%s5359_s8 + $0x230] sm:$0xff]  ;;  %v4257_v60 = vld [vmem:[%s5359_s8 + $0x238] sm:$0xff] }
  0x3f   :  { %5478 = vst [vmem:[#allocation117_spill] sm:$0xff] %v4252_v54  ;;  %5479 = vst [vmem:[#allocation118_spill] sm:$0xff] %v4257_v60  ;;  %v4262_v62 = vld [vmem:[%s5359_s8 + $0x240] sm:$0xff]  ;;  %v4267_v52 = vld [vmem:[%s5359_s8 + $0x248] sm:$0xff] }
  0x40   :  { %5480 = vst [vmem:[#allocation119_spill] sm:$0xff] %v4262_v62  ;;  %5481 = vst [vmem:[#allocation120_spill] sm:$0xff] %v4267_v52  ;;  %v4272_v63 = vld [vmem:[%s5359_s8 + $0x250] sm:$0xff]  ;;  %v4277_v54 = vld [vmem:[%s5359_s8 + $0x258] sm:$0xff] }
  0x41   :  { %5482 = vst [vmem:[#allocation121_spill] sm:$0xff] %v4272_v63  ;;  %5483 = vst [vmem:[#allocation122_spill] sm:$0xff] %v4277_v54  ;;  %v4282_v60 = vld [vmem:[%s5359_s8 + $0x260] sm:$0xff]  ;;  %v4287_v62 = vld [vmem:[%s5359_s8 + $0x268] sm:$0xff] }
  0x42   :  { %5484 = vst [vmem:[#allocation123_spill] sm:$0xff] %v4282_v60  ;;  %5485 = vst [vmem:[#allocation124_spill] sm:$0xff] %v4287_v62  ;;  %v4292_v52 = vld [vmem:[%s5359_s8 + $0x270] sm:$0xff]  ;;  %v4297_v63 = vld [vmem:[%s5359_s8 + $0x278] sm:$0xff] }
  0x43   :  { %5486 = vst [vmem:[#allocation125_spill] sm:$0xff] %v4292_v52  ;;  %5487 = vst [vmem:[#allocation126_spill] sm:$0xff] %v4297_v63  ;;  %v4302_v54 = vld [vmem:[%s5359_s8 + $0x280] sm:$0xff]  ;;  %v4307_v60 = vld [vmem:[%s5359_s8 + $0x288] sm:$0xff] }
  0x44   :  { %5488 = vst [vmem:[#allocation127_spill] sm:$0xff] %v4302_v54  ;;  %5489 = vst [vmem:[#allocation128_spill] sm:$0xff] %v4307_v60  ;;  %v4312_v62 = vld [vmem:[%s5359_s8 + $0x290] sm:$0xff]  ;;  %v4317_v52 = vld [vmem:[%s5359_s8 + $0x298] sm:$0xff] }
  0x45   :  { %5490 = vst [vmem:[#allocation129_spill] sm:$0xff] %v4312_v62  ;;  %5491 = vst [vmem:[#allocation130_spill] sm:$0xff] %v4317_v52  ;;  %v4322_v63 = vld [vmem:[%s5359_s8 + $0x2a0] sm:$0xff]  ;;  %v4327_v54 = vld [vmem:[%s5359_s8 + $0x2a8] sm:$0xff] }
  0x46   :  { %5492 = vst [vmem:[#allocation131_spill] sm:$0xff] %v4322_v63  ;;  %5493 = vst [vmem:[#allocation132_spill] sm:$0xff] %v4327_v54  ;;  %v4332_v60 = vld [vmem:[%s5359_s8 + $0x2b0] sm:$0xff]  ;;  %v4337_v62 = vld [vmem:[%s5359_s8 + $0x2b8] sm:$0xff] }
  0x47   :  { %5494 = vst [vmem:[#allocation133_spill] sm:$0xff] %v4332_v60  ;;  %5495 = vst [vmem:[#allocation134_spill] sm:$0xff] %v4337_v62  ;;  %v4342_v52 = vld [vmem:[%s5359_s8 + $0x2c0] sm:$0xff]  ;;  %v4347_v63 = vld [vmem:[%s5359_s8 + $0x2c8] sm:$0xff] }
  0x48   :  { %5496 = vst [vmem:[#allocation135_spill] sm:$0xff] %v4342_v52  ;;  %5497 = vst [vmem:[#allocation136_spill] sm:$0xff] %v4347_v63  ;;  %v4352_v54 = vld [vmem:[%s5359_s8 + $0x2d0] sm:$0xff]  ;;  %v4357_v60 = vld [vmem:[%s5359_s8 + $0x2d8] sm:$0xff] }
  0x49   :  { %5498 = vst [vmem:[#allocation137_spill] sm:$0xff] %v4352_v54  ;;  %5499 = vst [vmem:[#allocation138_spill] sm:$0xff] %v4357_v60  ;;  %v4362_v62 = vld [vmem:[%s5359_s8 + $0x2e0] sm:$0xff]  ;;  %v4367_v52 = vld [vmem:[%s5359_s8 + $0x2e8] sm:$0xff] }
  0x4a   :  { %5500 = vst [vmem:[#allocation139_spill] sm:$0xff] %v4362_v62  ;;  %5501 = vst [vmem:[#allocation140_spill] sm:$0xff] %v4367_v52  ;;  %v4372_v63 = vld [vmem:[%s5359_s8 + $0x2f0] sm:$0xff]  ;;  %v4377_v54 = vld [vmem:[%s5359_s8 + $0x2f8] sm:$0xff] }
  0x4b   :  { %5502 = vst [vmem:[#allocation141_spill] sm:$0xff] %v4372_v63  ;;  %5503 = vst [vmem:[#allocation142_spill] sm:$0xff] %v4377_v54  ;;  %v4382_v60 = vld [vmem:[%s5359_s8 + $0x300] sm:$0xff]  ;;  %v4387_v62 = vld [vmem:[%s5359_s8 + $0x308] sm:$0xff] }
  0x4c   :  { %5504 = vst [vmem:[#allocation143_spill] sm:$0xff] %v4382_v60  ;;  %5505 = vst [vmem:[#allocation144_spill] sm:$0xff] %v4387_v62  ;;  %v4392_v52 = vld [vmem:[%s5359_s8 + $0x310] sm:$0xff]  ;;  %v4397_v63 = vld [vmem:[%s5359_s8 + $0x318] sm:$0xff] }
  0x4d   :  { %5506 = vst [vmem:[#allocation145_spill] sm:$0xff] %v4392_v52  ;;  %5507 = vst [vmem:[#allocation146_spill] sm:$0xff] %v4397_v63  ;;  %v4402_v54 = vld [vmem:[%s5359_s8 + $0x320] sm:$0xff]  ;;  %v4407_v60 = vld [vmem:[%s5359_s8 + $0x328] sm:$0xff] }
  0x4e   :  { %5508 = vst [vmem:[#allocation147_spill] sm:$0xff] %v4402_v54  ;;  %5509 = vst [vmem:[#allocation148_spill] sm:$0xff] %v4407_v60  ;;  %v4412_v62 = vld [vmem:[%s5359_s8 + $0x330] sm:$0xff]  ;;  %v4417_v52 = vld [vmem:[%s5359_s8 + $0x338] sm:$0xff] }
  0x4f   :  { %5510 = vst [vmem:[#allocation149_spill] sm:$0xff] %v4412_v62  ;;  %5511 = vst [vmem:[#allocation150_spill] sm:$0xff] %v4417_v52  ;;  %v4422_v63 = vld [vmem:[%s5359_s8 + $0x340] sm:$0xff]  ;;  %v4427_v54 = vld [vmem:[%s5359_s8 + $0x348] sm:$0xff] }
  0x50   :  { %5512 = vst [vmem:[#allocation151_spill] sm:$0xff] %v4422_v63  ;;  %5513 = vst [vmem:[#allocation152_spill] sm:$0xff] %v4427_v54  ;;  %v4432_v60 = vld [vmem:[%s5359_s8 + $0x350] sm:$0xff]  ;;  %v4437_v62 = vld [vmem:[%s5359_s8 + $0x358] sm:$0xff] }
  0x51   :  { %5514 = vst [vmem:[#allocation153_spill] sm:$0xff] %v4432_v60  ;;  %5515 = vst [vmem:[#allocation154_spill] sm:$0xff] %v4437_v62  ;;  %v4442_v52 = vld [vmem:[%s5359_s8 + $0x360] sm:$0xff]  ;;  %v4447_v63 = vld [vmem:[%s5359_s8 + $0x368] sm:$0xff] }
  0x52   :  { %5516 = vst [vmem:[#allocation155_spill] sm:$0xff] %v4442_v52  ;;  %5517 = vst [vmem:[#allocation156_spill] sm:$0xff] %v4447_v63  ;;  %v4452_v54 = vld [vmem:[%s5359_s8 + $0x370] sm:$0xff]  ;;  %v4457_v60 = vld [vmem:[%s5359_s8 + $0x378] sm:$0xff] }
  0x53   :  { %5518 = vst [vmem:[#allocation157_spill] sm:$0xff] %v4452_v54  ;;  %5519 = vst [vmem:[#allocation158_spill] sm:$0xff] %v4457_v60  ;;  %v4462_v62 = vld [vmem:[%s5359_s8 + $0x380] sm:$0xff]  ;;  %v4467_v52 = vld [vmem:[%s5359_s8 + $0x388] sm:$0xff] }
  0x54   :  { %5520 = vst [vmem:[#allocation159_spill] sm:$0xff] %v4462_v62  ;;  %5521 = vst [vmem:[#allocation160_spill] sm:$0xff] %v4467_v52  ;;  %v4472_v63 = vld [vmem:[%s5359_s8 + $0x390] sm:$0xff]  ;;  %v4477_v54 = vld [vmem:[%s5359_s8 + $0x398] sm:$0xff] }
  0x55   :  { %5522 = vst [vmem:[#allocation161_spill] sm:$0xff] %v4472_v63  ;;  %5523 = vst [vmem:[#allocation162_spill] sm:$0xff] %v4477_v54  ;;  %v4482_v60 = vld [vmem:[%s5359_s8 + $0x3a0] sm:$0xff]  ;;  %v4487_v62 = vld [vmem:[%s5359_s8 + $0x3a8] sm:$0xff] }
  0x56   :  { %5524 = vst [vmem:[#allocation163_spill] sm:$0xff] %v4482_v60  ;;  %5525 = vst [vmem:[#allocation164_spill] sm:$0xff] %v4487_v62  ;;  %v4492_v52 = vld [vmem:[%s5359_s8 + $0x3b0] sm:$0xff]  ;;  %v4497_v63 = vld [vmem:[%s5359_s8 + $0x3b8] sm:$0xff] }
  0x57   :  { %5526 = vst [vmem:[#allocation165_spill] sm:$0xff] %v4492_v52  ;;  %5527 = vst [vmem:[#allocation166_spill] sm:$0xff] %v4497_v63  ;;  %v4502_v54 = vld [vmem:[%s5359_s8 + $0x3c0] sm:$0xff]  ;;  %v4507_v60 = vld [vmem:[%s5359_s8 + $0x3c8] sm:$0xff] }
  0x58   :  { %5528 = vst [vmem:[#allocation167_spill] sm:$0xff] %v4502_v54  ;;  %5529 = vst [vmem:[#allocation168_spill] sm:$0xff] %v4507_v60  ;;  %v4512_v62 = vld [vmem:[%s5359_s8 + $0x3d0] sm:$0xff]  ;;  %v4517_v52 = vld [vmem:[%s5359_s8 + $0x3d8] sm:$0xff] }
  0x59   :  { %5530 = vst [vmem:[#allocation169_spill] sm:$0xff] %v4512_v62  ;;  %5531 = vst [vmem:[#allocation170_spill] sm:$0xff] %v4517_v52  ;;  %v4522_v63 = vld [vmem:[%s5359_s8 + $0x3e0] sm:$0xff]  ;;  %v4527_v54 = vld [vmem:[%s5359_s8 + $0x3e8] sm:$0xff] }
  0x5a   :  { %5532 = vst [vmem:[#allocation171_spill] sm:$0xff] %v4522_v63  ;;  %5533 = vst [vmem:[#allocation172_spill] sm:$0xff] %v4527_v54  ;;  %v4532_v60 = vld [vmem:[%s5359_s8 + $0x3f0] sm:$0xff]  ;;  %v4537_v62 = vld [vmem:[%s5359_s8 + $0x3f8] sm:$0xff] }
  0x5b   :  { %5534 = vst [vmem:[#allocation173_spill] sm:$0xff] %v4532_v60  ;;  %5535 = vst [vmem:[#allocation174_spill] sm:$0xff] %v4537_v62 }
  0x5c   :  { %493 = vsyncadd [#allocation6 + $0x1], 16384  ;;  %v503_v63 = vld [vmem:[%s5352_s1 + $0x8] sm:$0xff]  ;;  %v505_v52 = vld [vmem:[%s5352_s1 + $0x18] sm:$0xff]  ;;  %v5361_v61 = vmov 0.0   ;;  %vm530_vm0 = vcmask 523264  }
  0x5d   :  { %v3107_v54 = vpack.c.bf16 %v505_v52, %v503_v63  ;;  %v502_v55 = vld [vmem:[%s5352_s1] sm:$0xff]  ;;  %v504_v60 = vld [vmem:[%s5352_s1 + $0x10] sm:$0xff]  ;;  %v507_v62 = vld [vmem:[%s5352_s1 + $0x28] sm:$0xff]  ;;  %619 = vmatprep.mubr.f32.mxu0 %v5361_v61  ;;  %779 = vmatprep.mubr.f32.mxu1 %v5361_v61  ;;  %vm808_vm1 = vcmask 261120   ;;  %vm811_vm2 = vcmask 523520  }
  0x5e   :  { %v3109_v53 = vpack.c.bf16 %v504_v60, %v502_v55  ;;  %v509_v52 = vld [vmem:[%s5352_s1 + $0x38] sm:$0xff]  ;;  %v506_v63 = vld [vmem:[%s5352_s1 + $0x20] sm:$0xff]  ;;  %v508_v46 = vld [vmem:[%s5352_s1 + $0x30] sm:$0xff] }
  0x5f   :  { %3108 = vmatprep.subr.bf16.mxu0 %v3107_v54  ;;  %v3111_v38 = vpack.c.bf16 %v509_v52, %v507_v62  ;;  %v511_v44 = vld [vmem:[%s5352_s1 + $0x48] sm:$0xff]  ;;  %v513_v55 = vld [vmem:[%s5352_s1 + $0x58] sm:$0xff]  ;;  %v3113_v60 = vpack.c.bf16 %v508_v46, %v506_v63  ;;  %v510_v61 = vld [vmem:[%s5352_s1 + $0x40] sm:$0xff] }
  0x60   :  { %3110 = vmatpush1.bf16.msra.mxu0 %v3109_v53  ;;  %v685_v36 = vld [vmem:[%s5353_s2 + $0x8] sm:$0xff]  ;;  %v687_v54 = vld [vmem:[%s5353_s2 + $0x18] sm:$0xff]  ;;  %v3115_v62 = vpack.c.bf16 %v513_v55, %v511_v44  ;;  %v512_v52 = vld [vmem:[%s5352_s1 + $0x50] sm:$0xff] }
  0x61   :  { %3112 = vmatprep.subr.bf16.mxu0 %v3111_v38  ;;  %v4583_v53 = vpack.c.bf16 %v687_v54, %v685_v36  ;;  %v684_v46 = vld [vmem:[%s5353_s2] sm:$0xff]  ;;  %v686_v63 = vld [vmem:[%s5353_s2 + $0x10] sm:$0xff]  ;;  %v515_v38 = vld [vmem:[%s5352_s1 + $0x68] sm:$0xff] }
  0x62   :  { %v4591_v47 = vpack.c.bf16 %v686_v63, %v684_v46  ;;  %v517_v44 = vld [vmem:[%s5352_s1 + $0x78] sm:$0xff]  ;;  %v514_v36 = vld [vmem:[%s5352_s1 + $0x60] sm:$0xff]  ;;  %v689_v55 = vld [vmem:[%s5353_s2 + $0x28] sm:$0xff]  ;;  %v3117_v63 = vpack.c.bf16 %v512_v52, %v510_v61 }
  0x63   :  { %3124 = vmatprep.subr.bf16.mxu1 %v4583_v53  ;;  %v691_v54 = vld [vmem:[%s5353_s2 + $0x38] sm:$0xff]  ;;  %v688_v46 = vld [vmem:[%s5353_s2 + $0x20] sm:$0xff]  ;;  %v516_v39 = vld [vmem:[%s5352_s1 + $0x70] sm:$0xff]  ;;  %v3119_v22 = vpack.c.bf16 %v517_v44, %v515_v38 }
  0x64   :  { %3114 = vmatpush1.bf16.msra.mxu0 %v3113_v60  ;;  %3126 = vmatpush1.bf16.msra.mxu1 %v4591_v47  ;;  %v4616_v45 = vpack.c.bf16 %v691_v54, %v689_v55  ;;  %v690_v37 = vld [vmem:[%s5353_s2 + $0x30] sm:$0xff]  ;;  %v693_v30 = vld [vmem:[%s5353_s2 + $0x48] sm:$0xff]  ;;  %v695_v61 = vld [vmem:[%s5353_s2 + $0x58] sm:$0xff]  ;;  %v3121_v38 = vpack.c.bf16 %v516_v39, %v514_v36  ;;  %v5537_v36 = vmov 0.0  }
  0x65   :  { %3116 = vmatprep.subr.bf16.mxu0 %v3115_v62  ;;  %v4624_v60 = vpack.c.bf16 %v690_v37, %v688_v46  ;;  %v692_v52 = vld [vmem:[%s5353_s2 + $0x40] sm:$0xff]  ;;  %v694_v55 = vld [vmem:[%s5353_s2 + $0x50] sm:$0xff]  ;;  %v4636_v54 = vpack.c.bf16 %v695_v61, %v693_v30  ;;  %v697_v37 = vld [vmem:[%s5353_s2 + $0x68] sm:$0xff] }
  0x66   :  { %3128 = vmatprep.subr.bf16.mxu1 %v4616_v45  ;;  %v699_v62 = vld [vmem:[%s5353_s2 + $0x78] sm:$0xff]  ;;  %v4645_v44 = vpack.c.bf16 %v694_v55, %v692_v52  ;;  %v696_v30 = vld [vmem:[%s5353_s2 + $0x60] sm:$0xff]  ;;  %v698_v61 = vld [vmem:[%s5353_s2 + $0x70] sm:$0xff] }
  0x67   :  { %v4648_v46 = vpack.c.bf16 %v699_v62, %v697_v37  ;;  %v4659_v39 = vld [vmem:[%s5351_s0] sm:$0xff]  ;;  %v4742_v12 = vld [vmem:[%s5351_s0 + $0x10] sm:$0xff] }
  0x68   :  { %3118 = vmatpush1.bf16.msra.mxu0 %v3117_v63  ;;  %3130 = vmatpush1.bf16.msra.mxu1 %v4624_v60  ;;  %5536 = vst [vmem:[#allocation175_spill] sm:$0xff] %v4659_v39  ;;  %v520_v63 = vlaneseq  ;;  %v518_v37 = vld [vmem:[%s5354_s3] sm:$0x3]  ;;  %5540 = vst [vmem:[#allocation178_spill] sm:$0xff] %v4742_v12 }
  0x69   :  { %3120 = vmatprep.subr.bf16.mxu0 %v3119_v22  ;;  %3132 = vmatprep.subr.bf16.mxu1 %v4636_v54  ;;  %v4662_v22 = vpack.c.bf16 %v698_v61, %v696_v30 }
  0x6a   :  { %v4689_v52 = vshrl.u32 %v520_v63, 7 }
  0x6c   :  { %3122 = vmatpush1.bf16.msra.mxu0 %v3121_v38  ;;  %3134 = vmatpush1.bf16.msra.mxu1 %v4645_v44  ;;  %5538 = vst [vmem:[#allocation176_spill] sm:$0xff] %v4689_v52  ;;  %v5364_v55 = vsub.s32 0, %v4689_v52  ;;  %v5365_v62 = vsub.s32 1, %v4689_v52 }
  0x6d   :  { %3136 = vmatprep.subr.bf16.mxu1 %v4648_v46  ;;  %3156 = vmatprep.subr.bf16.mxu0 %v4583_v53 }
  0x6e   :  { %v4698_v38 = vrot.slane %v518_v37, %v5364_v55  ;;  %v4702_v30 = vrot.slane %v518_v37, %v5365_v62  ;;  %v4710_v37 = vld [vmem:[%s5355_s4] ss:$0 sm:$0xff]  ;;  %s3525_s4 = smov 64  }
  0x6f   :  { %2824 = vmatmul.mubr.msk.f32.vlgmr.msra.gmra.mrb[0].mxu0 %vm530_vm0, %v4659_v39 }
  0x70   :  { %3138 = vmatpush1.bf16.msra.mxu1 %v4662_v22  ;;  %625 = vmatprep.mubr.f32.mxu0 %v5537_v36 }
  0x71   :  { %3140 = vmatprep.subr.bf16.mxu1 %v4583_v53  ;;  %3158 = vmatpush1.bf16.msra.mxu0 %v4591_v47 }
  0x72   :  { %3160 = vmatprep.subr.bf16.mxu0 %v4616_v45 }
  0x73   :  { %780 = vmatmul.mubr.f32.vlgmr.msra.gmra.mrb[0].mxu1 %v5537_v36 }
  0x74   :  { %3142 = vmatpush1.bf16.msra.mxu1 %v4591_v47  ;;  %884 = vmatprep.mubr.f32.mxu1 %v5537_v36 }
  0x75   :  { %3144 = vmatprep.subr.bf16.mxu1 %v4616_v45  ;;  %3162 = vmatpush1.bf16.msra.mxu0 %v4624_v60 }
  0x76   :  { %3164 = vmatprep.subr.bf16.mxu0 %v4636_v54 }
  0x78   :  { %3146 = vmatpush1.bf16.msra.mxu1 %v4624_v60 }
  0x79   :  { %3148 = vmatprep.subr.bf16.mxu1 %v4636_v54  ;;  %3166 = vmatpush1.bf16.msra.mxu0 %v4645_v44 }
  0x7a   :  { %3168 = vmatprep.subr.bf16.mxu0 %v4648_v46 }
  0x7c   :  { %3150 = vmatpush1.bf16.msra.mxu1 %v4645_v44 }
  0x7d   :  { %3152 = vmatprep.subr.bf16.mxu1 %v4648_v46  ;;  %3170 = vmatpush1.bf16.msra.mxu0 %v4662_v22 }
  0x7e   :  { %3188 = vmatprep.subr.bf16.mxu0 %v4583_v53 }
  0x80   :  { %3154 = vmatpush1.bf16.msra.mxu1 %v4662_v22 }
  0x81   :  { %3172 = vmatprep.subr.bf16.mxu1 %v4583_v53 }
 0x142   :  { %v621_v61 = vpop.f32.mrb[0].mxu0 }
 0x143   :  { %v622_v63 = vadd.f32 %v621_v61, %v4698_v38  ;;  %v623_v39 = vpop.f32.mrb[1].mxu0 }
 0x144   :  { %v624_v28 = vadd.f32 %v623_v39, %v4702_v30 }
 0x146   :  { %669 = vst.msk [vmem:[#allocation2 + $0x8] sm:$0xff] %vm530_vm0, %v624_v28  ;;  %v781_v20 = vpop.f32.mrb[0].mxu1 }
 0x147   :  { %v786_v31 = vadd.f32 %v781_v20, %v622_v63  ;;  %v783_v23 = vpop.f32.mrb[1].mxu1  ;;  %v4716_v20 = vld [vmem:[%s5351_s0 + $0x8] sm:$0xff] }
 0x148   :  { %v793_v61 = vadd.f32 %v4710_v37, %v783_v23  ;;  %5539 = vst [vmem:[#allocation177_spill] sm:$0xff] %v4716_v20  ;;  %2825 = vmatmul.mubr.msk.f32.gmra.mrb[2].mxu0 %vm530_vm0, %v4716_v20 }
 0x149   :  { %v2833_v29 = vmul.f32 -1.442695, %v786_v31  ;;  %631 = vmatprep.mubr.f32.mxu0 %v5537_v36 }
 0x14b   :  { %3448 = vpow2.f32 %v2833_v29 }
 0x14c   :  { %2826 = vmatmul.mubr.msk.f32.gmra.mrb[4].mxu0 %vm530_vm0, %v4742_v12 }
 0x14d   :  { %v711_v39 = vld [vmem:[#allocation2 + $0x8] sm:$0xff]  ;;  %637 = vmatprep.mubr.f32.mxu0 %v5537_v36 }
 0x155   :  { %v3449_v21 = vpop.eup %3448 }
 0x156   :  { %v790_v55 = vadd.f32 1.0, %v3449_v21 }
 0x158   :  { %3450 = vrcp.f32 %v790_v55 }
 0x162   :  { %v3451_v62 = vpop.eup %3450 }
 0x163   :  { %v794_v52 = vmul.f32 %v3451_v62, %v793_v61  ;;  %v797_v23 = vsub.f32 1.0, %v3451_v62 }
 0x165   :  { %v795_v14 = vadd.f32 %v794_v52, %v711_v39 }
 0x167   :  { %3452 = vtanh.f32 %v795_v14 }
 0x171   :  { %v3453_v21 = vpop.eup %3452 }
 0x172   :  { %799 = vrot.lane.b32.xlu0 %v3453_v21, %s3525_s4 }
 0x1e4   :  { %v800_v28 = vpop.permute.xlu0 %799 }
 0x1e5   :  { %v802_v29 = vmul.f32 %v800_v28, %v797_v23 }
 0x1e7   :  { %805 = vrot.lane.b32.xlu0 %v802_v29, %s3525_s4 }
 0x21b   :  { %v627_v14 = vpop.f32.mrb[2].mxu0 }
 0x21c   :  { %v628_v31 = vadd.f32 %v627_v14, %v4698_v38  ;;  %v629_v52 = vpop.f32.mrb[3].mxu0 }
 0x21d   :  { %v630_v55 = vadd.f32 %v629_v52, %v4702_v30 }
 0x21f   :  { %671 = vst.msk [vmem:[#allocation2 + $0x18] sm:$0xff] %vm530_vm0, %v630_v55 }
 0x226   :  { %v817_v20 = vld [vmem:[#allocation2 + $0x18] sm:$0xff] }
 0x259   :  { %v806_v63 = vpop.permute.xlu0 %805 }
 0x25a   :  { %2834 = vmatmul.mubr.msk.f32.vlgmr.msra.gmra.mrb[2].mxu1 %vm530_vm0, %v806_v63  ;;  %809 = vst.msk [vmem:[#allocation3] sm:$0xff] %vm808_vm1, %v806_v63 }
 0x25b   :  { %812 = vst.msk [vmem:[#allocation3 + $0x38] sm:$0xff] %vm811_vm2, %v806_v63  ;;  %3174 = vmatpush1.bf16.msra.mxu1 %v4591_v47  ;;  %1094 = vmatprep.mubr.f32.mxu1 %v5537_v36 }
 0x25c   :  { %3176 = vmatprep.subr.bf16.mxu1 %v4616_v45 }
 0x25f   :  { %3178 = vmatpush1.bf16.msra.mxu1 %v4624_v60 }
 0x260   :  { %3180 = vmatprep.subr.bf16.mxu1 %v4636_v54 }
 0x263   :  { %3182 = vmatpush1.bf16.msra.mxu1 %v4645_v44 }
 0x264   :  { %3184 = vmatprep.subr.bf16.mxu1 %v4648_v46 }
 0x267   :  { %3186 = vmatpush1.bf16.msra.mxu1 %v4662_v22 }
 0x268   :  { %3204 = vmatprep.subr.bf16.mxu1 %v4583_v53 }
 0x32d   :  { %v886_v62 = vpop.f32.mrb[2].mxu1 }
 0x32e   :  { %v891_v61 = vadd.f32 %v886_v62, %v628_v31  ;;  %v888_v39 = vpop.f32.mrb[3].mxu1  ;;  %v4750_v31 = vld [vmem:[%s5351_s0 + $0x18] sm:$0xff] }
 0x32f   :  { %v898_v14 = vadd.f32 %v4710_v37, %v888_v39  ;;  %5541 = vst [vmem:[#allocation179_spill] sm:$0xff] %v4750_v31  ;;  %2827 = vmatmul.mubr.msk.f32.gmra.mrb[6].mxu0 %vm530_vm0, %v4750_v31  ;;  %v4783_v39 = vld [vmem:[%s5351_s0 + $0x38] sm:$0xff] }
 0x330   :  { %v2835_v21 = vmul.f32 -1.442695, %v891_v61  ;;  %643 = vmatprep.mubr.f32.mxu0 %v5537_v36  ;;  %v4767_v61 = vld [vmem:[%s5351_s0 + $0x28] sm:$0xff]  ;;  %5545 = vst [vmem:[#allocation183_spill] sm:$0xff] %v4783_v39 }
 0x331   :  { %5543 = vst [vmem:[#allocation181_spill] sm:$0xff] %v4767_v61 }
 0x332   :  { %3454 = vpow2.f32 %v2835_v21 }
 0x33c   :  { %v3455_v23 = vpop.eup %3454 }
 0x33d   :  { %v895_v28 = vadd.f32 1.0, %v3455_v23 }
 0x33f   :  { %3456 = vrcp.f32 %v895_v28 }
 0x349   :  { %v3457_v52 = vpop.eup %3456 }
 0x34a   :  { %v899_v55 = vmul.f32 %v3457_v52, %v898_v14  ;;  %v902_v21 = vsub.f32 1.0, %v3457_v52 }
 0x34c   :  { %v900_v6 = vadd.f32 %v899_v55, %v817_v20  ;;  %v633_v55 = vpop.f32.mrb[4].mxu0 }
 0x34e   :  { %3458 = vtanh.f32 %v900_v6  ;;  %v4758_v6 = vld [vmem:[%s5351_s0 + $0x20] sm:$0xff] }
 0x34f   :  { %5542 = vst [vmem:[#allocation180_spill] sm:$0xff] %v4758_v6  ;;  %2828 = vmatmul.mubr.msk.f32.gmra.mrb[8].mxu0 %vm530_vm0, %v4758_v6 }
 0x350   :  { %649 = vmatprep.mubr.f32.mxu0 %v5537_v36 }
 0x353   :  { %2829 = vmatmul.mubr.msk.f32.gmra.mrb[10].mxu0 %vm530_vm0, %v4767_v61 }
 0x354   :  { %655 = vmatprep.mubr.f32.mxu0 %v5537_v36 }
 0x358   :  { %v3459_v20 = vpop.eup %3458 }
 0x359   :  { %v903_v62 = vsub.f32 %v3459_v20, %v806_v63  ;;  %v4775_v63 = vld [vmem:[%s5351_s0 + $0x30] sm:$0xff]  ;;  %v634_v20 = vadd.f32 %v633_v55, %v4698_v38 }
 0x35a   :  { %5544 = vst [vmem:[#allocation182_spill] sm:$0xff] %v4775_v63  ;;  %2830 = vmatmul.mubr.msk.f32.gmra.mrb[12].mxu0 %vm530_vm0, %v4775_v63 }
 0x35b   :  { %905 = vrot.lane.b32.xlu1 %v903_v62, %s3525_s4  ;;  %661 = vmatprep.mubr.f32.mxu0 %v5537_v36  ;;  %v635_v62 = vpop.f32.mrb[5].mxu0 }
 0x35c   :  { %v636_v63 = vadd.f32 %v635_v62, %v4702_v30 }
 0x35e   :  { %2831 = vmatmul.mubr.msk.f32.gmra.mrb[14].mxu0 %vm530_vm0, %v4783_v39  ;;  %673 = vst.msk [vmem:[#allocation2 + $0x28] sm:$0xff] %vm530_vm0, %v636_v63 }
 0x35f   :  { %989 = vmatprep.mubr.f32.mxu0 %v5537_v36 }
 0x365   :  { %v922_v4 = vld [vmem:[#allocation2 + $0x28] sm:$0xff] }
 0x3cd   :  { %v906_v23 = vpop.permute.xlu1 %905 }
 0x3ce   :  { %v908_v28 = vmul.f32 %v906_v23, %v902_v21 }
 0x3d0   :  { %v4788_v14 = vadd.f32 %v908_v28, %v802_v29 }
 0x3d2   :  { %911 = vrot.lane.b32.xlu1 %v4788_v14, %s3525_s4 }
 0x402   :  { %v639_v61 = vpop.f32.mrb[6].mxu0 }
 0x403   :  { %v4796_v39 = vadd.f32 %v639_v61, %v4698_v38  ;;  %v641_v52 = vpop.f32.mrb[7].mxu0 }
 0x404   :  { %v642_v21 = vadd.f32 %v641_v52, %v4702_v30 }
 0x406   :  { %675 = vst.msk [vmem:[#allocation2 + $0x38] sm:$0xff] %vm530_vm0, %v642_v21 }
 0x422   :  { %v645_v29 = vpop.f32.mrb[8].mxu0 }
 0x423   :  { %v4801_v23 = vadd.f32 %v645_v29, %v4698_v38  ;;  %v647_v28 = vpop.f32.mrb[9].mxu0 }
 0x424   :  { %v648_v55 = vadd.f32 %v647_v28, %v4702_v30 }
 0x426   :  { %677 = vst.msk [vmem:[#allocation2 + $0x48] sm:$0xff] %vm530_vm0, %v648_v55  ;;  %v651_v62 = vpop.f32.mrb[10].mxu0 }
 0x427   :  { %v4806_v63 = vadd.f32 %v651_v62, %v4698_v38  ;;  %v653_v61 = vpop.f32.mrb[11].mxu0 }
 0x428   :  { %v654_v6 = vadd.f32 %v653_v61, %v4702_v30 }
 0x42a   :  { %679 = vst.msk [vmem:[#allocation2 + $0x58] sm:$0xff] %vm530_vm0, %v654_v6 }
 0x42d   :  { %v657_v52 = vpop.f32.mrb[12].mxu0 }
 0x42e   :  { %v4811_v21 = vadd.f32 %v657_v52, %v4698_v38  ;;  %v659_v29 = vpop.f32.mrb[13].mxu0 }
 0x42f   :  { %v660_v31 = vadd.f32 %v659_v29, %v4702_v30 }
 0x431   :  { %681 = vst.msk [vmem:[#allocation2 + $0x68] sm:$0xff] %vm530_vm0, %v660_v31  ;;  %v663_v28 = vpop.f32.mrb[14].mxu0 }
 0x432   :  { %v4816_v55 = vadd.f32 %v663_v28, %v4698_v38  ;;  %v665_v62 = vpop.f32.mrb[15].mxu0 }
 0x433   :  { %v666_v12 = vadd.f32 %v665_v62, %v4702_v30 }
 0x435   :  { %683 = vst.msk [vmem:[#allocation2 + $0x78] sm:$0xff] %vm530_vm0, %v666_v12 }
 0x444   :  { %v912_v61 = vpop.permute.xlu1 %911 }
 0x445   :  { %915 = vst.msk [vmem:[#allocation3 + $0x8] sm:$0xff] %vm808_vm1, %v912_v61  ;;  %2836 = vmatmul.mubr.msk.f32.vlgmr.msra.gmra.mrb[16].mxu0 %vm530_vm0, %v912_v61 }
 0x446   :  { %917 = vst.msk [vmem:[#allocation3 + $0x30] sm:$0xff] %vm811_vm2, %v912_v61  ;;  %3190 = vmatpush1.bf16.msra.mxu0 %v4591_v47  ;;  %1199 = vmatprep.mubr.f32.mxu0 %v5537_v36 }
 0x447   :  { %3192 = vmatprep.subr.bf16.mxu0 %v4616_v45 }
 0x44a   :  { %3194 = vmatpush1.bf16.msra.mxu0 %v4624_v60 }
 0x44b   :  { %3196 = vmatprep.subr.bf16.mxu0 %v4636_v54 }
 0x44e   :  { %3198 = vmatpush1.bf16.msra.mxu0 %v4645_v44 }
 0x44f   :  { %3200 = vmatprep.subr.bf16.mxu0 %v4648_v46 }
 0x452   :  { %3202 = vmatpush1.bf16.msra.mxu0 %v4662_v22 }
 0x453   :  { %3220 = vmatprep.subr.bf16.mxu0 %v4583_v53 }
 0x518   :  { %v991_v12 = vpop.f32.mrb[16].mxu0 }
 0x519   :  { %v996_v38 = vadd.f32 %v991_v12, %v634_v20  ;;  %v993_v30 = vpop.f32.mrb[17].mxu0 }
 0x51a   :  { %v1003_v29 = vadd.f32 %v4710_v37, %v993_v30 }
 0x51b   :  { %v2837_v31 = vmul.f32 -1.442695, %v996_v38 }
 0x51d   :  { %3460 = vpow2.f32 %v2837_v31  ;;  %v1027_v31 = vld [vmem:[#allocation2 + $0x38] sm:$0xff] }
 0x527   :  { %v3461_v6 = vpop.eup %3460 }
 0x528   :  { %v1000_v52 = vadd.f32 1.0, %v3461_v6 }
 0x52a   :  { %3462 = vrcp.f32 %v1000_v52 }
 0x534   :  { %v3463_v28 = vpop.eup %3462 }
 0x535   :  { %v1004_v62 = vmul.f32 %v3463_v28, %v1003_v29  ;;  %v1007_v5 = vsub.f32 1.0, %v3463_v28 }
 0x537   :  { %v1005_v15 = vadd.f32 %v1004_v62, %v922_v4 }
 0x539   :  { %3464 = vtanh.f32 %v1005_v15 }
 0x543   :  { %v3465_v7 = vpop.eup %3464 }
 0x544   :  { %v1008_v13 = vsub.f32 %v3465_v7, %v912_v61 }
 0x546   :  { %1010 = vrot.lane.b32.xlu0 %v1008_v13, %s3525_s4 }
 0x5b8   :  { %v1011_v58 = vpop.permute.xlu0 %1010 }
 0x5b9   :  { %v1013_v20 = vmul.f32 %v1011_v58, %v1007_v5 }
 0x5bb   :  { %v1014_v12 = vadd.f32 %v1013_v20, %v4788_v14 }
 0x5bd   :  { %1016 = vrot.lane.b32.xlu1 %v1014_v12, %s3525_s4 }
 0x62f   :  { %v1017_v38 = vpop.permute.xlu1 %1016 }
 0x630   :  { %1020 = vst.msk [vmem:[#allocation3 + $0x10] sm:$0xff] %vm808_vm1, %v1017_v38  ;;  %2838 = vmatmul.mubr.msk.f32.vlgmr.msra.gmra.mrb[4].mxu1 %vm530_vm0, %v1017_v38 }
 0x631   :  { %1022 = vst.msk [vmem:[#allocation3 + $0x28] sm:$0xff] %vm811_vm2, %v1017_v38  ;;  %3206 = vmatpush1.bf16.msra.mxu1 %v4591_v47  ;;  %1302 = vmatprep.mubr.f32.mxu1 %v5537_v36 }
 0x632   :  { %3208 = vmatprep.subr.bf16.mxu1 %v4616_v45 }
 0x635   :  { %3210 = vmatpush1.bf16.msra.mxu1 %v4624_v60 }
 0x636   :  { %3212 = vmatprep.subr.bf16.mxu1 %v4636_v54 }
 0x639   :  { %3214 = vmatpush1.bf16.msra.mxu1 %v4645_v44 }
 0x63a   :  { %3216 = vmatprep.subr.bf16.mxu1 %v4648_v46 }
 0x63d   :  { %3218 = vmatpush1.bf16.msra.mxu1 %v4662_v22 }
 0x63e   :  { %3236 = vmatprep.subr.bf16.mxu1 %v4583_v53 }
 0x703   :  { %v1096_v4 = vpop.f32.mrb[4].mxu1 }
 0x704   :  { %v1101_v5 = vadd.f32 %v1096_v4, %v4796_v39  ;;  %v1098_v7 = vpop.f32.mrb[5].mxu1 }
 0x705   :  { %v1108_v14 = vadd.f32 %v4710_v37, %v1098_v7 }
 0x706   :  { %v2839_v13 = vmul.f32 -1.442695, %v1101_v5 }
 0x708   :  { %3466 = vpow2.f32 %v2839_v13 }
 0x712   :  { %v3467_v15 = vpop.eup %3466 }
 0x713   :  { %v1105_v58 = vadd.f32 1.0, %v3467_v15 }
 0x715   :  { %3468 = vrcp.f32 %v1105_v58 }
 0x71f   :  { %v3469_v61 = vpop.eup %3468 }
 0x720   :  { %v1109_v30 = vmul.f32 %v3469_v61, %v1108_v14  ;;  %v1112_v53 = vsub.f32 1.0, %v3469_v61  ;;  %v1132_v61 = vld [vmem:[#allocation2 + $0x48] sm:$0xff] }
 0x722   :  { %v1110_v6 = vadd.f32 %v1109_v30, %v1027_v31 }
 0x724   :  { %3470 = vtanh.f32 %v1110_v6 }
 0x72e   :  { %v3471_v52 = vpop.eup %3470 }
 0x72f   :  { %v1113_v29 = vsub.f32 %v3471_v52, %v1017_v38 }
 0x731   :  { %1115 = vrot.lane.b32.xlu0 %v1113_v29, %s3525_s4 }
 0x7a3   :  { %v1116_v28 = vpop.permute.xlu0 %1115 }
 0x7a4   :  { %v1118_v39 = vmul.f32 %v1116_v28, %v1112_v53 }
 0x7a6   :  { %v1119_v62 = vadd.f32 %v1118_v39, %v1014_v12 }
 0x7a8   :  { %1121 = vrot.lane.b32.xlu1 %v1119_v62, %s3525_s4 }
 0x81a   :  { %v1122_v20 = vpop.permute.xlu1 %1121 }
 0x81b   :  { %1125 = vst.msk [vmem:[#allocation3 + $0x18] sm:$0xff] %vm808_vm1, %v1122_v20  ;;  %2840 = vmatmul.mubr.msk.f32.vlgmr.msra.gmra.mrb[18].mxu0 %vm530_vm0, %v1122_v20 }
 0x81c   :  { %1127 = vst.msk [vmem:[#allocation3 + $0x20] sm:$0xff] %vm811_vm2, %v1122_v20  ;;  %3222 = vmatpush1.bf16.msra.mxu0 %v4591_v47  ;;  %1405 = vmatprep.mubr.f32.mxu0 %v5537_v36 }
 0x81d   :  { %3224 = vmatprep.subr.bf16.mxu0 %v4616_v45 }
 0x820   :  { %3226 = vmatpush1.bf16.msra.mxu0 %v4624_v60 }
 0x821   :  { %3228 = vmatprep.subr.bf16.mxu0 %v4636_v54 }
 0x824   :  { %3230 = vmatpush1.bf16.msra.mxu0 %v4645_v44 }
 0x825   :  { %3232 = vmatprep.subr.bf16.mxu0 %v4648_v46 }
 0x828   :  { %3234 = vmatpush1.bf16.msra.mxu0 %v4662_v22 }
 0x8ee   :  { %v1201_v12 = vpop.f32.mrb[18].mxu0 }
 0x8ef   :  { %v1206_v38 = vadd.f32 %v1201_v12, %v4801_v23  ;;  %v1203_v4 = vpop.f32.mrb[19].mxu0 }
 0x8f0   :  { %v1213_v15 = vadd.f32 %v4710_v37, %v1203_v4 }
 0x8f1   :  { %v2841_v5 = vmul.f32 -1.442695, %v1206_v38 }
 0x8f3   :  { %3472 = vpow2.f32 %v2841_v5 }
 0x8fd   :  { %v3473_v7 = vpop.eup %3472 }
 0x8fe   :  { %v1210_v13 = vadd.f32 1.0, %v3473_v7 }
 0x900   :  { %3474 = vrcp.f32 %v1210_v13 }
 0x90a   :  { %v3475_v58 = vpop.eup %3474 }
 0x90b   :  { %v1214_v14 = vmul.f32 %v3475_v58, %v1213_v15  ;;  %v1217_v52 = vsub.f32 1.0, %v3475_v58 }
 0x90d   :  { %v1215_v30 = vadd.f32 %v1214_v14, %v1132_v61 }
 0x90f   :  { %3476 = vtanh.f32 %v1215_v30 }
 0x919   :  { %v3477_v31 = vpop.eup %3476 }
 0x91a   :  { %v1218_v6 = vsub.f32 %v3477_v31, %v1122_v20 }
 0x91c   :  { %1220 = vrot.lane.b32.xlu0 %v1218_v6, %s3525_s4 }
 0x98e   :  { %v1221_v29 = vpop.permute.xlu0 %1220 }
 0x98f   :  { %v1223_v23 = vmul.f32 %v1221_v29, %v1217_v52 }
 0x991   :  { %v1224_v53 = vadd.f32 %v1223_v23, %v1119_v62 }
 0x993   :  { %1226 = vrot.lane.b32.xlu1 %v1224_v53, %s3525_s4 }
 0xa05   :  { %v1227_v28 = vpop.permute.xlu1 %1226 }
 0xa06   :  { %1229 = vst.msk [vmem:[#allocation3 + $0x20] sm:$0xff] %vm808_vm1, %v1227_v28  ;;  %2842 = vmatmul.mubr.msk.f32.vlgmr.msra.gmra.mrb[6].mxu1 %vm530_vm0, %v1227_v28 }
 0xa07   :  { %1230 = vst.msk [vmem:[#allocation3 + $0x18] sm:$0xff] %vm811_vm2, %v1227_v28  ;;  %3238 = vmatpush1.bf16.msra.mxu1 %v4591_v47  ;;  %1508 = vmatprep.mubr.f32.mxu1 %v5537_v36 }
 0xa08   :  { %3240 = vmatprep.subr.bf16.mxu1 %v4616_v45 }
 0xa0b   :  { %3242 = vmatpush1.bf16.msra.mxu1 %v4624_v60 }
 0xa0c   :  { %3244 = vmatprep.subr.bf16.mxu1 %v4636_v54  ;;  %v1235_v54 = vld [vmem:[#allocation2 + $0x58] sm:$0xff] }
 0xa0f   :  { %3246 = vmatpush1.bf16.msra.mxu1 %v4645_v44 }
 0xa10   :  { %3248 = vmatprep.subr.bf16.mxu1 %v4648_v46 }
 0xa13   :  { %3250 = vmatpush1.bf16.msra.mxu1 %v4662_v22 }
 0xad9   :  { %v1304_v39 = vpop.f32.mrb[6].mxu1 }
 0xada   :  { %v1309_v62 = vadd.f32 %v1304_v39, %v4806_v63  ;;  %v1306_v20 = vpop.f32.mrb[7].mxu1 }
 0xadb   :  { %v1316_v45 = vadd.f32 %v4710_v37, %v1306_v20 }
 0xadc   :  { %v2843_v12 = vmul.f32 -1.442695, %v1309_v62 }
 0xade   :  { %3478 = vpow2.f32 %v2843_v12 }
 0xae8   :  { %v3479_v47 = vpop.eup %3478 }
 0xae9   :  { %v1313_v38 = vadd.f32 1.0, %v3479_v47 }
 0xaeb   :  { %3480 = vrcp.f32 %v1313_v38 }
 0xaf5   :  { %v3481_v60 = vpop.eup %3480 }
 0xaf6   :  { %v1317_v4 = vmul.f32 %v3481_v60, %v1316_v45  ;;  %v1320_v22 = vsub.f32 1.0, %v3481_v60 }
 0xaf8   :  { %v1318_v5 = vadd.f32 %v1317_v4, %v1235_v54 }
 0xafa   :  { %3482 = vtanh.f32 %v1318_v5 }
 0xb04   :  { %v3483_v44 = vpop.eup %3482 }
 0xb05   :  { %v1321_v46 = vsub.f32 %v3483_v44, %v1227_v28 }
 0xb07   :  { %1323 = vrot.lane.b32.xlu0 %v1321_v46, %s3525_s4 }
 0xb79   :  { %v1324_v7 = vpop.permute.xlu0 %1323 }
 0xb7a   :  { %v1326_v63 = vmul.f32 %v1324_v7, %v1320_v22 }
 0xb7c   :  { %v1327_v13 = vadd.f32 %v1326_v63, %v1224_v53  ;;  %v1338_v53 = vld [vmem:[#allocation2 + $0x68] sm:$0xff]  ;;  %v1441_v63 = vld [vmem:[#allocation2 + $0x78] sm:$0xff] }
 0xb7e   :  { %1329 = vrot.lane.b32.xlu1 %v1327_v13, %s3525_s4 }
 0xbf0   :  { %v1330_v15 = vpop.permute.xlu1 %1329 }
 0xbf1   :  { %1332 = vst.msk [vmem:[#allocation3 + $0x28] sm:$0xff] %vm808_vm1, %v1330_v15  ;;  %2844 = vmatmul.mubr.msk.f32.vlgmr.msra.gmra.mrb[20].mxu0 %vm530_vm0, %v1330_v15 }
 0xbf2   :  { %1333 = vst.msk [vmem:[#allocation3 + $0x10] sm:$0xff] %vm811_vm2, %v1330_v15 }
 0xcc4   :  { %v1407_v58 = vpop.f32.mrb[20].mxu0 }
 0xcc5   :  { %v1412_v14 = vadd.f32 %v1407_v58, %v4811_v21  ;;  %v1409_v61 = vpop.f32.mrb[21].mxu0 }
 0xcc6   :  { %v1419_v52 = vadd.f32 %v4710_v37, %v1409_v61 }
 0xcc7   :  { %v2845_v30 = vmul.f32 -1.442695, %v1412_v14 }
 0xcc9   :  { %3484 = vpow2.f32 %v2845_v30 }
 0xcd3   :  { %v3485_v31 = vpop.eup %3484 }
 0xcd4   :  { %v1416_v6 = vadd.f32 1.0, %v3485_v31 }
 0xcd6   :  { %3486 = vrcp.f32 %v1416_v6 }
 0xce0   :  { %v3487_v29 = vpop.eup %3486 }
 0xce1   :  { %v1420_v23 = vmul.f32 %v3487_v29, %v1419_v52  ;;  %v1423_v20 = vsub.f32 1.0, %v3487_v29 }
 0xce3   :  { %v1421_v28 = vadd.f32 %v1420_v23, %v1338_v53 }
 0xce5   :  { %3488 = vtanh.f32 %v1421_v28 }
 0xcef   :  { %v3489_v39 = vpop.eup %3488 }
 0xcf0   :  { %v1424_v62 = vsub.f32 %v3489_v39, %v1330_v15 }
 0xcf2   :  { %1426 = vrot.lane.b32.xlu0 %v1424_v62, %s3525_s4 }
 0xd64   :  { %v1427_v12 = vpop.permute.xlu0 %1426 }
 0xd65   :  { %v1429_v21 = vmul.f32 %v1427_v12, %v1423_v20 }
 0xd67   :  { %v1430_v47 = vadd.f32 %v1429_v21, %v1327_v13 }
 0xd69   :  { %1432 = vrot.lane.b32.xlu1 %v1430_v47, %s3525_s4 }
 0xddb   :  { %v1433_v38 = vpop.permute.xlu1 %1432 }
 0xddc   :  { %1435 = vst.msk [vmem:[#allocation3 + $0x30] sm:$0xff] %vm808_vm1, %v1433_v38  ;;  %2846 = vmatmul.mubr.msk.f32.vlgmr.msra.gmra.mrb[8].mxu1 %vm530_vm0, %v1433_v38 }
 0xddd   :  { %1436 = vst.msk [vmem:[#allocation3 + $0x8] sm:$0xff] %vm811_vm2, %v1433_v38 }
 0xeaf   :  { %v1510_v45 = vpop.f32.mrb[8].mxu1 }
 0xeb0   :  { %v1515_v60 = vadd.f32 %v1510_v45, %v4816_v55  ;;  %v1512_v4 = vpop.f32.mrb[9].mxu1 }
 0xeb1   :  { %v1522_v46 = vadd.f32 %v4710_v37, %v1512_v4 }
 0xeb2   :  { %v2847_v54 = vmul.f32 -1.442695, %v1515_v60 }
 0xeb4   :  { %3490 = vpow2.f32 %v2847_v54 }
 0xebe   :  { %v3491_v5 = vpop.eup %3490 }
 0xebf   :  { %v1519_v44 = vadd.f32 1.0, %v3491_v5 }
 0xec1   :  { %3492 = vrcp.f32 %v1519_v44 }
 0xecb   :  { %v3493_v22 = vpop.eup %3492 }
 0xecc   :  { %v1523_v7 = vmul.f32 %v3493_v22, %v1522_v46  ;;  %v1526_v14 = vsub.f32 1.0, %v3493_v22 }
 0xece   :  { %v1524_v13 = vadd.f32 %v1523_v7, %v1441_v63 }
 0xed0   :  { %3494 = vtanh.f32 %v1524_v13 }
 0xeda   :  { %v3495_v15 = vpop.eup %3494 }
 0xedb   :  { %v1527_v58 = vsub.f32 %v3495_v15, %v1433_v38 }
 0xedd   :  { %1529 = vrot.lane.b32.xlu0 %v1527_v58, %s3525_s4 }
 0xf4f   :  { %v1530_v61 = vpop.permute.xlu0 %1529 }
 0xf50   :  { %v1532_v55 = vmul.f32 %v1530_v61, %v1526_v14 }
 0xf52   :  { %v1533_v30 = vadd.f32 %v1532_v55, %v1430_v47 }
 0xf54   :  { %1535 = vrot.lane.b32.xlu1 %v1533_v30, %s3525_s4 }
 0xfc6   :  { %v1536_v31 = vpop.permute.xlu1 %1535 }
 0xfc7   :  { %1538 = vst.msk [vmem:[#allocation3 + $0x38] sm:$0xff] %vm808_vm1, %v1536_v31 }
 0xfc8   :  { %1539 = vst.msk [vmem:[#allocation3] sm:$0xff] %vm811_vm2, %v1536_v31 }
 0xfc9   :  { %3518 = dma.done.wait [#allocation6], 8192 }
 0xfca   :  { %3519 = vsyncadd [#allocation6], 4294959104  ;;  %v3251_v37 = vpack.c.bf16 %v3627_v9, %v3587_v1  ;;  %v3267_v6 = vpack.c.bf16 %v3637_v11, %v3597_v3  ;;  %v3253_v52 = vpack.c.bf16 %v3622_v8, %v3582_v0  ;;  %v3269_v29 = vpack.c.bf16 %v3632_v10, %v3592_v2 }
 0xfcb   :  { %3520 = dma.done.wait [#allocation6 + $0x1], 16384 }
 0xfcc   :  { %3521 = vsyncadd [#allocation6 + $0x1], 4294950912  ;;  %1749 = vmatprep.mubr.f32.mxu0 %v5537_v36  ;;  %v3255_v23 = vpack.c.bf16 %v3707_v25, %v3667_v17  ;;  %v3271_v53 = vpack.c.bf16 %v3717_v27, %v3677_v19  ;;  %1862 = vmatprep.mubr.f32.mxu1 %v5537_v36  ;;  %v3257_v0 = vpack.c.bf16 %v3702_v24, %v3662_v16  ;;  %v5546_v17 = vld [vmem:[#allocation42_spill] sm:$0xff]  ;;  %v5547_v19 = vld [vmem:[#allocation15_spill] sm:$0xff] }
 0xfcd   :  { %3252 = vmatprep.subr.bf16.mxu0 %v3251_v37  ;;  %3268 = vmatprep.subr.bf16.mxu1 %v3267_v6  ;;  %v3273_v1 = vpack.c.bf16 %v3712_v26, %v3672_v18  ;;  %v3259_v2 = vpack.c.bf16 %v3787_v41, %v3747_v33  ;;  %v3275_v3 = vpack.c.bf16 %v3797_v43, %v3757_v35  ;;  %v5548_v24 = vld [vmem:[#allocation19_spill] sm:$0xff]  ;;  %v5549_v26 = vld [vmem:[#allocation17_spill] sm:$0xff]  ;;  %v5552_v35 = vld [vmem:[#allocation18_spill] sm:$0xff] }
 0xfce   :  { %3254 = vmatpush1.bf16.msra.mxu0 %v3253_v52  ;;  %3270 = vmatpush1.bf16.msra.mxu1 %v3269_v29  ;;  %v3261_v8 = vpack.c.bf16 %v3782_v40, %v3742_v32  ;;  %v3277_v9 = vpack.c.bf16 %v3792_v42, %v3752_v34  ;;  %v3263_v10 = vpack.c.bf16 %v3867_v57, %v3827_v49  ;;  %v5550_v27 = vld [vmem:[#allocation21_spill] sm:$0xff]  ;;  %v5551_v34 = vld [vmem:[#allocation14_spill] sm:$0xff]  ;;  %v5553_v41 = vld [vmem:[#allocation16_spill] sm:$0xff] }
 0xfcf   :  { %3256 = vmatprep.subr.bf16.mxu0 %v3255_v23  ;;  %3272 = vmatprep.subr.bf16.mxu1 %v3271_v53  ;;  %v3279_v11 = vpack.c.bf16 %v3877_v59, %v3837_v51  ;;  %v3265_v16 = vpack.c.bf16 %v3862_v56, %v3822_v48  ;;  %v3281_v18 = vpack.c.bf16 %v5546_v17, %v3832_v50  ;;  %v4936_v33 = vld [vmem:[#allocation3] sm:$0xff]  ;;  %v5554_v42 = vld [vmem:[#allocation20_spill] sm:$0xff]  ;;  %v5555_v48 = vld [vmem:[#allocation23_spill] sm:$0xff] }
 0xfd0   :  { %v3283_v25 = vpack.c.bf16 %v5548_v24, %v5547_v19  ;;  %v3299_v32 = vpack.c.bf16 %v5550_v27, %v5549_v26  ;;  %v3285_v40 = vpack.c.bf16 %v5552_v35, %v5551_v34  ;;  %v3301_v43 = vpack.c.bf16 %v5554_v42, %v5553_v41  ;;  %v5556_v49 = vld [vmem:[#allocation27_spill] sm:$0xff]  ;;  %v5557_v51 = vld [vmem:[#allocation25_spill] sm:$0xff]  ;;  %v5559_v28 = vld [vmem:[#allocation22_spill] sm:$0xff] }
 0xfd1   :  { %v3287_v50 = vpack.c.bf16 %v5556_v49, %v5555_v48  ;;  %v5558_v56 = vld [vmem:[#allocation29_spill] sm:$0xff]  ;;  %v4951_v59 = vld [vmem:[#allocation3 + $0x8] sm:$0xff]  ;;  %v5560_v39 = vld [vmem:[#allocation26_spill] sm:$0xff] }
 0xfd2   :  { %3258 = vmatpush1.bf16.msra.mxu0 %v3257_v0  ;;  %3274 = vmatpush1.bf16.msra.mxu1 %v3273_v1  ;;  %v3303_v57 = vpack.c.bf16 %v5558_v56, %v5557_v51  ;;  %v3289_v62 = vpack.c.bf16 %v5560_v39, %v5559_v28  ;;  %v5561_v20 = vld [vmem:[#allocation24_spill] sm:$0xff]  ;;  %v5563_v47 = vld [vmem:[#allocation31_spill] sm:$0xff]  ;;  %v5565_v60 = vld [vmem:[#allocation33_spill] sm:$0xff] }
 0xfd3   :  { %3260 = vmatprep.subr.bf16.mxu0 %v3259_v2  ;;  %3276 = vmatprep.subr.bf16.mxu1 %v3275_v3  ;;  %v5562_v12 = vld [vmem:[#allocation28_spill] sm:$0xff]  ;;  %v5564_v38 = vld [vmem:[#allocation35_spill] sm:$0xff]  ;;  %v5566_v4 = vld [vmem:[#allocation37_spill] sm:$0xff] }
 0xfd4   :  { %v3305_v21 = vpack.c.bf16 %v5562_v12, %v5561_v20  ;;  %v3291_v45 = vpack.c.bf16 %v5564_v38, %v5563_v47  ;;  %v3307_v54 = vpack.c.bf16 %v5566_v4, %v5565_v60  ;;  %v4968_v5 = vld [vmem:[#allocation3 + $0x10] sm:$0xff]  ;;  %v5567_v44 = vld [vmem:[#allocation30_spill] sm:$0xff]  ;;  %v5571_v15 = vld [vmem:[#allocation39_spill] sm:$0xff] }
 0xfd5   :  { %v5568_v46 = vld [vmem:[#allocation34_spill] sm:$0xff]  ;;  %v5569_v7 = vld [vmem:[#allocation32_spill] sm:$0xff]  ;;  %v5573_v61 = vld [vmem:[#allocation41_spill] sm:$0xff] }
 0xfd6   :  { %3262 = vmatpush1.bf16.msra.mxu0 %v3261_v8  ;;  %3278 = vmatpush1.bf16.msra.mxu1 %v3277_v9  ;;  %v3293_v22 = vpack.c.bf16 %v5568_v46, %v5567_v44  ;;  %v5570_v63 = vld [vmem:[#allocation36_spill] sm:$0xff]  ;;  %v5574_v55 = vld [vmem:[#allocation46_spill] sm:$0xff]  ;;  %v4984_v31 = vld [vmem:[#allocation3 + $0x18] sm:$0xff] }
 0xfd7   :  { %3264 = vmatprep.subr.bf16.mxu0 %v3263_v10  ;;  %3280 = vmatprep.subr.bf16.mxu1 %v3279_v11  ;;  %v3309_v13 = vpack.c.bf16 %v5570_v63, %v5569_v7  ;;  %v5572_v58 = vld [vmem:[#allocation44_spill] sm:$0xff]  ;;  %v3311_v30 = vpack.c.bf16 %v5574_v55, %v5573_v61  ;;  %v5575_v37 = vld [vmem:[#allocation38_spill] sm:$0xff]  ;;  %v5576_v6 = vld [vmem:[#allocation43_spill] sm:$0xff] }
 0xfd8   :  { %v3295_v14 = vpack.c.bf16 %v5572_v58, %v5571_v15  ;;  %v3297_v52 = vpack.c.bf16 %v5576_v6, %v5575_v37  ;;  %v5577_v29 = vld [vmem:[#allocation40_spill] sm:$0xff]  ;;  %v5578_v23 = vld [vmem:[#allocation45_spill] sm:$0xff]  ;;  %v5579_v0 = vld [vmem:[#allocation63_spill] sm:$0xff] }
 0xfd9   :  { %v3313_v53 = vpack.c.bf16 %v5578_v23, %v5577_v29  ;;  %v5580_v1 = vld [vmem:[#allocation64_spill] sm:$0xff]  ;;  %v5581_v3 = vld [vmem:[#allocation95_spill] sm:$0xff]  ;;  %v5000_v10 = vld [vmem:[#allocation3 + $0x20] sm:$0xff] }
 0xfda   :  { %3266 = vmatpush1.bf16.msra.mxu0 %v3265_v16  ;;  %3282 = vmatpush1.bf16.msra.mxu1 %v3281_v18  ;;  %v3315_v2 = vpack.c.bf16 %v5580_v1, %v5579_v0  ;;  %v5582_v8 = vld [vmem:[#allocation96_spill] sm:$0xff]  ;;  %v5008_v11 = vld [vmem:[#allocation3 + $0x28] sm:$0xff]  ;;  %v5024_v17 = vld [vmem:[#allocation3 + $0x38] sm:$0xff] }
 0xfdb   :  { %3284 = vmatprep.subr.bf16.mxu0 %v3283_v25  ;;  %3300 = vmatprep.subr.bf16.mxu1 %v3299_v32  ;;  %v3347_v9 = vpack.c.bf16 %v5582_v8, %v5581_v3  ;;  %v5016_v16 = vld [vmem:[#allocation3 + $0x30] sm:$0xff]  ;;  %v5583_v18 = vld [vmem:[#allocation47_spill] sm:$0xff]  ;;  %v5587_v32 = vld [vmem:[#allocation65_spill] sm:$0xff] }
 0xfdc   :  { %v5584_v19 = vld [vmem:[#allocation48_spill] sm:$0xff]  ;;  %v5585_v25 = vld [vmem:[#allocation79_spill] sm:$0xff]  ;;  %v5588_v34 = vld [vmem:[#allocation66_spill] sm:$0xff] }
 0xfdd   :  { %2848 = vmatmul.mubr.msk.f32.vlgmr.msra.gmra.mrb[22].mxu0 %vm530_vm0, %v4936_v33  ;;  %2856 = vmatmul.mubr.msk.f32.vlgmr.msra.gmra.mrb[10].mxu1 %vm530_vm0, %v4936_v33  ;;  %v3317_v24 = vpack.c.bf16 %v5584_v19, %v5583_v18  ;;  %v5586_v26 = vld [vmem:[#allocation80_spill] sm:$0xff]  ;;  %v3319_v35 = vpack.c.bf16 %v5588_v34, %v5587_v32  ;;  %v5590_v41 = vld [vmem:[#allocation98_spill] sm:$0xff]  ;;  %v5599_v12 = vld [vmem:[#allocation51_spill] sm:$0xff] }
 0xfde   :  { %3286 = vmatpush1.bf16.msra.mxu0 %v3285_v40  ;;  %1755 = vmatprep.mubr.f32.mxu0 %v5537_v36  ;;  %v3349_v27 = vpack.c.bf16 %v5586_v26, %v5585_v25  ;;  %v5589_v40 = vld [vmem:[#allocation97_spill] sm:$0xff]  ;;  %v5592_v48 = vld [vmem:[#allocation50_spill] sm:$0xff]  ;;  %v5596_v28 = vld [vmem:[#allocation68_spill] sm:$0xff] }
 0xfdf   :  { %1868 = vmatprep.mubr.f32.mxu1 %v5537_v36  ;;  %3302 = vmatpush1.bf16.msra.mxu1 %v3301_v43  ;;  %v3351_v42 = vpack.c.bf16 %v5590_v41, %v5589_v40  ;;  %v5591_v43 = vld [vmem:[#allocation49_spill] sm:$0xff]  ;;  %v5594_v51 = vld [vmem:[#allocation82_spill] sm:$0xff]  ;;  %v5598_v20 = vld [vmem:[#allocation100_spill] sm:$0xff] }
 0xfe0   :  { %3288 = vmatprep.subr.bf16.mxu0 %v3287_v50  ;;  %3304 = vmatprep.subr.bf16.mxu1 %v3303_v57  ;;  %v3321_v49 = vpack.c.bf16 %v5592_v48, %v5591_v43  ;;  %v5593_v50 = vld [vmem:[#allocation81_spill] sm:$0xff]  ;;  %v5595_v57 = vld [vmem:[#allocation67_spill] sm:$0xff]  ;;  %v5608_v63 = vld [vmem:[#allocation54_spill] sm:$0xff] }
 0xfe1   :  { %2849 = vmatmul.mubr.msk.f32.gmra.mrb[24].mxu0 %vm530_vm0, %v4951_v59  ;;  %2857 = vmatmul.mubr.msk.f32.gmra.mrb[12].mxu1 %vm530_vm0, %v4951_v59  ;;  %v3353_v56 = vpack.c.bf16 %v5594_v51, %v5593_v50  ;;  %v3323_v39 = vpack.c.bf16 %v5596_v28, %v5595_v57  ;;  %v5601_v38 = vld [vmem:[#allocation83_spill] sm:$0xff]  ;;  %v5603_v4 = vld [vmem:[#allocation69_spill] sm:$0xff]  ;;  %v5610_v58 = vld [vmem:[#allocation86_spill] sm:$0xff] }
 0xfe2   :  { %1761 = vmatprep.mubr.f32.mxu0 %v5537_v36  ;;  %1874 = vmatprep.mubr.f32.mxu1 %v5537_v36  ;;  %v5605_v46 = vld [vmem:[#allocation101_spill] sm:$0xff]  ;;  %v5611_v61 = vld [vmem:[#allocation71_spill] sm:$0xff]  ;;  %v5612_v55 = vld [vmem:[#allocation72_spill] sm:$0xff] }
 0xfe3   :  { %3290 = vmatpush1.bf16.msra.mxu0 %v3289_v62  ;;  %3306 = vmatpush1.bf16.msra.mxu1 %v3305_v21  ;;  %v5597_v62 = vld [vmem:[#allocation99_spill] sm:$0xff]  ;;  %v5600_v21 = vld [vmem:[#allocation52_spill] sm:$0xff]  ;;  %v5607_v7 = vld [vmem:[#allocation53_spill] sm:$0xff] }
 0xfe4   :  { %3292 = vmatprep.subr.bf16.mxu0 %v3291_v45  ;;  %3308 = vmatprep.subr.bf16.mxu1 %v3307_v54  ;;  %v3325_v47 = vpack.c.bf16 %v5600_v21, %v5599_v12  ;;  %v5602_v45 = vld [vmem:[#allocation84_spill] sm:$0xff]  ;;  %v5604_v54 = vld [vmem:[#allocation70_spill] sm:$0xff]  ;;  %v5609_v15 = vld [vmem:[#allocation85_spill] sm:$0xff] }
 0xfe5   :  { %2850 = vmatmul.mubr.msk.f32.gmra.mrb[26].mxu0 %vm530_vm0, %v4968_v5  ;;  %2858 = vmatmul.mubr.msk.f32.gmra.mrb[14].mxu1 %vm530_vm0, %v4968_v5  ;;  %v3357_v60 = vpack.c.bf16 %v5602_v45, %v5601_v38  ;;  %v3327_v44 = vpack.c.bf16 %v5604_v54, %v5603_v4  ;;  %v5613_v37 = vld [vmem:[#allocation103_spill] sm:$0xff]  ;;  %v5614_v6 = vld [vmem:[#allocation104_spill] sm:$0xff]  ;;  %v5620_v3 = vld [vmem:[#allocation74_spill] sm:$0xff] }
 0xfe6   :  { %1767 = vmatprep.mubr.f32.mxu0 %v5537_v36  ;;  %1880 = vmatprep.mubr.f32.mxu1 %v5537_v36  ;;  %v5616_v29 = vld [vmem:[#allocation56_spill] sm:$0xff]  ;;  %v5622_v18 = vld [vmem:[#allocation106_spill] sm:$0xff]  ;;  %v5623_v19 = vld [vmem:[#allocation57_spill] sm:$0xff] }
 0xfe7   :  { %3294 = vmatpush1.bf16.msra.mxu0 %v3293_v22  ;;  %3310 = vmatpush1.bf16.msra.mxu1 %v3309_v13  ;;  %v5606_v22 = vld [vmem:[#allocation102_spill] sm:$0xff]  ;;  %v3329_v13 = vpack.c.bf16 %v5608_v63, %v5607_v7  ;;  %v5618_v0 = vld [vmem:[#allocation88_spill] sm:$0xff]  ;;  %v5625_v26 = vld [vmem:[#allocation89_spill] sm:$0xff] }
 0xfe8   :  { %3296 = vmatprep.subr.bf16.mxu0 %v3295_v14  ;;  %3312 = vmatprep.subr.bf16.mxu1 %v3311_v30  ;;  %v3361_v14 = vpack.c.bf16 %v5610_v58, %v5609_v15  ;;  %v3331_v30 = vpack.c.bf16 %v5612_v55, %v5611_v61  ;;  %v5627_v34 = vld [vmem:[#allocation75_spill] sm:$0xff]  ;;  %v5632_v43 = vld [vmem:[#allocation60_spill] sm:$0xff]  ;;  %v5637_v28 = vld [vmem:[#allocation109_spill] sm:$0xff] }
 0xfe9   :  { %2851 = vmatmul.mubr.msk.f32.gmra.mrb[28].mxu0 %vm530_vm0, %v4984_v31  ;;  %2859 = vmatmul.mubr.msk.f32.gmra.mrb[16].mxu1 %vm530_vm0, %v4984_v31  ;;  %v5629_v41 = vld [vmem:[#allocation107_spill] sm:$0xff]  ;;  %v5634_v50 = vld [vmem:[#allocation92_spill] sm:$0xff]  ;;  %v5641_v12 = vld [vmem:[#allocation93_spill] sm:$0xff] }
 0xfea   :  { %1773 = vmatprep.mubr.f32.mxu0 %v5537_v36  ;;  %1886 = vmatprep.mubr.f32.mxu1 %v5537_v36  ;;  %v5642_v21 = vld [vmem:[#allocation94_spill] sm:$0xff]  ;;  %v5644_v38 = vld [vmem:[#allocation128_spill] sm:$0xff] }
 0xfeb   :  { %3298 = vmatpush1.bf16.msra.mxu0 %v3297_v52  ;;  %3314 = vmatpush1.bf16.msra.mxu1 %v3313_v53  ;;  %v5615_v52 = vld [vmem:[#allocation55_spill] sm:$0xff]  ;;  %v5646_v4 = vld [vmem:[#allocation160_spill] sm:$0xff] }
 0xfec   :  { %3316 = vmatprep.subr.bf16.mxu0 %v3315_v2  ;;  %3348 = vmatprep.subr.bf16.mxu1 %v3347_v9  ;;  %v3333_v23 = vpack.c.bf16 %v5616_v29, %v5615_v52  ;;  %v5617_v53 = vld [vmem:[#allocation87_spill] sm:$0xff]  ;;  %v5619_v2 = vld [vmem:[#allocation73_spill] sm:$0xff] }
 0xfed   :  { %2852 = vmatmul.mubr.msk.f32.gmra.mrb[30].mxu0 %vm530_vm0, %v5000_v10  ;;  %2860 = vmatmul.mubr.msk.f32.gmra.mrb[18].mxu1 %vm530_vm0, %v5000_v10  ;;  %v3365_v1 = vpack.c.bf16 %v5618_v0, %v5617_v53  ;;  %v3335_v8 = vpack.c.bf16 %v5620_v3, %v5619_v2  ;;  %v5621_v9 = vld [vmem:[#allocation105_spill] sm:$0xff]  ;;  %v5650_v53 = vld [vmem:[#allocation111_spill] sm:$0xff]  ;;  %v5651_v0 = vld [vmem:[#allocation112_spill] sm:$0xff] }
 0xfee   :  { %1779 = vmatprep.mubr.f32.mxu0 %v5537_v36  ;;  %1892 = vmatprep.mubr.f32.mxu1 %v5537_v36 }
 0xff1   :  { %2853 = vmatmul.mubr.msk.f32.gmra.mrb[32].mxu0 %vm530_vm0, %v5008_v11  ;;  %2861 = vmatmul.mubr.msk.f32.gmra.mrb[20].mxu1 %vm530_vm0, %v5008_v11 }
 0xff2   :  { %1785 = vmatprep.mubr.f32.mxu0 %v5537_v36  ;;  %1898 = vmatprep.mubr.f32.mxu1 %v5537_v36 }
 0xff5   :  { %2854 = vmatmul.mubr.msk.f32.gmra.mrb[34].mxu0 %vm530_vm0, %v5016_v16  ;;  %2862 = vmatmul.mubr.msk.f32.gmra.mrb[22].mxu1 %vm530_vm0, %v5016_v16 }
 0xff6   :  { %1791 = vmatprep.mubr.f32.mxu0 %v5537_v36  ;;  %1904 = vmatprep.mubr.f32.mxu1 %v5537_v36 }
 0xff9   :  { %2855 = vmatmul.mubr.msk.f32.gmra.mrb[36].mxu0 %vm530_vm0, %v5024_v17  ;;  %2863 = vmatmul.mubr.msk.f32.gmra.mrb[24].mxu1 %vm530_vm0, %v5024_v17 }
 0xffa   :  { %1975 = vmatprep.mubr.f32.mxu0 %v5537_v36  ;;  %2088 = vmatprep.mubr.f32.mxu1 %v5537_v36 }
 0xffd   :  { %2864 = vmatmul.mubr.msk.f32.vlgmr.msra.gmra.mrb[38].mxu0 %vm530_vm0, %v4936_v33  ;;  %2872 = vmatmul.mubr.msk.f32.vlgmr.msra.gmra.mrb[26].mxu1 %vm530_vm0, %v4936_v33  ;;  %v3355_v33 = vpack.c.bf16 %v5598_v20, %v5597_v62  ;;  %v5639_v62 = vld [vmem:[#allocation61_spill] sm:$0xff]  ;;  %v5640_v20 = vld [vmem:[#allocation62_spill] sm:$0xff] }
 0xffe   :  { %1981 = vmatprep.mubr.f32.mxu0 %v5537_v36  ;;  %2094 = vmatprep.mubr.f32.mxu1 %v5537_v36 }
 0xfff   :  { %3318 = vmatpush3.bf16.msra.mxu0 %v3317_v24  ;;  %3350 = vmatpush3.bf16.msra.mxu1 %v3349_v27  ;;  %v5624_v24 = vld [vmem:[#allocation58_spill] sm:$0xff] }
0x1000   :  { %3320 = vmatprep.subr.bf16.mxu0 %v3319_v35  ;;  %3352 = vmatprep.subr.bf16.mxu1 %v3351_v42  ;;  %v3337_v25 = vpack.c.bf16 %v5624_v24, %v5623_v19  ;;  %v5626_v27 = vld [vmem:[#allocation90_spill] sm:$0xff]  ;;  %v5628_v35 = vld [vmem:[#allocation76_spill] sm:$0xff]  ;;  %v5654_v24 = vld [vmem:[#allocation129_spill] sm:$0xff] }
0x1001   :  { %2865 = vmatmul.mubr.msk.f32.gmra.mrb[40].mxu0 %vm530_vm0, %v4951_v59  ;;  %2873 = vmatmul.mubr.msk.f32.gmra.mrb[28].mxu1 %vm530_vm0, %v4951_v59  ;;  %v3359_v59 = vpack.c.bf16 %v5606_v22, %v5605_v46  ;;  %v3369_v32 = vpack.c.bf16 %v5626_v27, %v5625_v26  ;;  %v3339_v40 = vpack.c.bf16 %v5628_v35, %v5627_v34  ;;  %v5630_v42 = vld [vmem:[#allocation108_spill] sm:$0xff]  ;;  %v5146_v22 = vld [vmem:[%s5356_s5] sm:$0xff] }
0x1002   :  { %1987 = vmatprep.mubr.f32.mxu0 %v5537_v36  ;;  %2100 = vmatprep.mubr.f32.mxu1 %v5537_v36 }
0x1003   :  { %3322 = vmatpush3.bf16.msra.mxu0 %v3321_v49  ;;  %3354 = vmatpush3.bf16.msra.mxu1 %v3353_v56  ;;  %v5633_v49 = vld [vmem:[#allocation91_spill] sm:$0xff]  ;;  %v5635_v56 = vld [vmem:[#allocation77_spill] sm:$0xff] }
0x1004   :  { %3324 = vmatprep.subr.bf16.mxu0 %v3323_v39  ;;  %3356 = vmatprep.subr.bf16.mxu1 %v3355_v33  ;;  %v3373_v51 = vpack.c.bf16 %v5634_v50, %v5633_v49  ;;  %v5638_v39 = vld [vmem:[#allocation110_spill] sm:$0xff]  ;;  %v3345_v33 = vpack.c.bf16 %v5640_v20, %v5639_v62  ;;  %v5658_v49 = vld [vmem:[#allocation113_spill] sm:$0xff]  ;;  %v5662_v20 = vld [vmem:[#allocation131_spill] sm:$0xff] }
0x1005   :  { %2866 = vmatmul.mubr.msk.f32.gmra.mrb[42].mxu0 %vm530_vm0, %v4968_v5  ;;  %2874 = vmatmul.mubr.msk.f32.gmra.mrb[30].mxu1 %vm530_vm0, %v4968_v5  ;;  %v3363_v5 = vpack.c.bf16 %v5614_v6, %v5613_v37  ;;  %v5659_v50 = vld [vmem:[#allocation114_spill] sm:$0xff] }
0x1006   :  { %1993 = vmatprep.mubr.f32.mxu0 %v5537_v36  ;;  %2106 = vmatprep.mubr.f32.mxu1 %v5537_v36 }
0x1007   :  { %3326 = vmatpush3.bf16.msra.mxu0 %v3325_v47  ;;  %3358 = vmatpush3.bf16.msra.mxu1 %v3357_v60  ;;  %v5643_v47 = vld [vmem:[#allocation127_spill] sm:$0xff] }
0x1008   :  { %3328 = vmatprep.subr.bf16.mxu0 %v3327_v44  ;;  %3360 = vmatprep.subr.bf16.mxu1 %v3359_v59  ;;  %v3379_v45 = vpack.c.bf16 %v5644_v38, %v5643_v47  ;;  %v5645_v60 = vld [vmem:[#allocation159_spill] sm:$0xff]  ;;  %v5647_v44 = vld [vmem:[#allocation176_spill] sm:$0xff] }
0x1009   :  { %2867 = vmatmul.mubr.msk.f32.gmra.mrb[44].mxu0 %vm530_vm0, %v4984_v31  ;;  %2875 = vmatmul.mubr.msk.f32.gmra.mrb[32].mxu1 %vm530_vm0, %v4984_v31  ;;  %v3367_v31 = vpack.c.bf16 %v5622_v18, %v5621_v9  ;;  %v3411_v54 = vpack.c.bf16 %v5646_v4, %v5645_v60  ;;  %v1631_v46 = vsub.s32 2, %v5647_v44  ;;  %v1635_v59 = vsub.s32 3, %v5647_v44  ;;  %v5652_v18 = vld [vmem:[#allocation143_spill] sm:$0xff]  ;;  %v5665_v4 = vld [vmem:[#allocation164_spill] sm:$0xff] }
0x100a   :  { %1999 = vmatprep.mubr.f32.mxu0 %v5537_v36  ;;  %2112 = vmatprep.mubr.f32.mxu1 %v5537_v36  ;;  %v5648_v7 = vsub.s32 0, %v5647_v44  ;;  %v5649_v15 = vsub.s32 1, %v5647_v44  ;;  %v5664_v60 = vld [vmem:[#allocation163_spill] sm:$0xff] }
0x100b   :  { %3330 = vmatpush3.bf16.msra.mxu0 %v3329_v13  ;;  %3362 = vmatpush3.bf16.msra.mxu1 %v3361_v14  ;;  %v5155_v13 = vrot.slane %v5146_v22, %v1631_v46  ;;  %v5163_v14 = vrot.slane %v5146_v22, %v1635_v59 }
0x100c   :  { %3332 = vmatprep.subr.bf16.mxu0 %v3331_v30  ;;  %3364 = vmatprep.subr.bf16.mxu1 %v3363_v5  ;;  %v5152_v63 = vrot.slane %v5146_v22, %v5648_v7  ;;  %v5160_v58 = vrot.slane %v5146_v22, %v5649_v15  ;;  %v5666_v15 = vld [vmem:[#allocation115_spill] sm:$0xff] }
0x100d   :  { %2868 = vmatmul.mubr.msk.f32.gmra.mrb[46].mxu0 %vm530_vm0, %v5000_v10  ;;  %2876 = vmatmul.mubr.msk.f32.gmra.mrb[34].mxu1 %vm530_vm0, %v5000_v10  ;;  %v3371_v10 = vpack.c.bf16 %v5630_v42, %v5629_v41  ;;  %v5656_v41 = vld [vmem:[#allocation161_spill] sm:$0xff]  ;;  %v5657_v42 = vld [vmem:[#allocation162_spill] sm:$0xff] }
0x100e   :  { %2005 = vmatprep.mubr.f32.mxu0 %v5537_v36  ;;  %2118 = vmatprep.mubr.f32.mxu1 %v5537_v36 }
0x100f   :  { %3334 = vmatpush3.bf16.msra.mxu0 %v3333_v23  ;;  %3366 = vmatpush3.bf16.msra.mxu1 %v3365_v1  ;;  %v3381_v1 = vpack.c.bf16 %v5651_v0, %v5650_v53  ;;  %v5670_v53 = vld [vmem:[#allocation133_spill] sm:$0xff]  ;;  %v5671_v0 = vld [vmem:[#allocation134_spill] sm:$0xff] }
0x1010   :  { %3336 = vmatprep.subr.bf16.mxu0 %v3335_v8  ;;  %3368 = vmatprep.subr.bf16.mxu1 %v3367_v31  ;;  %v5653_v31 = vld [vmem:[#allocation144_spill] sm:$0xff] }
0x1011   :  { %2869 = vmatmul.mubr.msk.f32.gmra.mrb[48].mxu0 %vm530_vm0, %v5008_v11  ;;  %2877 = vmatmul.mubr.msk.f32.gmra.mrb[36].mxu1 %vm530_vm0, %v5008_v11  ;;  %v5631_v11 = vld [vmem:[#allocation59_spill] sm:$0xff]  ;;  %v3413_v19 = vpack.c.bf16 %v5653_v31, %v5652_v18  ;;  %v5672_v31 = vld [vmem:[#allocation165_spill] sm:$0xff] }
0x1012   :  { %2011 = vmatprep.mubr.f32.mxu0 %v5537_v36  ;;  %2124 = vmatprep.mubr.f32.mxu1 %v5537_v36  ;;  %v3341_v48 = vpack.c.bf16 %v5632_v43, %v5631_v11 }
0x1013   :  { %3338 = vmatpush3.bf16.msra.mxu0 %v3337_v25  ;;  %3370 = vmatpush3.bf16.msra.mxu1 %v3369_v32  ;;  %v5655_v25 = vld [vmem:[#allocation130_spill] sm:$0xff] }
0x1014   :  { %3340 = vmatprep.subr.bf16.mxu0 %v3339_v40  ;;  %3372 = vmatprep.subr.bf16.mxu1 %v3371_v10  ;;  %v3383_v26 = vpack.c.bf16 %v5655_v25, %v5654_v24  ;;  %v3415_v10 = vpack.c.bf16 %v5657_v42, %v5656_v41 }
0x1015   :  { %2870 = vmatmul.mubr.msk.f32.gmra.mrb[50].mxu0 %vm530_vm0, %v5016_v16  ;;  %2878 = vmatmul.mubr.msk.f32.gmra.mrb[38].mxu1 %vm530_vm0, %v5016_v16  ;;  %v5636_v16 = vld [vmem:[#allocation78_spill] sm:$0xff] }
0x1016   :  { %2017 = vmatprep.mubr.f32.mxu0 %v5537_v36  ;;  %2130 = vmatprep.mubr.f32.mxu1 %v5537_v36  ;;  %v3343_v57 = vpack.c.bf16 %v5636_v16, %v5635_v56  ;;  %v3375_v36 = vpack.c.bf16 %v5638_v39, %v5637_v28  ;;  %v5660_v39 = vld [vmem:[#allocation145_spill] sm:$0xff] }
0x1017   :  { %3342 = vmatpush3.bf16.msra.mxu0 %v3341_v48  ;;  %3374 = vmatpush3.bf16.msra.mxu1 %v3373_v51  ;;  %v3385_v51 = vpack.c.bf16 %v5659_v50, %v5658_v49  ;;  %v5678_v49 = vld [vmem:[#allocation135_spill] sm:$0xff]  ;;  %v5679_v50 = vld [vmem:[#allocation136_spill] sm:$0xff] }
0x1018   :  { %3344 = vmatprep.subr.bf16.mxu0 %v3343_v57  ;;  %3376 = vmatprep.subr.bf16.mxu1 %v3375_v36  ;;  %v5661_v36 = vld [vmem:[#allocation146_spill] sm:$0xff] }
0x1019   :  { %2871 = vmatmul.mubr.msk.f32.gmra.mrb[52].mxu0 %vm530_vm0, %v5024_v17  ;;  %2879 = vmatmul.mubr.msk.f32.gmra.mrb[40].mxu1 %vm530_vm0, %v5024_v17  ;;  %v3377_v17 = vpack.c.bf16 %v5642_v21, %v5641_v12  ;;  %v3417_v62 = vpack.c.bf16 %v5661_v36, %v5660_v39  ;;  %v5680_v36 = vld [vmem:[#allocation167_spill] sm:$0xff] }
0x101b   :  { %3346 = vmatpush3.bf16.msra.mxu0 %v3345_v33  ;;  %3378 = vmatpush3.bf16.msra.mxu1 %v3377_v17  ;;  %v5663_v33 = vld [vmem:[#allocation132_spill] sm:$0xff] }
0x101c   :  { %3380 = vmatprep.subr.bf16.mxu0 %v3379_v45  ;;  %3412 = vmatprep.subr.bf16.mxu1 %v3411_v54  ;;  %v3387_v12 = vpack.c.bf16 %v5663_v33, %v5662_v20  ;;  %v3419_v54 = vpack.c.bf16 %v5665_v4, %v5664_v60 }
0x10b0   :  { %v1751_v61 = vpop.f32.mrb[22].mxu0  ;;  %v1864_v55 = vpop.f32.mrb[10].mxu1 }
0x10b1   :  { %v1752_v30 = vadd.f32 %v1751_v61, %v5152_v63  ;;  %v1865_v37 = vadd.f32 %v1864_v55, %v5155_v13  ;;  %v1753_v6 = vpop.f32.mrb[23].mxu0  ;;  %v1866_v5 = vpop.f32.mrb[11].mxu1  ;;  %v5667_v61 = vld [vmem:[#allocation116_spill] sm:$0xff] }
0x10b2   :  { %v1754_v52 = vadd.f32 %v1753_v6, %v5160_v58  ;;  %v1867_v29 = vadd.f32 %v1866_v5, %v5163_v14  ;;  %v3389_v55 = vpack.c.bf16 %v5667_v61, %v5666_v15  ;;  %v5686_v15 = vld [vmem:[#allocation137_spill] sm:$0xff]  ;;  %v5687_v61 = vld [vmem:[#allocation138_spill] sm:$0xff] }
0x10b3   :  { %v2139_v23 = vmax.f32 %v1865_v37, 0.0  ;;  %v2137_v27 = vmax.f32 %v1752_v30, 0.0 }
0x10b4   :  { %v2138_v2 = vmax.f32 %v1754_v52, 0.0  ;;  %v2140_v3 = vmax.f32 %v1867_v29, 0.0  ;;  %v1757_v8 = vpop.f32.mrb[24].mxu0  ;;  %v1870_v9 = vpop.f32.mrb[12].mxu1  ;;  %v5668_v52 = vld [vmem:[#allocation147_spill] sm:$0xff]  ;;  %v5669_v29 = vld [vmem:[#allocation148_spill] sm:$0xff] }
0x10b5   :  { %v1758_v32 = vadd.f32 %v1757_v8, %v5152_v63  ;;  %v1871_v34 = vadd.f32 %v1870_v9, %v5155_v13  ;;  %v1759_v35 = vpop.f32.mrb[25].mxu0  ;;  %v1872_v40 = vpop.f32.mrb[13].mxu1 }
0x10b6   :  { %v1760_v11 = vadd.f32 %v1759_v35, %v5160_v58  ;;  %v1873_v43 = vadd.f32 %v1872_v40, %v5163_v14  ;;  %2400 = vmatprep.mubr.f32.mxu0 %v2138_v2  ;;  %2505 = vmatprep.mubr.f32.mxu1 %v2140_v3 }
0x10b7   :  { %v2147_v48 = vmax.f32 %v1871_v34, 0.0  ;;  %2401 = vmatmul.mubr.f32.vlgmr.msra.gmra.mrb[54].mxu0 %v2137_v27  ;;  %2506 = vmatmul.mubr.f32.vlgmr.msra.gmra.mrb[42].mxu1 %v2139_v23  ;;  %v2145_v21 = vmax.f32 %v1758_v32, 0.0  ;;  %v3421_v23 = vpack.c.bf16 %v5669_v29, %v5668_v52  ;;  %v5674_v32 = vld [vmem:[#allocation117_spill] sm:$0xff]  ;;  %v5675_v34 = vld [vmem:[#allocation118_spill] sm:$0xff] }
0x10b8   :  { %v2146_v56 = vmax.f32 %v1760_v11, 0.0  ;;  %v2148_v16 = vmax.f32 %v1873_v43, 0.0  ;;  %v1763_v57 = vpop.f32.mrb[26].mxu0  ;;  %v1876_v28 = vpop.f32.mrb[14].mxu1  ;;  %3382 = vmatpush3.bf16.msra.mxu0 %v3381_v1  ;;  %3414 = vmatpush3.bf16.msra.mxu1 %v3413_v19  ;;  %v3391_v1 = vpack.c.bf16 %v5671_v0, %v5670_v53  ;;  %v5673_v19 = vld [vmem:[#allocation166_spill] sm:$0xff]  ;;  %v3393_v35 = vpack.c.bf16 %v5675_v34, %v5674_v32  ;;  %v5676_v11 = vld [vmem:[#allocation149_spill] sm:$0xff] }
0x10b9   :  { %v1764_v17 = vadd.f32 %v1763_v57, %v5152_v63  ;;  %v1877_v47 = vadd.f32 %v1876_v28, %v5155_v13  ;;  %v1765_v38 = vpop.f32.mrb[27].mxu0  ;;  %v1878_v45 = vpop.f32.mrb[15].mxu1  ;;  %3384 = vmatprep.subr.bf16.mxu0 %v3383_v26  ;;  %3416 = vmatprep.subr.bf16.mxu1 %v3415_v10  ;;  %v3423_v24 = vpack.c.bf16 %v5673_v19, %v5672_v31  ;;  %v5677_v43 = vld [vmem:[#allocation150_spill] sm:$0xff]  ;;  %v5688_v29 = vld [vmem:[#allocation169_spill] sm:$0xff] }
0x10ba   :  { %v1766_v46 = vadd.f32 %v1765_v38, %v5160_v58  ;;  %v1879_v59 = vadd.f32 %v1878_v45, %v5163_v14  ;;  %2405 = vmatprep.mubr.f32.mxu0 %v2146_v56  ;;  %2510 = vmatprep.mubr.f32.mxu1 %v2148_v16  ;;  %v5693_v31 = vld [vmem:[#allocation154_spill] sm:$0xff] }
0x10bb   :  { %v2155_v7 = vmax.f32 %v1877_v47, 0.0  ;;  %2406 = vmatmul.mubr.f32.gmra.mrb[56].mxu0 %v2145_v21  ;;  %2511 = vmatmul.mubr.f32.gmra.mrb[44].mxu1 %v2147_v48  ;;  %v2153_v2 = vmax.f32 %v1764_v17, 0.0  ;;  %v3425_v48 = vpack.c.bf16 %v5677_v43, %v5676_v11  ;;  %v5682_v17 = vld [vmem:[#allocation119_spill] sm:$0xff]  ;;  %v5683_v47 = vld [vmem:[#allocation120_spill] sm:$0xff] }
0x10bc   :  { %v2154_v30 = vmax.f32 %v1766_v46, 0.0  ;;  %v2156_v37 = vmax.f32 %v1879_v59, 0.0  ;;  %v1769_v6 = vpop.f32.mrb[28].mxu0  ;;  %v1882_v5 = vpop.f32.mrb[16].mxu1  ;;  %3386 = vmatpush3.bf16.msra.mxu0 %v3385_v51  ;;  %3418 = vmatpush3.bf16.msra.mxu1 %v3417_v62  ;;  %v3395_v51 = vpack.c.bf16 %v5679_v50, %v5678_v49  ;;  %v5681_v62 = vld [vmem:[#allocation168_spill] sm:$0xff]  ;;  %v3397_v38 = vpack.c.bf16 %v5683_v47, %v5682_v17  ;;  %v5684_v46 = vld [vmem:[#allocation151_spill] sm:$0xff] }
0x10bd   :  { %v1770_v3 = vadd.f32 %v1769_v6, %v5152_v63  ;;  %v1883_v8 = vadd.f32 %v1882_v5, %v5155_v13  ;;  %v1771_v9 = vpop.f32.mrb[29].mxu0  ;;  %v1884_v18 = vpop.f32.mrb[17].mxu1  ;;  %3388 = vmatprep.subr.bf16.mxu0 %v3387_v12  ;;  %3420 = vmatprep.subr.bf16.mxu1 %v3419_v54  ;;  %v3427_v20 = vpack.c.bf16 %v5681_v62, %v5680_v36  ;;  %v5685_v59 = vld [vmem:[#allocation152_spill] sm:$0xff]  ;;  %v5696_v50 = vld [vmem:[#allocation171_spill] sm:$0xff]  ;;  %v1651_v62 = vsub.s32 7, %v5647_v44 }
0x10be   :  { %v1772_v25 = vadd.f32 %v1771_v9, %v5160_v58  ;;  %v1885_v26 = vadd.f32 %v1884_v18, %v5163_v14  ;;  %2410 = vmatprep.mubr.f32.mxu0 %v2154_v30  ;;  %2515 = vmatprep.mubr.f32.mxu1 %v2156_v37  ;;  %v5692_v18 = vld [vmem:[#allocation153_spill] sm:$0xff] }
0x10bf   :  { %v2163_v27 = vmax.f32 %v1883_v8, 0.0  ;;  %2411 = vmatmul.mubr.f32.gmra.mrb[58].mxu0 %v2153_v2  ;;  %2516 = vmatmul.mubr.f32.gmra.mrb[46].mxu1 %v2155_v7  ;;  %v2161_v56 = vmax.f32 %v1770_v3, 0.0  ;;  %v3429_v7 = vpack.c.bf16 %v5685_v59, %v5684_v46  ;;  %v5690_v2 = vld [vmem:[#allocation121_spill] sm:$0xff]  ;;  %v5691_v3 = vld [vmem:[#allocation122_spill] sm:$0xff]  ;;  %v3433_v19 = vpack.c.bf16 %v5693_v31, %v5692_v18 }
0x10c0   :  { %v2162_v40 = vmax.f32 %v1772_v25, 0.0  ;;  %v2164_v41 = vmax.f32 %v1885_v26, 0.0  ;;  %v1775_v42 = vpop.f32.mrb[30].mxu0  ;;  %v1888_v10 = vpop.f32.mrb[18].mxu1  ;;  %3390 = vmatpush3.bf16.msra.mxu0 %v3389_v55  ;;  %3422 = vmatpush3.bf16.msra.mxu1 %v3421_v23  ;;  %v3399_v55 = vpack.c.bf16 %v5687_v61, %v5686_v15  ;;  %v5689_v23 = vld [vmem:[#allocation170_spill] sm:$0xff]  ;;  %v3401_v8 = vpack.c.bf16 %v5691_v3, %v5690_v2  ;;  %v5706_v2 = vld [vmem:[#allocation125_spill] sm:$0xff] }
0x10c1   :  { %v1776_v16 = vadd.f32 %v1775_v42, %v5152_v63  ;;  %v1889_v57 = vadd.f32 %v1888_v10, %v5155_v13  ;;  %v1777_v28 = vpop.f32.mrb[31].mxu0  ;;  %v1890_v39 = vpop.f32.mrb[19].mxu1  ;;  %3392 = vmatprep.subr.bf16.mxu0 %v3391_v1  ;;  %3424 = vmatprep.subr.bf16.mxu1 %v3423_v24  ;;  %v3431_v53 = vpack.c.bf16 %v5689_v23, %v5688_v29  ;;  %v1639_v24 = vsub.s32 4, %v5647_v44  ;;  %v5703_v46 = vld [vmem:[#allocation142_spill] sm:$0xff] }
0x10c2   :  { %v1778_v33 = vadd.f32 %v1777_v28, %v5160_v58  ;;  %v1891_v12 = vadd.f32 %v1890_v39, %v5163_v14  ;;  %2415 = vmatprep.mubr.f32.mxu0 %v2162_v40  ;;  %2520 = vmatprep.mubr.f32.mxu1 %v2164_v41  ;;  %v1643_v25 = vsub.s32 5, %v5647_v44  ;;  %v5695_v40 = vld [vmem:[#allocation140_spill] sm:$0xff]  ;;  %v1647_v42 = vsub.s32 6, %v5647_v44  ;;  %v5698_v28 = vld [vmem:[#allocation123_spill] sm:$0xff]  ;;  %v5707_v3 = vld [vmem:[#allocation126_spill] sm:$0xff] }
0x10c3   :  { %v2171_v21 = vmax.f32 %v1889_v57, 0.0  ;;  %2416 = vmatmul.mubr.f32.gmra.mrb[60].mxu0 %v2161_v56  ;;  %2521 = vmatmul.mubr.f32.gmra.mrb[48].mxu1 %v2163_v27  ;;  %v2169_v30 = vmax.f32 %v1776_v16, 0.0  ;;  %v5699_v39 = vld [vmem:[#allocation124_spill] sm:$0xff]  ;;  %v5267_v23 = vrot.slane %v5146_v22, %v1651_v62 }
0x10c4   :  { %v2170_v45 = vmax.f32 %v1778_v33, 0.0  ;;  %v2172_v60 = vmax.f32 %v1891_v12, 0.0  ;;  %v1781_v4 = vpop.f32.mrb[32].mxu0  ;;  %v1894_v54 = vpop.f32.mrb[20].mxu1  ;;  %3394 = vmatpush3.bf16.msra.mxu0 %v3393_v35  ;;  %3426 = vmatpush3.bf16.msra.mxu1 %v3425_v48  ;;  %v5694_v35 = vld [vmem:[#allocation139_spill] sm:$0xff]  ;;  %v3405_v36 = vpack.c.bf16 %v5699_v39, %v5698_v28  ;;  %v5248_v33 = vrot.slane %v5146_v22, %v1639_v24 }
0x10c5   :  { %v1782_v37 = vadd.f32 %v1781_v4, %v5152_v63  ;;  %v1895_v6 = vadd.f32 %v1894_v54, %v5155_v13  ;;  %v1783_v5 = vpop.f32.mrb[33].mxu0  ;;  %v1896_v52 = vpop.f32.mrb[21].mxu1  ;;  %3396 = vmatprep.subr.bf16.mxu0 %v3395_v51  ;;  %3428 = vmatprep.subr.bf16.mxu1 %v3427_v20  ;;  %v3403_v41 = vpack.c.bf16 %v5695_v40, %v5694_v35  ;;  %v5697_v51 = vld [vmem:[#allocation172_spill] sm:$0xff]  ;;  %v5700_v12 = vld [vmem:[#allocation155_spill] sm:$0xff]  ;;  %v5702_v54 = vld [vmem:[#allocation141_spill] sm:$0xff] }
0x10c6   :  { %v1784_v0 = vadd.f32 %v1783_v5, %v5160_v58  ;;  %v1897_v1 = vadd.f32 %v1896_v52, %v5163_v14  ;;  %2420 = vmatprep.mubr.f32.mxu0 %v2170_v45  ;;  %2525 = vmatprep.mubr.f32.mxu1 %v2172_v60  ;;  %v3435_v56 = vpack.c.bf16 %v5697_v51, %v5696_v50 }
0x10c7   :  { %v2179_v9 = vmax.f32 %v1895_v6, 0.0  ;;  %2421 = vmatmul.mubr.f32.gmra.mrb[62].mxu0 %v2169_v30  ;;  %2526 = vmatmul.mubr.f32.gmra.mrb[50].mxu1 %v2171_v21  ;;  %v2177_v10 = vmax.f32 %v1782_v37, 0.0  ;;  %v5701_v21 = vld [vmem:[#allocation156_spill] sm:$0xff]  ;;  %v5253_v47 = vrot.slane %v5146_v22, %v1643_v25  ;;  %v5256_v44 = vrot.slane %v5146_v22, %v1647_v42  ;;  %v5704_v37 = vld [vmem:[#allocation173_spill] sm:$0xff]  ;;  %v5705_v6 = vld [vmem:[#allocation174_spill] sm:$0xff] }
0x10c8   :  { %v2178_v26 = vmax.f32 %v1784_v0, 0.0  ;;  %v2180_v27 = vmax.f32 %v1897_v1, 0.0  ;;  %v1787_v32 = vpop.f32.mrb[34].mxu0  ;;  %v1900_v34 = vpop.f32.mrb[22].mxu1  ;;  %3398 = vmatpush3.bf16.msra.mxu0 %v3397_v38  ;;  %3430 = vmatpush3.bf16.msra.mxu1 %v3429_v7  ;;  %v3437_v17 = vpack.c.bf16 %v5701_v21, %v5700_v12  ;;  %v3407_v59 = vpack.c.bf16 %v5703_v46, %v5702_v54 }
0x10c9   :  { %v1788_v11 = vadd.f32 %v1787_v32, %v5152_v63  ;;  %v1901_v43 = vadd.f32 %v1900_v34, %v5155_v13  ;;  %v1789_v48 = vpop.f32.mrb[35].mxu0  ;;  %v1902_v49 = vpop.f32.mrb[23].mxu1  ;;  %3400 = vmatprep.subr.bf16.mxu0 %v3399_v55  ;;  %3432 = vmatprep.subr.bf16.mxu1 %v3431_v53  ;;  %v3439_v5 = vpack.c.bf16 %v5705_v6, %v5704_v37 }
0x10ca   :  { %v1790_v16 = vadd.f32 %v1789_v48, %v5160_v58  ;;  %v1903_v57 = vadd.f32 %v1902_v49, %v5163_v14  ;;  %2425 = vmatprep.mubr.f32.mxu0 %v2178_v26  ;;  %2530 = vmatprep.mubr.f32.mxu1 %v2180_v27 }
0x10cb   :  { %v2187_v20 = vmax.f32 %v1901_v43, 0.0  ;;  %2426 = vmatmul.mubr.f32.gmra.mrb[64].mxu0 %v2177_v10  ;;  %2531 = vmatmul.mubr.f32.gmra.mrb[52].mxu1 %v2179_v9  ;;  %v2185_v7 = vmax.f32 %v1788_v11, 0.0  ;;  %v5709_v9 = vld [vmem:[#allocation158_spill] sm:$0xff] }
0x10cc   :  { %v2186_v38 = vmax.f32 %v1790_v16, 0.0  ;;  %v2188_v45 = vmax.f32 %v1903_v57, 0.0  ;;  %v1793_v60 = vpop.f32.mrb[36].mxu0  ;;  %v1906_v4 = vpop.f32.mrb[24].mxu1  ;;  %3402 = vmatpush3.bf16.msra.mxu0 %v3401_v8  ;;  %3434 = vmatpush3.bf16.msra.mxu1 %v3433_v19  ;;  %v3409_v8 = vpack.c.bf16 %v5707_v3, %v5706_v2 }
0x10cd   :  { %v1794_v15 = vadd.f32 %v1793_v60, %v5152_v63  ;;  %v1907_v61 = vadd.f32 %v1906_v4, %v5155_v13  ;;  %v1795_v55 = vpop.f32.mrb[37].mxu0  ;;  %v1908_v30 = vpop.f32.mrb[25].mxu1  ;;  %3404 = vmatprep.subr.bf16.mxu0 %v3403_v41  ;;  %3436 = vmatprep.subr.bf16.mxu1 %v3435_v56 }
0x10ce   :  { %v1796_v52 = vadd.f32 %v1795_v55, %v5160_v58  ;;  %v1909_v29 = vadd.f32 %v1908_v30, %v5163_v14  ;;  %2430 = vmatprep.mubr.f32.mxu0 %v2186_v38  ;;  %2535 = vmatprep.mubr.f32.mxu1 %v2188_v45  ;;  %v5708_v58 = vld [vmem:[#allocation157_spill] sm:$0xff] }
0x10cf   :  { %v2195_v53 = vmax.f32 %v1907_v61, 0.0  ;;  %2431 = vmatmul.mubr.f32.gmra.mrb[66].mxu0 %v2185_v7  ;;  %2536 = vmatmul.mubr.f32.gmra.mrb[54].mxu1 %v2187_v20  ;;  %v3441_v14 = vpack.c.bf16 %v5709_v9, %v5708_v58  ;;  %v2193_v18 = vmax.f32 %v1794_v15, 0.0 }
0x10d0   :  { %v2194_v63 = vmax.f32 %v1796_v52, 0.0  ;;  %v2196_v13 = vmax.f32 %v1909_v29, 0.0  ;;  %v1977_v0 = vpop.f32.mrb[38].mxu0  ;;  %v2090_v1 = vpop.f32.mrb[26].mxu1  ;;  %3406 = vmatpush3.bf16.msra.mxu0 %v3405_v36  ;;  %3438 = vmatpush3.bf16.msra.mxu1 %v3437_v17 }
0x10d1   :  { %v1978_v31 = vadd.f32 %v1977_v0, %v5248_v33  ;;  %v2091_v22 = vadd.f32 %v2090_v1, %v5256_v44  ;;  %v1979_v19 = vpop.f32.mrb[39].mxu0  ;;  %v2092_v24 = vpop.f32.mrb[27].mxu1  ;;  %3408 = vmatprep.subr.bf16.mxu0 %v3407_v59  ;;  %3440 = vmatprep.subr.bf16.mxu1 %v3439_v5 }
0x10d2   :  { %v1980_v25 = vadd.f32 %v1979_v19, %v5253_v47  ;;  %v2093_v26 = vadd.f32 %v2092_v24, %v5267_v23  ;;  %2435 = vmatprep.mubr.f32.mxu0 %v2194_v63  ;;  %2540 = vmatprep.mubr.f32.mxu1 %v2196_v13 }
0x10d3   :  { %v2143_v27 = vmax.f32 %v2091_v22, 0.0  ;;  %2436 = vmatmul.mubr.f32.gmra.mrb[68].mxu0 %v2193_v18  ;;  %2541 = vmatmul.mubr.f32.gmra.mrb[56].mxu1 %v2195_v53  ;;  %v2141_v41 = vmax.f32 %v1978_v31, 0.0 }
0x10d4   :  { %v2142_v32 = vmax.f32 %v1980_v25, 0.0  ;;  %v2144_v34 = vmax.f32 %v2093_v26, 0.0  ;;  %v1983_v35 = vpop.f32.mrb[40].mxu0  ;;  %v2096_v40 = vpop.f32.mrb[28].mxu1  ;;  %3410 = vmatpush3.bf16.msra.mxu0 %v3409_v8  ;;  %3442 = vmatpush3.bf16.msra.mxu1 %v3441_v14 }
0x10d5   :  { %v1984_v42 = vadd.f32 %v1983_v35, %v5248_v33  ;;  %v2097_v10 = vadd.f32 %v2096_v40, %v5256_v44  ;;  %v1985_v11 = vpop.f32.mrb[41].mxu0  ;;  %v2098_v43 = vpop.f32.mrb[29].mxu1 }
0x10d6   :  { %v1986_v48 = vadd.f32 %v1985_v11, %v5253_v47  ;;  %v2099_v49 = vadd.f32 %v2098_v43, %v5267_v23  ;;  %2610 = vmatprep.mubr.f32.mxu0 %v2142_v32  ;;  %2715 = vmatprep.mubr.f32.mxu1 %v2144_v34 }
0x10d7   :  { %v2151_v50 = vmax.f32 %v2097_v10, 0.0  ;;  %2611 = vmatmul.mubr.f32.vlgmr.msra.gmra.mrb[70].mxu0 %v2141_v41  ;;  %2716 = vmatmul.mubr.f32.vlgmr.msra.gmra.mrb[58].mxu1 %v2143_v27  ;;  %v2149_v28 = vmax.f32 %v1984_v42, 0.0 }
0x10d8   :  { %v2150_v51 = vmax.f32 %v1986_v48, 0.0  ;;  %v2152_v56 = vmax.f32 %v2099_v49, 0.0  ;;  %v1989_v16 = vpop.f32.mrb[42].mxu0  ;;  %v2102_v57 = vpop.f32.mrb[30].mxu1 }
0x10d9   :  { %v1990_v39 = vadd.f32 %v1989_v16, %v5248_v33  ;;  %v2103_v36 = vadd.f32 %v2102_v57, %v5256_v44  ;;  %v1991_v62 = vpop.f32.mrb[43].mxu0  ;;  %v2104_v20 = vpop.f32.mrb[31].mxu1 }
0x10da   :  { %v1992_v12 = vadd.f32 %v1991_v62, %v5253_v47  ;;  %v2105_v21 = vadd.f32 %v2104_v20, %v5267_v23  ;;  %2615 = vmatprep.mubr.f32.mxu0 %v2150_v51  ;;  %2720 = vmatprep.mubr.f32.mxu1 %v2152_v56 }
0x10db   :  { %v2159_v17 = vmax.f32 %v2103_v36, 0.0  ;;  %2616 = vmatmul.mubr.f32.gmra.mrb[72].mxu0 %v2149_v28  ;;  %2721 = vmatmul.mubr.f32.gmra.mrb[60].mxu1 %v2151_v50  ;;  %v2157_v54 = vmax.f32 %v1990_v39, 0.0 }
0x10dc   :  { %v2158_v38 = vmax.f32 %v1992_v12, 0.0  ;;  %v2160_v45 = vmax.f32 %v2105_v21, 0.0  ;;  %v1995_v60 = vpop.f32.mrb[44].mxu0  ;;  %v2108_v4 = vpop.f32.mrb[32].mxu1 }
0x10dd   :  { %v1996_v46 = vadd.f32 %v1995_v60, %v5248_v33  ;;  %v2109_v59 = vadd.f32 %v2108_v4, %v5256_v44  ;;  %v1997_v7 = vpop.f32.mrb[45].mxu0  ;;  %v2110_v15 = vpop.f32.mrb[33].mxu1 }
0x10de   :  { %v1998_v61 = vadd.f32 %v1997_v7, %v5253_v47  ;;  %v2111_v55 = vadd.f32 %v2110_v15, %v5267_v23  ;;  %2620 = vmatprep.mubr.f32.mxu0 %v2158_v38  ;;  %2725 = vmatprep.mubr.f32.mxu1 %v2160_v45 }
0x10df   :  { %v2167_v30 = vmax.f32 %v2109_v59, 0.0  ;;  %2621 = vmatmul.mubr.f32.gmra.mrb[74].mxu0 %v2157_v54  ;;  %2726 = vmatmul.mubr.f32.gmra.mrb[62].mxu1 %v2159_v17  ;;  %v2165_v29 = vmax.f32 %v1996_v46, 0.0 }
0x10e0   :  { %v2166_v37 = vmax.f32 %v1998_v61, 0.0  ;;  %v2168_v6 = vmax.f32 %v2111_v55, 0.0  ;;  %v2001_v5 = vpop.f32.mrb[46].mxu0  ;;  %v2114_v52 = vpop.f32.mrb[34].mxu1 }
0x10e1   :  { %v2002_v53 = vadd.f32 %v2001_v5, %v5248_v33  ;;  %v2115_v63 = vadd.f32 %v2114_v52, %v5256_v44  ;;  %v2003_v13 = vpop.f32.mrb[47].mxu0  ;;  %v2116_v0 = vpop.f32.mrb[35].mxu1 }
0x10e2   :  { %v2004_v1 = vadd.f32 %v2003_v13, %v5253_v47  ;;  %v2117_v2 = vadd.f32 %v2116_v0, %v5267_v23  ;;  %2625 = vmatprep.mubr.f32.mxu0 %v2166_v37  ;;  %2730 = vmatprep.mubr.f32.mxu1 %v2168_v6 }
0x10e3   :  { %v2175_v3 = vmax.f32 %v2115_v63, 0.0  ;;  %2626 = vmatmul.mubr.f32.gmra.mrb[76].mxu0 %v2165_v29  ;;  %2731 = vmatmul.mubr.f32.gmra.mrb[64].mxu1 %v2167_v30  ;;  %v2173_v18 = vmax.f32 %v2002_v53, 0.0 }
0x10e4   :  { %v2174_v8 = vmax.f32 %v2004_v1, 0.0  ;;  %v2176_v58 = vmax.f32 %v2117_v2, 0.0  ;;  %v2007_v9 = vpop.f32.mrb[48].mxu0  ;;  %v2120_v14 = vpop.f32.mrb[36].mxu1 }
0x10e5   :  { %v2008_v31 = vadd.f32 %v2007_v9, %v5248_v33  ;;  %v2121_v22 = vadd.f32 %v2120_v14, %v5256_v44  ;;  %v2009_v19 = vpop.f32.mrb[49].mxu0  ;;  %v2122_v24 = vpop.f32.mrb[37].mxu1 }
0x10e6   :  { %v2010_v25 = vadd.f32 %v2009_v19, %v5253_v47  ;;  %v2123_v26 = vadd.f32 %v2122_v24, %v5267_v23  ;;  %2630 = vmatprep.mubr.f32.mxu0 %v2174_v8  ;;  %2735 = vmatprep.mubr.f32.mxu1 %v2176_v58 }
0x10e7   :  { %v2183_v27 = vmax.f32 %v2121_v22, 0.0  ;;  %2631 = vmatmul.mubr.f32.gmra.mrb[78].mxu0 %v2173_v18  ;;  %2736 = vmatmul.mubr.f32.gmra.mrb[66].mxu1 %v2175_v3  ;;  %v2181_v41 = vmax.f32 %v2008_v31, 0.0 }
0x10e8   :  { %v2182_v32 = vmax.f32 %v2010_v25, 0.0  ;;  %v2184_v34 = vmax.f32 %v2123_v26, 0.0  ;;  %v2013_v35 = vpop.f32.mrb[50].mxu0  ;;  %v2126_v40 = vpop.f32.mrb[38].mxu1 }
0x10e9   :  { %v2014_v42 = vadd.f32 %v2013_v35, %v5248_v33  ;;  %v2127_v10 = vadd.f32 %v2126_v40, %v5256_v44  ;;  %v2015_v11 = vpop.f32.mrb[51].mxu0  ;;  %v2128_v43 = vpop.f32.mrb[39].mxu1 }
0x10ea   :  { %v2016_v48 = vadd.f32 %v2015_v11, %v5253_v47  ;;  %v2129_v49 = vadd.f32 %v2128_v43, %v5267_v23  ;;  %2635 = vmatprep.mubr.f32.mxu0 %v2182_v32  ;;  %2740 = vmatprep.mubr.f32.mxu1 %v2184_v34 }
0x10eb   :  { %v2191_v50 = vmax.f32 %v2127_v10, 0.0  ;;  %2636 = vmatmul.mubr.f32.gmra.mrb[80].mxu0 %v2181_v41  ;;  %2741 = vmatmul.mubr.f32.gmra.mrb[68].mxu1 %v2183_v27  ;;  %v2189_v28 = vmax.f32 %v2014_v42, 0.0 }
0x10ec   :  { %v2190_v51 = vmax.f32 %v2016_v48, 0.0  ;;  %v2192_v56 = vmax.f32 %v2129_v49, 0.0  ;;  %v2019_v16 = vpop.f32.mrb[52].mxu0  ;;  %v2132_v57 = vpop.f32.mrb[40].mxu1 }
0x10ed   :  { %v2020_v39 = vadd.f32 %v2019_v16, %v5248_v33  ;;  %v2133_v36 = vadd.f32 %v2132_v57, %v5256_v44  ;;  %v2021_v62 = vpop.f32.mrb[53].mxu0  ;;  %v2134_v20 = vpop.f32.mrb[41].mxu1 }
0x10ee   :  { %v2022_v12 = vadd.f32 %v2021_v62, %v5253_v47  ;;  %v2135_v21 = vadd.f32 %v2134_v20, %v5267_v23  ;;  %2640 = vmatprep.mubr.f32.mxu0 %v2190_v51  ;;  %2745 = vmatprep.mubr.f32.mxu1 %v2192_v56  ;;  %v2880_v47 = vld [vmem:[%s5357_s6] ss:$0 sm:$0xff]  ;;  %s3526_s6 = smov [#allocation7]  }
0x10ef   :  { %v2199_v17 = vmax.f32 %v2133_v36, 0.0  ;;  %2641 = vmatmul.mubr.f32.gmra.mrb[82].mxu0 %v2189_v28  ;;  %2746 = vmatmul.mubr.f32.gmra.mrb[70].mxu1 %v2191_v50  ;;  %v2197_v60 = vmax.f32 %v2020_v39, 0.0  ;;  %s2777_s15 = sshll.u32 %s3526_s6, 4  ;;  %s2778_s15 = int_to_ptr.vmem [resolvable:$true] %s2777_s15 }
0x10f0   :  { %v2198_v38 = vmax.f32 %v2022_v12, 0.0  ;;  %v2200_v45 = vmax.f32 %v2135_v21, 0.0  ;;  %s3496_s16 = scalar_lea.vmem %s2778_s15, 1024  ;;  %p3501_p1 = scmp.lt.s32.totalorder %s2778_s15, %s2778_s15 }
0x10f1   :  { %p3497_p0 = scmp.ne.s32.totalorder %s2778_s15, %s3496_s16  ;;  %p3502_p2 = scmp.lt.s32.totalorder %s3496_s16, %s3496_s16 }
0x10f2   :  { %2645 = vmatprep.mubr.f32.mxu0 %v2198_v38  ;;  %2750 = vmatprep.mubr.f32.mxu1 %v2200_v45 }
0x10f3   :  { %2646 = vmatmul.mubr.f32.gmra.mrb[84].mxu0 %v2197_v60  ;;  %2751 = vmatmul.mubr.f32.gmra.mrb[72].mxu1 %v2199_v17  ;;  %p3503_p3 = por %p3502_p2, %p3501_p1 }
0x10f5   :  { %p3504_p4 = pnand %p3503_p3, %p3497_p0 }
0x118a   :  { %v2915_v33 = vpop.f32.mrb[54].mxu0  ;;  %v2971_v44 = vpop.f32.mrb[42].mxu1 }
0x118b   :  { %v2916_v4 = vpop.f32.mrb[55].mxu0  ;;  %v2972_v23 = vpop.f32.mrb[43].mxu1 }
0x118c   :  { %v2917_v54 = vadd.f32 %v2916_v4, %v2915_v33  ;;  %v2973_v46 = vadd.f32 %v2972_v23, %v2971_v44 }
0x118e   :  { %v2403_v59 = vadd.f32 %v2917_v54, %v2880_v47  ;;  %v2918_v7 = vpop.f32.mrb[56].mxu0  ;;  %v2974_v15 = vpop.f32.mrb[44].mxu1 }
0x118f   :  { %v2919_v61 = vpop.f32.mrb[57].mxu0  ;;  %v2975_v55 = vpop.f32.mrb[45].mxu1 }
0x1190   :  { %v2508_v30 = vadd.f32 %v2973_v46, %v2403_v59  ;;  %v2920_v37 = vadd.f32 %v2919_v61, %v2918_v7  ;;  %v2976_v6 = vadd.f32 %v2975_v55, %v2974_v15 }
0x1192   :  { %v2408_v5 = vadd.f32 %v2920_v37, %v2880_v47  ;;  %v2921_v52 = vpop.f32.mrb[58].mxu0  ;;  %v2977_v29 = vpop.f32.mrb[46].mxu1 }
0x1193   :  { %v2922_v53 = vpop.f32.mrb[59].mxu0  ;;  %v2978_v63 = vpop.f32.mrb[47].mxu1 }
0x1194   :  { %v2513_v13 = vadd.f32 %v2976_v6, %v2408_v5  ;;  %v2923_v0 = vadd.f32 %v2922_v53, %v2921_v52  ;;  %v2979_v1 = vadd.f32 %v2978_v63, %v2977_v29  ;;  %v5710_v29 = vld [vmem:[#allocation175_spill] sm:$0xff] }
0x1196   :  { %v2413_v2 = vadd.f32 %v2923_v0, %v2880_v47  ;;  %v2924_v3 = vpop.f32.mrb[60].mxu0  ;;  %v2980_v8 = vpop.f32.mrb[48].mxu1 }
0x1197   :  { %v2925_v58 = vpop.f32.mrb[61].mxu0  ;;  %v2981_v9 = vpop.f32.mrb[49].mxu1 }
0x1198   :  { %v2518_v14 = vadd.f32 %v2979_v1, %v2413_v2  ;;  %v2926_v18 = vadd.f32 %v2925_v58, %v2924_v3  ;;  %v2982_v31 = vadd.f32 %v2981_v9, %v2980_v8 }
0x119a   :  { %v2418_v22 = vadd.f32 %v2926_v18, %v2880_v47  ;;  %v2927_v19 = vpop.f32.mrb[62].mxu0  ;;  %v2983_v24 = vpop.f32.mrb[50].mxu1 }
0x119b   :  { %v2928_v25 = vpop.f32.mrb[63].mxu0  ;;  %v2984_v26 = vpop.f32.mrb[51].mxu1 }
0x119c   :  { %v5308_v27 = vadd.f32 %v2982_v31, %v2418_v22  ;;  %v2929_v32 = vadd.f32 %v2928_v25, %v2927_v19  ;;  %v2985_v34 = vadd.f32 %v2984_v26, %v2983_v24 }
0x119e   :  { %v2423_v35 = vadd.f32 %v2929_v32, %v2880_v47  ;;  %v2930_v40 = vpop.f32.mrb[64].mxu0  ;;  %v2986_v41 = vpop.f32.mrb[52].mxu1  ;;  %v5712_v32 = vld [vmem:[#allocation178_spill] sm:$0xff] }
0x119f   :  { %v2931_v42 = vpop.f32.mrb[65].mxu0  ;;  %v2987_v10 = vpop.f32.mrb[53].mxu1 }
0x11a0   :  { %v5310_v11 = vadd.f32 %v2985_v34, %v2423_v35  ;;  %v2932_v43 = vadd.f32 %v2931_v42, %v2930_v40  ;;  %v2988_v48 = vadd.f32 %v2987_v10, %v2986_v41 }
0x11a2   :  { %v2428_v49 = vadd.f32 %v2932_v43, %v2880_v47  ;;  %v2933_v50 = vpop.f32.mrb[66].mxu0  ;;  %v2989_v51 = vpop.f32.mrb[54].mxu1 }
0x11a3   :  { %v2934_v56 = vpop.f32.mrb[67].mxu0  ;;  %v2990_v16 = vpop.f32.mrb[55].mxu1 }
0x11a4   :  { %v5312_v57 = vadd.f32 %v2988_v48, %v2428_v49  ;;  %v2935_v28 = vadd.f32 %v2934_v56, %v2933_v50  ;;  %v2991_v39 = vadd.f32 %v2990_v16, %v2989_v51  ;;  %v5713_v49 = vld [vmem:[#allocation179_spill] sm:$0xff] }
0x11a6   :  { %v2433_v36 = vadd.f32 %v2935_v28, %v2880_v47  ;;  %v2936_v62 = vpop.f32.mrb[68].mxu0  ;;  %v2992_v20 = vpop.f32.mrb[56].mxu1 }
0x11a7   :  { %v2937_v12 = vpop.f32.mrb[69].mxu0  ;;  %v2993_v21 = vpop.f32.mrb[57].mxu1 }
0x11a8   :  { %v5314_v17 = vadd.f32 %v2991_v39, %v2433_v36  ;;  %v2938_v38 = vadd.f32 %v2937_v12, %v2936_v62  ;;  %v2994_v45 = vadd.f32 %v2993_v21, %v2992_v20  ;;  %v5714_v20 = vld [vmem:[#allocation180_spill] sm:$0xff] }
0x11aa   :  { %v2438_v60 = vadd.f32 %v2938_v38, %v2880_v47  ;;  %v3027_v33 = vpop.f32.mrb[70].mxu0  ;;  %v3083_v44 = vpop.f32.mrb[58].mxu1 }
0x11ab   :  { %v3028_v4 = vpop.f32.mrb[71].mxu0  ;;  %v3084_v23 = vpop.f32.mrb[59].mxu1 }
0x11ac   :  { %v5316_v54 = vadd.f32 %v2994_v45, %v2438_v60  ;;  %v3029_v46 = vadd.f32 %v3028_v4, %v3027_v33  ;;  %v3085_v59 = vadd.f32 %v3084_v23, %v3083_v44  ;;  %v5715_v23 = vld [vmem:[#allocation181_spill] sm:$0xff] }
0x11ae   :  { %v2613_v7 = vadd.f32 %v3029_v46, %v2508_v30  ;;  %v3030_v15 = vpop.f32.mrb[72].mxu0  ;;  %v3086_v61 = vpop.f32.mrb[60].mxu1  ;;  %v5711_v30 = vld [vmem:[#allocation177_spill] sm:$0xff] }
0x11af   :  { %v3031_v55 = vpop.f32.mrb[73].mxu0  ;;  %v3087_v37 = vpop.f32.mrb[61].mxu1 }
0x11b0   :  { %v2718_v6 = vadd.f32 %v3085_v59, %v2613_v7  ;;  %v3032_v5 = vadd.f32 %v3031_v55, %v3030_v15  ;;  %v3088_v52 = vadd.f32 %v3087_v37, %v3086_v61 }
0x11b2   :  { %v2756_v53 = vadd.f32 %v2718_v6, %v5710_v29  ;;  %v2618_v63 = vadd.f32 %v3032_v5, %v2513_v13  ;;  %v3033_v47 = vpop.f32.mrb[74].mxu0  ;;  %v3089_v0 = vpop.f32.mrb[62].mxu1  ;;  %v5716_v5 = vld [vmem:[#allocation182_spill] sm:$0xff] }
0x11b3   :  { %v3034_v1 = vpop.f32.mrb[75].mxu0  ;;  %v3090_v2 = vpop.f32.mrb[63].mxu1 }
0x11b4   :  { %2764 = vst.msk [vmem:[#allocation7] sm:$0xff] %vm808_vm1, %v2756_v53  ;;  %v2723_v3 = vadd.f32 %v3088_v52, %v2618_v63  ;;  %v3035_v8 = vadd.f32 %v3034_v1, %v3033_v47  ;;  %v3091_v58 = vadd.f32 %v3090_v2, %v3089_v0 }
0x11b6   :  { %v2757_v9 = vadd.f32 %v2723_v3, %v5711_v30  ;;  %v2623_v18 = vadd.f32 %v3035_v8, %v2518_v14  ;;  %v3036_v31 = vpop.f32.mrb[76].mxu0  ;;  %v3092_v22 = vpop.f32.mrb[64].mxu1 }
0x11b7   :  { %v3037_v19 = vpop.f32.mrb[77].mxu0  ;;  %v3093_v24 = vpop.f32.mrb[65].mxu1 }
0x11b8   :  { %2765 = vst.msk [vmem:[#allocation7 + $0x8] sm:$0xff] %vm808_vm1, %v2757_v9  ;;  %v2728_v25 = vadd.f32 %v3091_v58, %v2623_v18  ;;  %v3038_v13 = vadd.f32 %v3037_v19, %v3036_v31  ;;  %v3094_v26 = vadd.f32 %v3093_v24, %v3092_v22 }
0x11ba   :  { %v2758_v34 = vadd.f32 %v2728_v25, %v5712_v32  ;;  %v2628_v35 = vadd.f32 %v3038_v13, %v5308_v27  ;;  %v3039_v40 = vpop.f32.mrb[78].mxu0  ;;  %v3095_v41 = vpop.f32.mrb[66].mxu1 }
0x11bb   :  { %v3040_v42 = vpop.f32.mrb[79].mxu0  ;;  %v3096_v10 = vpop.f32.mrb[67].mxu1 }
0x11bc   :  { %2766 = vst.msk [vmem:[#allocation7 + $0x10] sm:$0xff] %vm808_vm1, %v2758_v34  ;;  %v2733_v14 = vadd.f32 %v3094_v26, %v2628_v35  ;;  %v3041_v43 = vadd.f32 %v3040_v42, %v3039_v40  ;;  %v3097_v48 = vadd.f32 %v3096_v10, %v3095_v41 }
0x11be   :  { %v2759_v50 = vadd.f32 %v2733_v14, %v5713_v49  ;;  %v2633_v51 = vadd.f32 %v3041_v43, %v5310_v11  ;;  %v3042_v56 = vpop.f32.mrb[80].mxu0  ;;  %v3098_v16 = vpop.f32.mrb[68].mxu1 }
0x11bf   :  { %v3043_v28 = vpop.f32.mrb[81].mxu0  ;;  %v3099_v39 = vpop.f32.mrb[69].mxu1 }
0x11c0   :  { %2767 = vst.msk [vmem:[#allocation7 + $0x18] sm:$0xff] %vm808_vm1, %v2759_v50  ;;  %v2738_v27 = vadd.f32 %v3097_v48, %v2633_v51  ;;  %v3044_v36 = vadd.f32 %v3043_v28, %v3042_v56  ;;  %v3100_v62 = vadd.f32 %v3099_v39, %v3098_v16 }
0x11c2   :  { %v2760_v12 = vadd.f32 %v2738_v27, %v5714_v20  ;;  %v2638_v21 = vadd.f32 %v3044_v36, %v5312_v57  ;;  %v3045_v38 = vpop.f32.mrb[82].mxu0  ;;  %v3101_v45 = vpop.f32.mrb[70].mxu1 }
0x11c3   :  { %v3046_v60 = vpop.f32.mrb[83].mxu0  ;;  %v3102_v33 = vpop.f32.mrb[71].mxu1 }
0x11c4   :  { %2768 = vst.msk [vmem:[#allocation7 + $0x20] sm:$0xff] %vm808_vm1, %v2760_v12  ;;  %v2743_v11 = vadd.f32 %v3100_v62, %v2638_v21  ;;  %v3047_v44 = vadd.f32 %v3046_v60, %v3045_v38  ;;  %v3103_v4 = vadd.f32 %v3102_v33, %v3101_v45 }
0x11c6   :  { %v2761_v46 = vadd.f32 %v2743_v11, %v5715_v23  ;;  %v2643_v59 = vadd.f32 %v3047_v44, %v5314_v17  ;;  %v3048_v7 = vpop.f32.mrb[84].mxu0  ;;  %v3104_v15 = vpop.f32.mrb[72].mxu1  ;;  %v5717_v17 = vld [vmem:[#allocation183_spill] sm:$0xff] }
0x11c7   :  { %v3049_v61 = vpop.f32.mrb[85].mxu0  ;;  %v3105_v55 = vpop.f32.mrb[73].mxu1 }
0x11c8   :  { %2769 = vst.msk [vmem:[#allocation7 + $0x28] sm:$0xff] %vm808_vm1, %v2761_v46  ;;  %v2748_v57 = vadd.f32 %v3103_v4, %v2643_v59  ;;  %v3050_v37 = vadd.f32 %v3049_v61, %v3048_v7  ;;  %v3106_v6 = vadd.f32 %v3105_v55, %v3104_v15 }
0x11ca   :  { %v2762_v52 = vadd.f32 %v2748_v57, %v5716_v5  ;;  %v2648_v29 = vadd.f32 %v3050_v37, %v5316_v54 }
0x11cc   :  { %2770 = vst.msk [vmem:[#allocation7 + $0x30] sm:$0xff] %vm808_vm1, %v2762_v52  ;;  %v2753_v53 = vadd.f32 %v3106_v6, %v2648_v29 }
0x11ce   :  { %v2763_v63 = vadd.f32 %v2753_v53, %v5717_v17 }
0x11d0   :  { %2771 = vst.msk [vmem:[#allocation7 + $0x38] sm:$0xff] %vm808_vm1, %v2763_v63 }
0x11d1   :  { %3507 = shalt.err (!%p3504_p4)
}
0x11d2   :  { %s3508_s7 = scalar_lea.hbm %s5360_s9, 1024 }
0x11d3   :  { %p3509_p5 = scmp.ne.s32.totalorder %s5360_s9, %s3508_s7  ;;  %p3512_p6 = scmp.lt.u32.totalorder %s3508_s7, %s5360_s9 }
0x11d5   :  { %p3514_p7 = pnand %p3512_p6, %p3509_p5 }
0x11d7   :  { %3517 = shalt.err (!%p3514_p7)
}
0x11d8   :  { %s3527_s21 = smov 128   ;;  %s3528_s22 = smov 8  }
0x11d9   :  { %2783 = dma.vmem_to_hbm [thread:$0]  %s2778_s15, 1024, %s5360_s9, [#allocation8], %s3527_s21, %s3527_s21, %s3528_s22  }
0x11da   :  { %3522 = dma.done.wait [#allocation8], 1024  }
0x11db   :  { %3523 = vsyncadd [#allocation8], 4294966272 }
0x11dc   :  { %2787 = vsyncpa [#allocation8], 1 }
0x11dd   :  { %2788 = vsyncmov [#allocation6] }
0x11e0   :  { %s2789_s24 = vpop.sfrf %2788 }
0x11e1   :  { %p2881_p8 = scmp.ne.s32.totalorder %s2789_s24, 0 }
0x11e3   :  { %2793 = shalt.err (%p2881_p8)  }
0x11e4   :  { %2795 = vsyncmov [#allocation6 + $0x1] }
0x11e7   :  { %s2796_s25 = vpop.sfrf %2795 }
0x11e8   :  { %p2882_p9 = scmp.ne.s32.totalorder %s2796_s25, 0 }
0x11ea   :  { %2800 = shalt.err (%p2882_p9)  }

</bundles_post_ra>
